<compile_context>
chip_gen: v7x
topology: tpu7x:2x2x1
jax: 0.10.0
libtpu: 0.0.40
codegen_flags: <defaults>
</compile_context>

<pallas_src>
import functools

import jax
import jax.numpy as jnp
from jax.experimental import pallas as pl
from jax.experimental.pallas import tpu as pltpu

# ---- model hyperparameters (module defaults) -------------------------------
MAX_LEN = 10
VOCAB_SIZE = 3
HIDDEN = 64
V = VOCAB_SIZE + 1          # input feature dim == number of query rows
LQ = V
OUT_DIM = MAX_LEN + 1       # 11
OUT_PAD = 16                # sublane-padded stored rows per query (16 >= 11)
LN_EPS = 1e-5
SUB = 128                   # inner lane sub-tile = one vreg lane width


def attention_kernel(x_ref, q_ref, wkvt_ref, cols_ref, wft_ref, bf_ref,
                     out_ref, attn_ref, kv_scr):
    # x_ref    : (S, V, BT)       batch-in-lanes input tile
    # q_ref    : (LQ, H)          query (score-matmul LHS)
    # wkvt_ref : (H, V)           W_kv^T
    # cols_ref : (H, 8)           columns: [b_kv | gamma | beta | q^T (LQ cols) | 0]
    # wft_ref  : (OUT_PAD, H)     W_f^T, rows OUT_DIM..OUT_PAD-1 zero
    # bf_ref   : (OUT_PAD, 1)     b_f column (zero padded)
    # out_ref  : (LQ*OUT_PAD, BT) lane-dense output slab
    # attn_ref : (S*LQ, BT)       lane-dense attention-weight slab
    # kv_scr   : (S, H, SUB)      VMEM scratch holding kv for one lane sub-tile
    S, Vd, BT = x_ref.shape
    LQn, H = q_ref.shape
    OUTP = wft_ref.shape[0]
    scale = 1.0 / (H ** 0.5)

    @pl.loop(0, BT // SUB)                     # rolled: bounds vreg live ranges
    def _(t):
        off = pl.multiple_of(t * SUB, SUB)
        lanes = pl.ds(off, SUB)

        # ---- kv projection + scores per s; kv staged in VMEM scratch -------
        sc = []
        for s in range(S):
            kv_s = jnp.dot(wkvt_ref[...], x_ref[s, :, lanes],
                           preferred_element_type=jnp.float32) \
                   + cols_ref[:, 0:1]                               # (H, SUB)
            kv_scr[s] = kv_s
            sc.append(jnp.dot(q_ref[...], kv_s,
                              preferred_element_type=jnp.float32) * scale)  # (LQ, SUB)

        # ---- softmax over s: pure-VPU elementwise on (LQ, SUB) slabs -------
        m = sc[0]
        for s in range(1, S):
            m = jnp.maximum(m, sc[s])
        e = [jnp.exp(sc[s] - m) for s in range(S)]
        den = e[0]
        for s in range(1, S):
            den = den + e[s]
        inv = pl.reciprocal(den, approx=False)   # exact: attn checked to 1e-5
        a = [e[s] * inv for s in range(S)]

        # one aligned, lane-dense store of all attention weights for this tile
        attn_ref[:, lanes] = jnp.concatenate(a, axis=0)             # (S*LQ, SUB)

        # ---- weighted sum + residual + LayerNorm + final dense per query ---
        for iq in range(LQn):
            ws = a[0][iq:iq + 1, :] * kv_scr[0]                     # sublane bcast
            for s in range(1, S):
                ws = ws + a[s][iq:iq + 1, :] * kv_scr[s]            # (H, SUB)
            h = ws + cols_ref[:, 3 + iq:4 + iq]                     # residual (+ Q row)
            mean = jnp.mean(h, axis=0, keepdims=True)               # (1, SUB)
            var = jnp.mean((h - mean) ** 2, axis=0, keepdims=True)
            dec = ((h - mean) * jax.lax.rsqrt(var + LN_EPS)
                   * cols_ref[:, 1:2] + cols_ref[:, 2:3])           # LayerNorm
            out_q = jnp.dot(wft_ref[...], dec,
                            preferred_element_type=jnp.float32) + bf_ref[...]  # (OUT_PAD, SUB)
            out_ref[iq * OUTP:(iq + 1) * OUTP, lanes] = out_q


def _round_up(n, m):
    return ((n + m - 1) // m) * m


@functools.partial(jax.jit, static_argnames=("block_b",))
def attention_model_forward(x, params, block_b=1024):
    """x: (B, S, V) float32. Returns (output, enc_attention_weights, None)."""
    B, S, Vin = x.shape
    assert Vin == V
    q, w_kv, b_kv, gamma, beta, w_f, b_f = params

    # ---- batch tiling: batch lives in the lane dimension --------------------
    Bp0 = _round_up(B, SUB)
    BT = min(_round_up(block_b, SUB), Bp0)
    if Bp0 == BT and BT >= 2 * SUB:          # keep >=2 grid steps for v7x megacore
        BT = _round_up(BT // 2, SUB)
    Bp = _round_up(Bp0, BT)
    grid = Bp // BT

    # batch-in-lanes input layout: (S, V, Bp)
    x_t = jnp.transpose(x, (1, 2, 0))
    if Bp != B:
        x_t = jnp.pad(x_t, ((0, 0), (0, 0), (0, Bp - B)))

    # consolidated per-H column parameters: [b_kv | gamma | beta | q^T | 0]
    cols = jnp.zeros((HIDDEN, 8), jnp.float32)
    cols = cols.at[:, 0].set(b_kv).at[:, 1].set(gamma).at[:, 2].set(beta)
    cols = cols.at[:, 3:3 + LQ].set(q.T)

    wkv_t = w_kv.T                                                   # (H, V)
    wf_t = jnp.zeros((OUT_PAD, HIDDEN), jnp.float32).at[:OUT_DIM, :].set(w_f.T)
    bf_c = jnp.zeros((OUT_PAD, 1), jnp.float32).at[:OUT_DIM, 0].set(b_f)

    flops_elem = (2 * S * V * HIDDEN + 2 * S * LQ * HIDDEN + 4 * S * LQ
                  + 2 * S * LQ * HIDDEN + 10 * LQ * HIDDEN
                  + 2 * LQ * HIDDEN * OUT_PAD)
    cost = pl.CostEstimate(
        flops=Bp * flops_elem,
        transcendentals=Bp * (S * LQ + 2 * LQ),
        bytes_accessed=4 * (x_t.size + LQ * OUT_PAD * Bp + S * LQ * Bp)
        + 4 * grid * (q.size + wkv_t.size + cols.size + wf_t.size + bf_c.size),
    )

    grid_spec = pltpu.PrefetchScalarGridSpec(
        num_scalar_prefetch=0,
        grid=(grid,),
        in_specs=[
            pl.BlockSpec((S, V, BT), lambda i: (0, 0, i)),           # x (batch in lanes)
            pl.BlockSpec((LQ, HIDDEN), lambda i: (0, 0)),            # query
            pl.BlockSpec((HIDDEN, V), lambda i: (0, 0)),             # W_kv^T
            pl.BlockSpec((HIDDEN, 8), lambda i: (0, 0)),             # b_kv|gamma|beta|q^T
            pl.BlockSpec((OUT_PAD, HIDDEN), lambda i: (0, 0)),       # W_f^T (padded)
            pl.BlockSpec((OUT_PAD, 1), lambda i: (0, 0)),            # b_f column
        ],
        out_specs=[
            pl.BlockSpec((LQ * OUT_PAD, BT), lambda i: (0, i)),      # output slab
            pl.BlockSpec((S * LQ, BT), lambda i: (0, i)),            # attention slab
        ],
        scratch_shapes=[pltpu.VMEM((S, HIDDEN, SUB), jnp.float32)],  # kv sub-tile
    )

    # Per-step VMEM footprint is ~3 MiB even at BT=2048, so the default scoped
    # VMEM limits on v5e/v6e/v7x are fine without vmem_limit_bytes overrides.
    out_t, attn_t = pl.pallas_call(
        attention_kernel,
        out_shape=(jax.ShapeDtypeStruct((LQ * OUT_PAD, Bp), jnp.float32),
                   jax.ShapeDtypeStruct((S * LQ, Bp), jnp.float32)),
        grid_spec=grid_spec,
        compiler_params=pltpu.CompilerParams(
            dimension_semantics=("parallel",)),
        cost_estimate=cost,
    )(x_t, q, wkv_t, cols, wf_t, bf_c)

    # Undo the kernel-friendly layouts / padding outside the kernel (cheap XLA).
    output = jnp.transpose(out_t.reshape(LQ, OUT_PAD, Bp),
                           (2, 0, 1))[:B, :, :OUT_DIM]               # (B, LQ, OUT_DIM)
    enc_attn = jnp.transpose(attn_t.reshape(S, LQ, Bp),
                             (2, 1, 0))[:B]                          # (B, LQ, S)

    # TODO(synk): self_att=True branch (second attention over `decoding`) not
    # implemented; module default is self_att=False -> returns None.
    return output, enc_attn, None


def init_params(key):
    """Deterministic parameter init matching the module's shapes."""
    k1, k2, k3, k4 = jax.random.split(key, 4)
    q = jax.random.normal(k1, (LQ, HIDDEN), jnp.float32) * 0.1       # query (1,V,H) -> (V,H)
    w_kv = jax.random.normal(k2, (V, HIDDEN), jnp.float32) * 0.1     # Linear(V, H), (in,out)
    b_kv = jax.random.normal(k3, (HIDDEN,), jnp.float32) * 0.1
    gamma = jnp.ones((HIDDEN,), jnp.float32)                         # LayerNorm defaults
    beta = jnp.zeros((HIDDEN,), jnp.float32)
    w_f = jax.random.normal(k4, (HIDDEN, OUT_DIM), jnp.float32) * 0.1
    b_f = jnp.zeros((OUT_DIM,), jnp.float32)
    return (q, w_kv, b_kv, gamma, beta, w_f, b_f)


def reference_forward(x, params):
    """Pure-JAX reference mirroring the PyTorch module."""
    q, w_kv, b_kv, gamma, beta, w_f, b_f = params
    kv = x @ w_kv + b_kv                                             # (B, S, H)
    qb = jnp.broadcast_to(q[None], (x.shape[0], LQ, HIDDEN))         # (B, Lq, H)
    scores = jnp.einsum('bqh,bsh->bqs', qb, kv) / jnp.sqrt(jnp.float32(HIDDEN))
    attn = jax.nn.softmax(scores, axis=-1)
    ws = jnp.einsum('bqs,bsh->bqh', attn, kv)
    h = ws + qb
    mean = h.mean(-1, keepdims=True)
    var = ((h - mean) ** 2).mean(-1, keepdims=True)
    dec = (h - mean) / jnp.sqrt(var + LN_EPS) * gamma + beta
    out = dec @ w_f + b_f
    return out, attn


if __name__ == "__main__":
    key = jax.random.PRNGKey(0)
    kx, kp = jax.random.split(key)

    B, S = 2, 8
    x = jax.random.normal(kx, (B, S, V), jnp.float32)
    params = init_params(kp)

    out, enc_attn, self_attn = attention_model_forward(x, params)
    out = jax.block_until_ready(out)
    enc_attn = jax.block_until_ready(enc_attn)

    ref_out, ref_attn = reference_forward(x, params)
    assert out.shape == (B, LQ, OUT_DIM)
    assert enc_attn.shape == (B, LQ, S)
    assert self_attn is None
    assert jnp.allclose(out, ref_out, atol=1e-4, rtol=1e-4)
    assert jnp.allclose(enc_attn, ref_attn, atol=1e-5, rtol=1e-5)

    print("KERNEL_OK")
</pallas_src>

<mosaic_0001>
module attributes {stable_mosaic.version = 11 : i64} {
  func.func @attention_kernel(%arg0: i32, %arg1: memref<8x4x128xf32, #tpu.memory_space<vmem>>, %arg2: memref<4x64xf32, #tpu.memory_space<vmem>>, %arg3: memref<64x4xf32, #tpu.memory_space<vmem>>, %arg4: memref<64x8xf32, #tpu.memory_space<vmem>>, %arg5: memref<16x64xf32, #tpu.memory_space<vmem>>, %arg6: memref<16x1xf32, #tpu.memory_space<vmem>>, %arg7: memref<64x128xf32, #tpu.memory_space<vmem>>, %arg8: memref<32x128xf32, #tpu.memory_space<vmem>>, %arg9: memref<8x64x128xf32, #tpu.memory_space<vmem>>) attributes {dimension_semantics = [#tpu.dimension_semantics<parallel>], iteration_bounds = array<i64: 1>, scalar_prefetch = 0 : i64, scratch_operands = 1 : i64, tpu.core_type = #tpu.core_type<tc>, window_params = [{transform_indices = @transform_0, window_bounds = array<i64: 8, 4, 128>}, {pipeline_mode = #tpu.pipeline_mode<synchronous>, transform_indices = @transform_1, window_bounds = array<i64: 4, 64>}, {pipeline_mode = #tpu.pipeline_mode<synchronous>, transform_indices = @transform_2, window_bounds = array<i64: 64, 4>}, {pipeline_mode = #tpu.pipeline_mode<synchronous>, transform_indices = @transform_3, window_bounds = array<i64: 64, 8>}, {pipeline_mode = #tpu.pipeline_mode<synchronous>, transform_indices = @transform_4, window_bounds = array<i64: 16, 64>}, {pipeline_mode = #tpu.pipeline_mode<synchronous>, transform_indices = @transform_5, window_bounds = array<i64: 16, 1>}, {transform_indices = @transform_6, window_bounds = array<i64: 64, 128>}, {transform_indices = @transform_7, window_bounds = array<i64: 32, 128>}]} {
    %c0_i32 = arith.constant 0 : i32
    %c1_i32 = arith.constant 1 : i32
    %0 = arith.muli %c0_i32, %c1_i32 : i32
    %c0_i32_0 = arith.constant 0 : i32
    %1 = arith.addi %c0_i32_0, %0 : i32
    %c128_i32 = arith.constant 128 : i32
    %2 = arith.muli %1, %c128_i32 : i32
    %3 = tpu.assume_multiple %2, 128 : i32
    %c0 = arith.constant 0 : index
    %c0_1 = arith.constant 0 : index
    %4 = vector.load %arg3[%c0, %c0_1] : memref<64x4xf32, #tpu.memory_space<vmem>>, vector<64x4xf32>
    %c0_2 = arith.constant 0 : index
    %c0_3 = arith.constant 0 : index
    %5 = arith.index_cast %3 : i32 to index
    %6 = vector.load %arg1[%c0_2, %c0_3, %5] : memref<8x4x128xf32, #tpu.memory_space<vmem>>, vector<1x4x128xf32>
    %7 = vector.shape_cast %6 : vector<1x4x128xf32> to vector<4x128xf32>
    %cst = arith.constant dense<0.000000e+00> : vector<64x128xf32>
    %8 = tpu.matmul %4, %7, %cst {dimension_numbers = #tpu.dot_dimension_numbers<[1], [0], [0], [1], [0, 0, 1, 1], [], []>} : vector<64x4xf32>, vector<4x128xf32>, vector<64x128xf32> -> vector<64x128xf32>
    %c0_4 = arith.constant 0 : index
    %c0_5 = arith.constant 0 : index
    %9 = vector.load %arg4[%c0_4, %c0_5] : memref<64x8xf32, #tpu.memory_space<vmem>>, vector<64x1xf32>
    %10 = vector.broadcast %9 : vector<64x1xf32> to vector<64x128xf32>
    %11 = arith.addf %8, %10 : vector<64x128xf32>
    %c0_6 = arith.constant 0 : index
    %c0_7 = arith.constant 0 : index
    %c0_8 = arith.constant 0 : index
    %12 = vector.load %arg9[%c0_6, %c0_7, %c0_8] : memref<8x64x128xf32, #tpu.memory_space<vmem>>, vector<1x64x128xf32>
    %13 = vector.shape_cast %12 : vector<1x64x128xf32> to vector<64x128xf32>
    %14 = vector.shape_cast %11 : vector<64x128xf32> to vector<1x64x128xf32>
    tpu.vector_store %arg9[%c0_6, %c0_7, %c0_8], %14 {strides = array<i32>} : memref<8x64x128xf32, #tpu.memory_space<vmem>>, vector<1x64x128xf32>,
    %c0_9 = arith.constant 0 : index
    %c0_10 = arith.constant 0 : index
    %15 = vector.load %arg2[%c0_9, %c0_10] : memref<4x64xf32, #tpu.memory_space<vmem>>, vector<4x64xf32>
    %cst_11 = arith.constant dense<0.000000e+00> : vector<4x128xf32>
    %16 = tpu.matmul %15, %11, %cst_11 {dimension_numbers = #tpu.dot_dimension_numbers<[1], [0], [0], [1], [0, 0, 1, 1], [], []>} : vector<4x64xf32>, vector<64x128xf32>, vector<4x128xf32> -> vector<4x128xf32>
    %cst_12 = arith.constant 1.250000e-01 : f32
    %17 = vector.broadcast %cst_12 : f32 to vector<4x128xf32>
    %18 = arith.mulf %16, %17 : vector<4x128xf32>
    %c0_13 = arith.constant 0 : index
    %c0_14 = arith.constant 0 : index
    %19 = vector.load %arg3[%c0_13, %c0_14] : memref<64x4xf32, #tpu.memory_space<vmem>>, vector<64x4xf32>
    %c1 = arith.constant 1 : index
    %c0_15 = arith.constant 0 : index
    %20 = arith.index_cast %3 : i32 to index
    %21 = vector.load %arg1[%c1, %c0_15, %20] : memref<8x4x128xf32, #tpu.memory_space<vmem>>, vector<1x4x128xf32>
    %22 = vector.shape_cast %21 : vector<1x4x128xf32> to vector<4x128xf32>
    %cst_16 = arith.constant dense<0.000000e+00> : vector<64x128xf32>
    %23 = tpu.matmul %19, %22, %cst_16 {dimension_numbers = #tpu.dot_dimension_numbers<[1], [0], [0], [1], [0, 0, 1, 1], [], []>} : vector<64x4xf32>, vector<4x128xf32>, vector<64x128xf32> -> vector<64x128xf32>
    %c0_17 = arith.constant 0 : index
    %c0_18 = arith.constant 0 : index
    %24 = vector.load %arg4[%c0_17, %c0_18] : memref<64x8xf32, #tpu.memory_space<vmem>>, vector<64x1xf32>
    %25 = vector.broadcast %24 : vector<64x1xf32> to vector<64x128xf32>
    %26 = arith.addf %23, %25 : vector<64x128xf32>
    %c1_19 = arith.constant 1 : index
    %c0_20 = arith.constant 0 : index
    %c0_21 = arith.constant 0 : index
    %27 = vector.load %arg9[%c1_19, %c0_20, %c0_21] : memref<8x64x128xf32, #tpu.memory_space<vmem>>, vector<1x64x128xf32>
    %28 = vector.shape_cast %27 : vector<1x64x128xf32> to vector<64x128xf32>
    %29 = vector.shape_cast %26 : vector<64x128xf32> to vector<1x64x128xf32>
    tpu.vector_store %arg9[%c1_19, %c0_20, %c0_21], %29 {strides = array<i32>} : memref<8x64x128xf32, #tpu.memory_space<vmem>>, vector<1x64x128xf32>,
    %c0_22 = arith.constant 0 : index
    %c0_23 = arith.constant 0 : index
    %30 = vector.load %arg2[%c0_22, %c0_23] : memref<4x64xf32, #tpu.memory_space<vmem>>, vector<4x64xf32>
    %cst_24 = arith.constant dense<0.000000e+00> : vector<4x128xf32>
    %31 = tpu.matmul %30, %26, %cst_24 {dimension_numbers = #tpu.dot_dimension_numbers<[1], [0], [0], [1], [0, 0, 1, 1], [], []>} : vector<4x64xf32>, vector<64x128xf32>, vector<4x128xf32> -> vector<4x128xf32>
    %cst_25 = arith.constant 1.250000e-01 : f32
    %32 = vector.broadcast %cst_25 : f32 to vector<4x128xf32>
    %33 = arith.mulf %31, %32 : vector<4x128xf32>
    %c0_26 = arith.constant 0 : index
    %c0_27 = arith.constant 0 : index
    %34 = vector.load %arg3[%c0_26, %c0_27] : memref<64x4xf32, #tpu.memory_space<vmem>>, vector<64x4xf32>
    %c2 = arith.constant 2 : index
    %c0_28 = arith.constant 0 : index
    %35 = arith.index_cast %3 : i32 to index
    %36 = vector.load %arg1[%c2, %c0_28, %35] : memref<8x4x128xf32, #tpu.memory_space<vmem>>, vector<1x4x128xf32>
    %37 = vector.shape_cast %36 : vector<1x4x128xf32> to vector<4x128xf32>
    %cst_29 = arith.constant dense<0.000000e+00> : vector<64x128xf32>
    %38 = tpu.matmul %34, %37, %cst_29 {dimension_numbers = #tpu.dot_dimension_numbers<[1], [0], [0], [1], [0, 0, 1, 1], [], []>} : vector<64x4xf32>, vector<4x128xf32>, vector<64x128xf32> -> vector<64x128xf32>
    %c0_30 = arith.constant 0 : index
    %c0_31 = arith.constant 0 : index
    %39 = vector.load %arg4[%c0_30, %c0_31] : memref<64x8xf32, #tpu.memory_space<vmem>>, vector<64x1xf32>
    %40 = vector.broadcast %39 : vector<64x1xf32> to vector<64x128xf32>
    %41 = arith.addf %38, %40 : vector<64x128xf32>
    %c2_32 = arith.constant 2 : index
    %c0_33 = arith.constant 0 : index
    %c0_34 = arith.constant 0 : index
    %42 = vector.load %arg9[%c2_32, %c0_33, %c0_34] : memref<8x64x128xf32, #tpu.memory_space<vmem>>, vector<1x64x128xf32>
    %43 = vector.shape_cast %42 : vector<1x64x128xf32> to vector<64x128xf32>
    %44 = vector.shape_cast %41 : vector<64x128xf32> to vector<1x64x128xf32>
    tpu.vector_store %arg9[%c2_32, %c0_33, %c0_34], %44 {strides = array<i32>} : memref<8x64x128xf32, #tpu.memory_space<vmem>>, vector<1x64x128xf32>,
    %c0_35 = arith.constant 0 : index
    %c0_36 = arith.constant 0 : index
    %45 = vector.load %arg2[%c0_35, %c0_36] : memref<4x64xf32, #tpu.memory_space<vmem>>, vector<4x64xf32>
    %cst_37 = arith.constant dense<0.000000e+00> : vector<4x128xf32>
    %46 = tpu.matmul %45, %41, %cst_37 {dimension_numbers = #tpu.dot_dimension_numbers<[1], [0], [0], [1], [0, 0, 1, 1], [], []>} : vector<4x64xf32>, vector<64x128xf32>, vector<4x128xf32> -> vector<4x128xf32>
    %cst_38 = arith.constant 1.250000e-01 : f32
    %47 = vector.broadcast %cst_38 : f32 to vector<4x128xf32>
    %48 = arith.mulf %46, %47 : vector<4x128xf32>
    %c0_39 = arith.constant 0 : index
    %c0_40 = arith.constant 0 : index
    %49 = vector.load %arg3[%c0_39, %c0_40] : memref<64x4xf32, #tpu.memory_space<vmem>>, vector<64x4xf32>
    %c3 = arith.constant 3 : index
    %c0_41 = arith.constant 0 : index
    %50 = arith.index_cast %3 : i32 to index
    %51 = vector.load %arg1[%c3, %c0_41, %50] : memref<8x4x128xf32, #tpu.memory_space<vmem>>, vector<1x4x128xf32>
    %52 = vector.shape_cast %51 : vector<1x4x128xf32> to vector<4x128xf32>
    %cst_42 = arith.constant dense<0.000000e+00> : vector<64x128xf32>
    %53 = tpu.matmul %49, %52, %cst_42 {dimension_numbers = #tpu.dot_dimension_numbers<[1], [0], [0], [1], [0, 0, 1, 1], [], []>} : vector<64x4xf32>, vector<4x128xf32>, vector<64x128xf32> -> vector<64x128xf32>
    %c0_43 = arith.constant 0 : index
    %c0_44 = arith.constant 0 : index
    %54 = vector.load %arg4[%c0_43, %c0_44] : memref<64x8xf32, #tpu.memory_space<vmem>>, vector<64x1xf32>
    %55 = vector.broadcast %54 : vector<64x1xf32> to vector<64x128xf32>
    %56 = arith.addf %53, %55 : vector<64x128xf32>
    %c3_45 = arith.constant 3 : index
    %c0_46 = arith.constant 0 : index
    %c0_47 = arith.constant 0 : index
    %57 = vector.load %arg9[%c3_45, %c0_46, %c0_47] : memref<8x64x128xf32, #tpu.memory_space<vmem>>, vector<1x64x128xf32>
    %58 = vector.shape_cast %57 : vector<1x64x128xf32> to vector<64x128xf32>
    %59 = vector.shape_cast %56 : vector<64x128xf32> to vector<1x64x128xf32>
    tpu.vector_store %arg9[%c3_45, %c0_46, %c0_47], %59 {strides = array<i32>} : memref<8x64x128xf32, #tpu.memory_space<vmem>>, vector<1x64x128xf32>,
    %c0_48 = arith.constant 0 : index
    %c0_49 = arith.constant 0 : index
    %60 = vector.load %arg2[%c0_48, %c0_49] : memref<4x64xf32, #tpu.memory_space<vmem>>, vector<4x64xf32>
    %cst_50 = arith.constant dense<0.000000e+00> : vector<4x128xf32>
    %61 = tpu.matmul %60, %56, %cst_50 {dimension_numbers = #tpu.dot_dimension_numbers<[1], [0], [0], [1], [0, 0, 1, 1], [], []>} : vector<4x64xf32>, vector<64x128xf32>, vector<4x128xf32> -> vector<4x128xf32>
    %cst_51 = arith.constant 1.250000e-01 : f32
    %62 = vector.broadcast %cst_51 : f32 to vector<4x128xf32>
    %63 = arith.mulf %61, %62 : vector<4x128xf32>
    %c0_52 = arith.constant 0 : index
    %c0_53 = arith.constant 0 : index
    %64 = vector.load %arg3[%c0_52, %c0_53] : memref<64x4xf32, #tpu.memory_space<vmem>>, vector<64x4xf32>
    %c4 = arith.constant 4 : index
    %c0_54 = arith.constant 0 : index
    %65 = arith.index_cast %3 : i32 to index
    %66 = vector.load %arg1[%c4, %c0_54, %65] : memref<8x4x128xf32, #tpu.memory_space<vmem>>, vector<1x4x128xf32>
    %67 = vector.shape_cast %66 : vector<1x4x128xf32> to vector<4x128xf32>
    %cst_55 = arith.constant dense<0.000000e+00> : vector<64x128xf32>
    %68 = tpu.matmul %64, %67, %cst_55 {dimension_numbers = #tpu.dot_dimension_numbers<[1], [0], [0], [1], [0, 0, 1, 1], [], []>} : vector<64x4xf32>, vector<4x128xf32>, vector<64x128xf32> -> vector<64x128xf32>
    %c0_56 = arith.constant 0 : index
    %c0_57 = arith.constant 0 : index
    %69 = vector.load %arg4[%c0_56, %c0_57] : memref<64x8xf32, #tpu.memory_space<vmem>>, vector<64x1xf32>
    %70 = vector.broadcast %69 : vector<64x1xf32> to vector<64x128xf32>
    %71 = arith.addf %68, %70 : vector<64x128xf32>
    %c4_58 = arith.constant 4 : index
    %c0_59 = arith.constant 0 : index
    %c0_60 = arith.constant 0 : index
    %72 = vector.load %arg9[%c4_58, %c0_59, %c0_60] : memref<8x64x128xf32, #tpu.memory_space<vmem>>, vector<1x64x128xf32>
    %73 = vector.shape_cast %72 : vector<1x64x128xf32> to vector<64x128xf32>
    %74 = vector.shape_cast %71 : vector<64x128xf32> to vector<1x64x128xf32>
    tpu.vector_store %arg9[%c4_58, %c0_59, %c0_60], %74 {strides = array<i32>} : memref<8x64x128xf32, #tpu.memory_space<vmem>>, vector<1x64x128xf32>,
    %c0_61 = arith.constant 0 : index
    %c0_62 = arith.constant 0 : index
    %75 = vector.load %arg2[%c0_61, %c0_62] : memref<4x64xf32, #tpu.memory_space<vmem>>, vector<4x64xf32>
    %cst_63 = arith.constant dense<0.000000e+00> : vector<4x128xf32>
    %76 = tpu.matmul %75, %71, %cst_63 {dimension_numbers = #tpu.dot_dimension_numbers<[1], [0], [0], [1], [0, 0, 1, 1], [], []>} : vector<4x64xf32>, vector<64x128xf32>, vector<4x128xf32> -> vector<4x128xf32>
    %cst_64 = arith.constant 1.250000e-01 : f32
    %77 = vector.broadcast %cst_64 : f32 to vector<4x128xf32>
    %78 = arith.mulf %76, %77 : vector<4x128xf32>
    %c0_65 = arith.constant 0 : index
    %c0_66 = arith.constant 0 : index
    %79 = vector.load %arg3[%c0_65, %c0_66] : memref<64x4xf32, #tpu.memory_space<vmem>>, vector<64x4xf32>
    %c5 = arith.constant 5 : index
    %c0_67 = arith.constant 0 : index
    %80 = arith.index_cast %3 : i32 to index
    %81 = vector.load %arg1[%c5, %c0_67, %80] : memref<8x4x128xf32, #tpu.memory_space<vmem>>, vector<1x4x128xf32>
    %82 = vector.shape_cast %81 : vector<1x4x128xf32> to vector<4x128xf32>
    %cst_68 = arith.constant dense<0.000000e+00> : vector<64x128xf32>
    %83 = tpu.matmul %79, %82, %cst_68 {dimension_numbers = #tpu.dot_dimension_numbers<[1], [0], [0], [1], [0, 0, 1, 1], [], []>} : vector<64x4xf32>, vector<4x128xf32>, vector<64x128xf32> -> vector<64x128xf32>
    %c0_69 = arith.constant 0 : index
    %c0_70 = arith.constant 0 : index
    %84 = vector.load %arg4[%c0_69, %c0_70] : memref<64x8xf32, #tpu.memory_space<vmem>>, vector<64x1xf32>
    %85 = vector.broadcast %84 : vector<64x1xf32> to vector<64x128xf32>
    %86 = arith.addf %83, %85 : vector<64x128xf32>
    %c5_71 = arith.constant 5 : index
    %c0_72 = arith.constant 0 : index
    %c0_73 = arith.constant 0 : index
    %87 = vector.load %arg9[%c5_71, %c0_72, %c0_73] : memref<8x64x128xf32, #tpu.memory_space<vmem>>, vector<1x64x128xf32>
    %88 = vector.shape_cast %87 : vector<1x64x128xf32> to vector<64x128xf32>
    %89 = vector.shape_cast %86 : vector<64x128xf32> to vector<1x64x128xf32>
    tpu.vector_store %arg9[%c5_71, %c0_72, %c0_73], %89 {strides = array<i32>} : memref<8x64x128xf32, #tpu.memory_space<vmem>>, vector<1x64x128xf32>,
    %c0_74 = arith.constant 0 : index
    %c0_75 = arith.constant 0 : index
    %90 = vector.load %arg2[%c0_74, %c0_75] : memref<4x64xf32, #tpu.memory_space<vmem>>, vector<4x64xf32>
    %cst_76 = arith.constant dense<0.000000e+00> : vector<4x128xf32>
    %91 = tpu.matmul %90, %86, %cst_76 {dimension_numbers = #tpu.dot_dimension_numbers<[1], [0], [0], [1], [0, 0, 1, 1], [], []>} : vector<4x64xf32>, vector<64x128xf32>, vector<4x128xf32> -> vector<4x128xf32>
    %cst_77 = arith.constant 1.250000e-01 : f32
    %92 = vector.broadcast %cst_77 : f32 to vector<4x128xf32>
    %93 = arith.mulf %91, %92 : vector<4x128xf32>
    %c0_78 = arith.constant 0 : index
    %c0_79 = arith.constant 0 : index
    %94 = vector.load %arg3[%c0_78, %c0_79] : memref<64x4xf32, #tpu.memory_space<vmem>>, vector<64x4xf32>
    %c6 = arith.constant 6 : index
    %c0_80 = arith.constant 0 : index
    %95 = arith.index_cast %3 : i32 to index
    %96 = vector.load %arg1[%c6, %c0_80, %95] : memref<8x4x128xf32, #tpu.memory_space<vmem>>, vector<1x4x128xf32>
    %97 = vector.shape_cast %96 : vector<1x4x128xf32> to vector<4x128xf32>
    %cst_81 = arith.constant dense<0.000000e+00> : vector<64x128xf32>
    %98 = tpu.matmul %94, %97, %cst_81 {dimension_numbers = #tpu.dot_dimension_numbers<[1], [0], [0], [1], [0, 0, 1, 1], [], []>} : vector<64x4xf32>, vector<4x128xf32>, vector<64x128xf32> -> vector<64x128xf32>
    %c0_82 = arith.constant 0 : index
    %c0_83 = arith.constant 0 : index
    %99 = vector.load %arg4[%c0_82, %c0_83] : memref<64x8xf32, #tpu.memory_space<vmem>>, vector<64x1xf32>
    %100 = vector.broadcast %99 : vector<64x1xf32> to vector<64x128xf32>
    %101 = arith.addf %98, %100 : vector<64x128xf32>
    %c6_84 = arith.constant 6 : index
    %c0_85 = arith.constant 0 : index
    %c0_86 = arith.constant 0 : index
    %102 = vector.load %arg9[%c6_84, %c0_85, %c0_86] : memref<8x64x128xf32, #tpu.memory_space<vmem>>, vector<1x64x128xf32>
    %103 = vector.shape_cast %102 : vector<1x64x128xf32> to vector<64x128xf32>
    %104 = vector.shape_cast %101 : vector<64x128xf32> to vector<1x64x128xf32>
    tpu.vector_store %arg9[%c6_84, %c0_85, %c0_86], %104 {strides = array<i32>} : memref<8x64x128xf32, #tpu.memory_space<vmem>>, vector<1x64x128xf32>,
    %c0_87 = arith.constant 0 : index
    %c0_88 = arith.constant 0 : index
    %105 = vector.load %arg2[%c0_87, %c0_88] : memref<4x64xf32, #tpu.memory_space<vmem>>, vector<4x64xf32>
    %cst_89 = arith.constant dense<0.000000e+00> : vector<4x128xf32>
    %106 = tpu.matmul %105, %101, %cst_89 {dimension_numbers = #tpu.dot_dimension_numbers<[1], [0], [0], [1], [0, 0, 1, 1], [], []>} : vector<4x64xf32>, vector<64x128xf32>, vector<4x128xf32> -> vector<4x128xf32>
    %cst_90 = arith.constant 1.250000e-01 : f32
    %107 = vector.broadcast %cst_90 : f32 to vector<4x128xf32>
    %108 = arith.mulf %106, %107 : vector<4x128xf32>
    %c0_91 = arith.constant 0 : index
    %c0_92 = arith.constant 0 : index
    %109 = vector.load %arg3[%c0_91, %c0_92] : memref<64x4xf32, #tpu.memory_space<vmem>>, vector<64x4xf32>
    %c7 = arith.constant 7 : index
    %c0_93 = arith.constant 0 : index
    %110 = arith.index_cast %3 : i32 to index
    %111 = vector.load %arg1[%c7, %c0_93, %110] : memref<8x4x128xf32, #tpu.memory_space<vmem>>, vector<1x4x128xf32>
    %112 = vector.shape_cast %111 : vector<1x4x128xf32> to vector<4x128xf32>
    %cst_94 = arith.constant dense<0.000000e+00> : vector<64x128xf32>
    %113 = tpu.matmul %109, %112, %cst_94 {dimension_numbers = #tpu.dot_dimension_numbers<[1], [0], [0], [1], [0, 0, 1, 1], [], []>} : vector<64x4xf32>, vector<4x128xf32>, vector<64x128xf32> -> vector<64x128xf32>
    %c0_95 = arith.constant 0 : index
    %c0_96 = arith.constant 0 : index
    %114 = vector.load %arg4[%c0_95, %c0_96] : memref<64x8xf32, #tpu.memory_space<vmem>>, vector<64x1xf32>
    %115 = vector.broadcast %114 : vector<64x1xf32> to vector<64x128xf32>
    %116 = arith.addf %113, %115 : vector<64x128xf32>
    %c7_97 = arith.constant 7 : index
    %c0_98 = arith.constant 0 : index
    %c0_99 = arith.constant 0 : index
    %117 = vector.load %arg9[%c7_97, %c0_98, %c0_99] : memref<8x64x128xf32, #tpu.memory_space<vmem>>, vector<1x64x128xf32>
    %118 = vector.shape_cast %117 : vector<1x64x128xf32> to vector<64x128xf32>
    %119 = vector.shape_cast %116 : vector<64x128xf32> to vector<1x64x128xf32>
    tpu.vector_store %arg9[%c7_97, %c0_98, %c0_99], %119 {strides = array<i32>} : memref<8x64x128xf32, #tpu.memory_space<vmem>>, vector<1x64x128xf32>,
    %c0_100 = arith.constant 0 : index
    %c0_101 = arith.constant 0 : index
    %120 = vector.load %arg2[%c0_100, %c0_101] : memref<4x64xf32, #tpu.memory_space<vmem>>, vector<4x64xf32>
    %cst_102 = arith.constant dense<0.000000e+00> : vector<4x128xf32>
    %121 = tpu.matmul %120, %116, %cst_102 {dimension_numbers = #tpu.dot_dimension_numbers<[1], [0], [0], [1], [0, 0, 1, 1], [], []>} : vector<4x64xf32>, vector<64x128xf32>, vector<4x128xf32> -> vector<4x128xf32>
    %cst_103 = arith.constant 1.250000e-01 : f32
    %122 = vector.broadcast %cst_103 : f32 to vector<4x128xf32>
    %123 = arith.mulf %121, %122 : vector<4x128xf32>
    %124 = arith.maximumf %18, %33 : vector<4x128xf32>
    %125 = arith.maximumf %124, %48 : vector<4x128xf32>
    %126 = arith.maximumf %125, %63 : vector<4x128xf32>
    %127 = arith.maximumf %126, %78 : vector<4x128xf32>
    %128 = arith.maximumf %127, %93 : vector<4x128xf32>
    %129 = arith.maximumf %128, %108 : vector<4x128xf32>
    %130 = arith.maximumf %129, %123 : vector<4x128xf32>
    %131 = arith.subf %18, %130 : vector<4x128xf32>
    %132 = math.exp %131 : vector<4x128xf32>
    %133 = arith.subf %33, %130 : vector<4x128xf32>
    %134 = math.exp %133 : vector<4x128xf32>
    %135 = arith.subf %48, %130 : vector<4x128xf32>
    %136 = math.exp %135 : vector<4x128xf32>
    %137 = arith.subf %63, %130 : vector<4x128xf32>
    %138 = math.exp %137 : vector<4x128xf32>
    %139 = arith.subf %78, %130 : vector<4x128xf32>
    %140 = math.exp %139 : vector<4x128xf32>
    %141 = arith.subf %93, %130 : vector<4x128xf32>
    %142 = math.exp %141 : vector<4x128xf32>
    %143 = arith.subf %108, %130 : vector<4x128xf32>
    %144 = math.exp %143 : vector<4x128xf32>
    %145 = arith.subf %123, %130 : vector<4x128xf32>
    %146 = math.exp %145 : vector<4x128xf32>
    %147 = arith.addf %132, %134 : vector<4x128xf32>
    %148 = arith.addf %147, %136 : vector<4x128xf32>
    %149 = arith.addf %148, %138 : vector<4x128xf32>
    %150 = arith.addf %149, %140 : vector<4x128xf32>
    %151 = arith.addf %150, %142 : vector<4x128xf32>
    %152 = arith.addf %151, %144 : vector<4x128xf32>
    %153 = arith.addf %152, %146 : vector<4x128xf32>
    %154 = tpu.reciprocal %153 : vector<4x128xf32> -> vector<4x128xf32>
    %155 = arith.mulf %132, %154 : vector<4x128xf32>
    %156 = arith.mulf %134, %154 : vector<4x128xf32>
    %157 = arith.mulf %136, %154 : vector<4x128xf32>
    %158 = arith.mulf %138, %154 : vector<4x128xf32>
    %159 = arith.mulf %140, %154 : vector<4x128xf32>
    %160 = arith.mulf %142, %154 : vector<4x128xf32>
    %161 = arith.mulf %144, %154 : vector<4x128xf32>
    %162 = arith.mulf %146, %154 : vector<4x128xf32>
    %163 = tpu.concatenate %155, %156, %157, %158, %159, %160, %161, %162 in 0 : vector<4x128xf32>, vector<4x128xf32>, vector<4x128xf32>, vector<4x128xf32>, vector<4x128xf32>, vector<4x128xf32>, vector<4x128xf32>, vector<4x128xf32> -> vector<32x128xf32>
    %c0_104 = arith.constant 0 : index
    %164 = arith.index_cast %3 : i32 to index
    %165 = vector.load %arg8[%c0_104, %164] : memref<32x128xf32, #tpu.memory_space<vmem>>, vector<32x128xf32>
    tpu.vector_store %arg8[%c0_104, %164], %163 {strides = array<i32>} : memref<32x128xf32, #tpu.memory_space<vmem>>, vector<32x128xf32>,
    %166 = vector.extract_strided_slice %155 {offsets = [0, 0], sizes = [1, 128], strides = [1, 1]} : vector<4x128xf32> to vector<1x128xf32>
    %c0_105 = arith.constant 0 : index
    %c0_106 = arith.constant 0 : index
    %c0_107 = arith.constant 0 : index
    %167 = vector.load %arg9[%c0_105, %c0_106, %c0_107] : memref<8x64x128xf32, #tpu.memory_space<vmem>>, vector<1x64x128xf32>
    %168 = vector.shape_cast %167 : vector<1x64x128xf32> to vector<64x128xf32>
    %169 = vector.broadcast %166 : vector<1x128xf32> to vector<64x128xf32>
    %170 = arith.mulf %169, %168 : vector<64x128xf32>
    %171 = vector.extract_strided_slice %156 {offsets = [0, 0], sizes = [1, 128], strides = [1, 1]} : vector<4x128xf32> to vector<1x128xf32>
    %c1_108 = arith.constant 1 : index
    %c0_109 = arith.constant 0 : index
    %c0_110 = arith.constant 0 : index
    %172 = vector.load %arg9[%c1_108, %c0_109, %c0_110] : memref<8x64x128xf32, #tpu.memory_space<vmem>>, vector<1x64x128xf32>
    %173 = vector.shape_cast %172 : vector<1x64x128xf32> to vector<64x128xf32>
    %174 = vector.broadcast %171 : vector<1x128xf32> to vector<64x128xf32>
    %175 = arith.mulf %174, %173 : vector<64x128xf32>
    %176 = arith.addf %170, %175 : vector<64x128xf32>
    %177 = vector.extract_strided_slice %157 {offsets = [0, 0], sizes = [1, 128], strides = [1, 1]} : vector<4x128xf32> to vector<1x128xf32>
    %c2_111 = arith.constant 2 : index
    %c0_112 = arith.constant 0 : index
    %c0_113 = arith.constant 0 : index
    %178 = vector.load %arg9[%c2_111, %c0_112, %c0_113] : memref<8x64x128xf32, #tpu.memory_space<vmem>>, vector<1x64x128xf32>
    %179 = vector.shape_cast %178 : vector<1x64x128xf32> to vector<64x128xf32>
    %180 = vector.broadcast %177 : vector<1x128xf32> to vector<64x128xf32>
    %181 = arith.mulf %180, %179 : vector<64x128xf32>
    %182 = arith.addf %176, %181 : vector<64x128xf32>
    %183 = vector.extract_strided_slice %158 {offsets = [0, 0], sizes = [1, 128], strides = [1, 1]} : vector<4x128xf32> to vector<1x128xf32>
    %c3_114 = arith.constant 3 : index
    %c0_115 = arith.constant 0 : index
    %c0_116 = arith.constant 0 : index
    %184 = vector.load %arg9[%c3_114, %c0_115, %c0_116] : memref<8x64x128xf32, #tpu.memory_space<vmem>>, vector<1x64x128xf32>
    %185 = vector.shape_cast %184 : vector<1x64x128xf32> to vector<64x128xf32>
    %186 = vector.broadcast %183 : vector<1x128xf32> to vector<64x128xf32>
    %187 = arith.mulf %186, %185 : vector<64x128xf32>
    %188 = arith.addf %182, %187 : vector<64x128xf32>
    %189 = vector.extract_strided_slice %159 {offsets = [0, 0], sizes = [1, 128], strides = [1, 1]} : vector<4x128xf32> to vector<1x128xf32>
    %c4_117 = arith.constant 4 : index
    %c0_118 = arith.constant 0 : index
    %c0_119 = arith.constant 0 : index
    %190 = vector.load %arg9[%c4_117, %c0_118, %c0_119] : memref<8x64x128xf32, #tpu.memory_space<vmem>>, vector<1x64x128xf32>
    %191 = vector.shape_cast %190 : vector<1x64x128xf32> to vector<64x128xf32>
    %192 = vector.broadcast %189 : vector<1x128xf32> to vector<64x128xf32>
    %193 = arith.mulf %192, %191 : vector<64x128xf32>
    %194 = arith.addf %188, %193 : vector<64x128xf32>
    %195 = vector.extract_strided_slice %160 {offsets = [0, 0], sizes = [1, 128], strides = [1, 1]} : vector<4x128xf32> to vector<1x128xf32>
    %c5_120 = arith.constant 5 : index
    %c0_121 = arith.constant 0 : index
    %c0_122 = arith.constant 0 : index
    %196 = vector.load %arg9[%c5_120, %c0_121, %c0_122] : memref<8x64x128xf32, #tpu.memory_space<vmem>>, vector<1x64x128xf32>
    %197 = vector.shape_cast %196 : vector<1x64x128xf32> to vector<64x128xf32>
    %198 = vector.broadcast %195 : vector<1x128xf32> to vector<64x128xf32>
    %199 = arith.mulf %198, %197 : vector<64x128xf32>
    %200 = arith.addf %194, %199 : vector<64x128xf32>
    %201 = vector.extract_strided_slice %161 {offsets = [0, 0], sizes = [1, 128], strides = [1, 1]} : vector<4x128xf32> to vector<1x128xf32>
    %c6_123 = arith.constant 6 : index
    %c0_124 = arith.constant 0 : index
    %c0_125 = arith.constant 0 : index
    %202 = vector.load %arg9[%c6_123, %c0_124, %c0_125] : memref<8x64x128xf32, #tpu.memory_space<vmem>>, vector<1x64x128xf32>
    %203 = vector.shape_cast %202 : vector<1x64x128xf32> to vector<64x128xf32>
    %204 = vector.broadcast %201 : vector<1x128xf32> to vector<64x128xf32>
    %205 = arith.mulf %204, %203 : vector<64x128xf32>
    %206 = arith.addf %200, %205 : vector<64x128xf32>
    %207 = vector.extract_strided_slice %162 {offsets = [0, 0], sizes = [1, 128], strides = [1, 1]} : vector<4x128xf32> to vector<1x128xf32>
    %c7_126 = arith.constant 7 : index
    %c0_127 = arith.constant 0 : index
    %c0_128 = arith.constant 0 : index
    %208 = vector.load %arg9[%c7_126, %c0_127, %c0_128] : memref<8x64x128xf32, #tpu.memory_space<vmem>>, vector<1x64x128xf32>
    %209 = vector.shape_cast %208 : vector<1x64x128xf32> to vector<64x128xf32>
    %210 = vector.broadcast %207 : vector<1x128xf32> to vector<64x128xf32>
    %211 = arith.mulf %210, %209 : vector<64x128xf32>
    %212 = arith.addf %206, %211 : vector<64x128xf32>
    %c0_129 = arith.constant 0 : index
    %c3_130 = arith.constant 3 : index
    %213 = vector.load %arg4[%c0_129, %c3_130] : memref<64x8xf32, #tpu.memory_space<vmem>>, vector<64x1xf32>
    %214 = vector.broadcast %213 : vector<64x1xf32> to vector<64x128xf32>
    %215 = arith.addf %212, %214 : vector<64x128xf32>
    %cst_131 = arith.constant dense<0.000000e+00> : vector<128xf32>
    %216 = vector.multi_reduction <add>, %215, %cst_131 [0] : vector<64x128xf32> to vector<128xf32>
    %217 = vector.shape_cast %216 : vector<128xf32> to vector<1x128xf32>
    %cst_132 = arith.constant 6.400000e+01 : f32
    %218 = vector.broadcast %cst_132 : f32 to vector<1x128xf32>
    %219 = arith.divf %217, %218 : vector<1x128xf32>
    %220 = vector.broadcast %219 : vector<1x128xf32> to vector<64x128xf32>
    %221 = arith.subf %215, %220 : vector<64x128xf32>
    %222 = arith.mulf %221, %221 : vector<64x128xf32>
    %cst_133 = arith.constant dense<0.000000e+00> : vector<128xf32>
    %223 = vector.multi_reduction <add>, %222, %cst_133 [0] : vector<64x128xf32> to vector<128xf32>
    %224 = vector.shape_cast %223 : vector<128xf32> to vector<1x128xf32>
    %cst_134 = arith.constant 6.400000e+01 : f32
    %225 = vector.broadcast %cst_134 : f32 to vector<1x128xf32>
    %226 = arith.divf %224, %225 : vector<1x128xf32>
    %227 = vector.broadcast %219 : vector<1x128xf32> to vector<64x128xf32>
    %228 = arith.subf %215, %227 : vector<64x128xf32>
    %cst_135 = arith.constant 9.99999974E-6 : f32
    %229 = vector.broadcast %cst_135 : f32 to vector<1x128xf32>
    %230 = arith.addf %226, %229 : vector<1x128xf32>
    %231 = math.rsqrt %230 : vector<1x128xf32>
    %232 = vector.broadcast %231 : vector<1x128xf32> to vector<64x128xf32>
    %233 = arith.mulf %228, %232 : vector<64x128xf32>
    %c0_136 = arith.constant 0 : index
    %c1_137 = arith.constant 1 : index
    %234 = vector.load %arg4[%c0_136, %c1_137] : memref<64x8xf32, #tpu.memory_space<vmem>>, vector<64x1xf32>
    %235 = vector.broadcast %234 : vector<64x1xf32> to vector<64x128xf32>
    %236 = arith.mulf %233, %235 : vector<64x128xf32>
    %c0_138 = arith.constant 0 : index
    %c2_139 = arith.constant 2 : index
    %237 = vector.load %arg4[%c0_138, %c2_139] : memref<64x8xf32, #tpu.memory_space<vmem>>, vector<64x1xf32>
    %238 = vector.broadcast %237 : vector<64x1xf32> to vector<64x128xf32>
    %239 = arith.addf %236, %238 : vector<64x128xf32>
    %c0_140 = arith.constant 0 : index
    %c0_141 = arith.constant 0 : index
    %240 = vector.load %arg5[%c0_140, %c0_141] : memref<16x64xf32, #tpu.memory_space<vmem>>, vector<16x64xf32>
    %cst_142 = arith.constant dense<0.000000e+00> : vector<16x128xf32>
    %241 = tpu.matmul %240, %239, %cst_142 {dimension_numbers = #tpu.dot_dimension_numbers<[1], [0], [0], [1], [0, 0, 1, 1], [], []>} : vector<16x64xf32>, vector<64x128xf32>, vector<16x128xf32> -> vector<16x128xf32>
    %c0_143 = arith.constant 0 : index
    %c0_144 = arith.constant 0 : index
    %242 = vector.load %arg6[%c0_143, %c0_144] : memref<16x1xf32, #tpu.memory_space<vmem>>, vector<16x1xf32>
    %243 = vector.broadcast %242 : vector<16x1xf32> to vector<16x128xf32>
    %244 = arith.addf %241, %243 : vector<16x128xf32>
    %c0_145 = arith.constant 0 : index
    %245 = arith.index_cast %3 : i32 to index
    %246 = vector.load %arg7[%c0_145, %245] : memref<64x128xf32, #tpu.memory_space<vmem>>, vector<16x128xf32>
    tpu.vector_store %arg7[%c0_145, %245], %244 {strides = array<i32>} : memref<64x128xf32, #tpu.memory_space<vmem>>, vector<16x128xf32>,
    %247 = vector.extract_strided_slice %155 {offsets = [1, 0], sizes = [1, 128], strides = [1, 1]} : vector<4x128xf32> to vector<1x128xf32>
    %c0_146 = arith.constant 0 : index
    %c0_147 = arith.constant 0 : index
    %c0_148 = arith.constant 0 : index
    %248 = vector.load %arg9[%c0_146, %c0_147, %c0_148] : memref<8x64x128xf32, #tpu.memory_space<vmem>>, vector<1x64x128xf32>
    %249 = vector.shape_cast %248 : vector<1x64x128xf32> to vector<64x128xf32>
    %250 = vector.broadcast %247 : vector<1x128xf32> to vector<64x128xf32>
    %251 = arith.mulf %250, %249 : vector<64x128xf32>
    %252 = vector.extract_strided_slice %156 {offsets = [1, 0], sizes = [1, 128], strides = [1, 1]} : vector<4x128xf32> to vector<1x128xf32>
    %c1_149 = arith.constant 1 : index
    %c0_150 = arith.constant 0 : index
    %c0_151 = arith.constant 0 : index
    %253 = vector.load %arg9[%c1_149, %c0_150, %c0_151] : memref<8x64x128xf32, #tpu.memory_space<vmem>>, vector<1x64x128xf32>
    %254 = vector.shape_cast %253 : vector<1x64x128xf32> to vector<64x128xf32>
    %255 = vector.broadcast %252 : vector<1x128xf32> to vector<64x128xf32>
    %256 = arith.mulf %255, %254 : vector<64x128xf32>
    %257 = arith.addf %251, %256 : vector<64x128xf32>
    %258 = vector.extract_strided_slice %157 {offsets = [1, 0], sizes = [1, 128], strides = [1, 1]} : vector<4x128xf32> to vector<1x128xf32>
    %c2_152 = arith.constant 2 : index
    %c0_153 = arith.constant 0 : index
    %c0_154 = arith.constant 0 : index
    %259 = vector.load %arg9[%c2_152, %c0_153, %c0_154] : memref<8x64x128xf32, #tpu.memory_space<vmem>>, vector<1x64x128xf32>
    %260 = vector.shape_cast %259 : vector<1x64x128xf32> to vector<64x128xf32>
    %261 = vector.broadcast %258 : vector<1x128xf32> to vector<64x128xf32>
    %262 = arith.mulf %261, %260 : vector<64x128xf32>
    %263 = arith.addf %257, %262 : vector<64x128xf32>
    %264 = vector.extract_strided_slice %158 {offsets = [1, 0], sizes = [1, 128], strides = [1, 1]} : vector<4x128xf32> to vector<1x128xf32>
    %c3_155 = arith.constant 3 : index
    %c0_156 = arith.constant 0 : index
    %c0_157 = arith.constant 0 : index
    %265 = vector.load %arg9[%c3_155, %c0_156, %c0_157] : memref<8x64x128xf32, #tpu.memory_space<vmem>>, vector<1x64x128xf32>
    %266 = vector.shape_cast %265 : vector<1x64x128xf32> to vector<64x128xf32>
    %267 = vector.broadcast %264 : vector<1x128xf32> to vector<64x128xf32>
    %268 = arith.mulf %267, %266 : vector<64x128xf32>
    %269 = arith.addf %263, %268 : vector<64x128xf32>
    %270 = vector.extract_strided_slice %159 {offsets = [1, 0], sizes = [1, 128], strides = [1, 1]} : vector<4x128xf32> to vector<1x128xf32>
    %c4_158 = arith.constant 4 : index
    %c0_159 = arith.constant 0 : index
    %c0_160 = arith.constant 0 : index
    %271 = vector.load %arg9[%c4_158, %c0_159, %c0_160] : memref<8x64x128xf32, #tpu.memory_space<vmem>>, vector<1x64x128xf32>
    %272 = vector.shape_cast %271 : vector<1x64x128xf32> to vector<64x128xf32>
    %273 = vector.broadcast %270 : vector<1x128xf32> to vector<64x128xf32>
    %274 = arith.mulf %273, %272 : vector<64x128xf32>
    %275 = arith.addf %269, %274 : vector<64x128xf32>
    %276 = vector.extract_strided_slice %160 {offsets = [1, 0], sizes = [1, 128], strides = [1, 1]} : vector<4x128xf32> to vector<1x128xf32>
    %c5_161 = arith.constant 5 : index
    %c0_162 = arith.constant 0 : index
    %c0_163 = arith.constant 0 : index
    %277 = vector.load %arg9[%c5_161, %c0_162, %c0_163] : memref<8x64x128xf32, #tpu.memory_space<vmem>>, vector<1x64x128xf32>
    %278 = vector.shape_cast %277 : vector<1x64x128xf32> to vector<64x128xf32>
    %279 = vector.broadcast %276 : vector<1x128xf32> to vector<64x128xf32>
    %280 = arith.mulf %279, %278 : vector<64x128xf32>
    %281 = arith.addf %275, %280 : vector<64x128xf32>
    %282 = vector.extract_strided_slice %161 {offsets = [1, 0], sizes = [1, 128], strides = [1, 1]} : vector<4x128xf32> to vector<1x128xf32>
    %c6_164 = arith.constant 6 : index
    %c0_165 = arith.constant 0 : index
    %c0_166 = arith.constant 0 : index
    %283 = vector.load %arg9[%c6_164, %c0_165, %c0_166] : memref<8x64x128xf32, #tpu.memory_space<vmem>>, vector<1x64x128xf32>
    %284 = vector.shape_cast %283 : vector<1x64x128xf32> to vector<64x128xf32>
    %285 = vector.broadcast %282 : vector<1x128xf32> to vector<64x128xf32>
    %286 = arith.mulf %285, %284 : vector<64x128xf32>
    %287 = arith.addf %281, %286 : vector<64x128xf32>
    %288 = vector.extract_strided_slice %162 {offsets = [1, 0], sizes = [1, 128], strides = [1, 1]} : vector<4x128xf32> to vector<1x128xf32>
    %c7_167 = arith.constant 7 : index
    %c0_168 = arith.constant 0 : index
    %c0_169 = arith.constant 0 : index
    %289 = vector.load %arg9[%c7_167, %c0_168, %c0_169] : memref<8x64x128xf32, #tpu.memory_space<vmem>>, vector<1x64x128xf32>
    %290 = vector.shape_cast %289 : vector<1x64x128xf32> to vector<64x128xf32>
    %291 = vector.broadcast %288 : vector<1x128xf32> to vector<64x128xf32>
    %292 = arith.mulf %291, %290 : vector<64x128xf32>
    %293 = arith.addf %287, %292 : vector<64x128xf32>
    %c0_170 = arith.constant 0 : index
    %c4_171 = arith.constant 4 : index
    %294 = vector.load %arg4[%c0_170, %c4_171] : memref<64x8xf32, #tpu.memory_space<vmem>>, vector<64x1xf32>
    %295 = vector.broadcast %294 : vector<64x1xf32> to vector<64x128xf32>
    %296 = arith.addf %293, %295 : vector<64x128xf32>
    %cst_172 = arith.constant dense<0.000000e+00> : vector<128xf32>
    %297 = vector.multi_reduction <add>, %296, %cst_172 [0] : vector<64x128xf32> to vector<128xf32>
    %298 = vector.shape_cast %297 : vector<128xf32> to vector<1x128xf32>
    %cst_173 = arith.constant 6.400000e+01 : f32
    %299 = vector.broadcast %cst_173 : f32 to vector<1x128xf32>
    %300 = arith.divf %298, %299 : vector<1x128xf32>
    %301 = vector.broadcast %300 : vector<1x128xf32> to vector<64x128xf32>
    %302 = arith.subf %296, %301 : vector<64x128xf32>
    %303 = arith.mulf %302, %302 : vector<64x128xf32>
    %cst_174 = arith.constant dense<0.000000e+00> : vector<128xf32>
    %304 = vector.multi_reduction <add>, %303, %cst_174 [0] : vector<64x128xf32> to vector<128xf32>
    %305 = vector.shape_cast %304 : vector<128xf32> to vector<1x128xf32>
    %cst_175 = arith.constant 6.400000e+01 : f32
    %306 = vector.broadcast %cst_175 : f32 to vector<1x128xf32>
    %307 = arith.divf %305, %306 : vector<1x128xf32>
    %308 = vector.broadcast %300 : vector<1x128xf32> to vector<64x128xf32>
    %309 = arith.subf %296, %308 : vector<64x128xf32>
    %cst_176 = arith.constant 9.99999974E-6 : f32
    %310 = vector.broadcast %cst_176 : f32 to vector<1x128xf32>
    %311 = arith.addf %307, %310 : vector<1x128xf32>
    %312 = math.rsqrt %311 : vector<1x128xf32>
    %313 = vector.broadcast %312 : vector<1x128xf32> to vector<64x128xf32>
    %314 = arith.mulf %309, %313 : vector<64x128xf32>
    %c0_177 = arith.constant 0 : index
    %c1_178 = arith.constant 1 : index
    %315 = vector.load %arg4[%c0_177, %c1_178] : memref<64x8xf32, #tpu.memory_space<vmem>>, vector<64x1xf32>
    %316 = vector.broadcast %315 : vector<64x1xf32> to vector<64x128xf32>
    %317 = arith.mulf %314, %316 : vector<64x128xf32>
    %c0_179 = arith.constant 0 : index
    %c2_180 = arith.constant 2 : index
    %318 = vector.load %arg4[%c0_179, %c2_180] : memref<64x8xf32, #tpu.memory_space<vmem>>, vector<64x1xf32>
    %319 = vector.broadcast %318 : vector<64x1xf32> to vector<64x128xf32>
    %320 = arith.addf %317, %319 : vector<64x128xf32>
    %c0_181 = arith.constant 0 : index
    %c0_182 = arith.constant 0 : index
    %321 = vector.load %arg5[%c0_181, %c0_182] : memref<16x64xf32, #tpu.memory_space<vmem>>, vector<16x64xf32>
    %cst_183 = arith.constant dense<0.000000e+00> : vector<16x128xf32>
    %322 = tpu.matmul %321, %320, %cst_183 {dimension_numbers = #tpu.dot_dimension_numbers<[1], [0], [0], [1], [0, 0, 1, 1], [], []>} : vector<16x64xf32>, vector<64x128xf32>, vector<16x128xf32> -> vector<16x128xf32>
    %c0_184 = arith.constant 0 : index
    %c0_185 = arith.constant 0 : index
    %323 = vector.load %arg6[%c0_184, %c0_185] : memref<16x1xf32, #tpu.memory_space<vmem>>, vector<16x1xf32>
    %324 = vector.broadcast %323 : vector<16x1xf32> to vector<16x128xf32>
    %325 = arith.addf %322, %324 : vector<16x128xf32>
    %c16 = arith.constant 16 : index
    %326 = arith.index_cast %3 : i32 to index
    %327 = vector.load %arg7[%c16, %326] : memref<64x128xf32, #tpu.memory_space<vmem>>, vector<16x128xf32>
    tpu.vector_store %arg7[%c16, %326], %325 {strides = array<i32>} : memref<64x128xf32, #tpu.memory_space<vmem>>, vector<16x128xf32>,
    %328 = vector.extract_strided_slice %155 {offsets = [2, 0], sizes = [1, 128], strides = [1, 1]} : vector<4x128xf32> to vector<1x128xf32>
    %c0_186 = arith.constant 0 : index
    %c0_187 = arith.constant 0 : index
    %c0_188 = arith.constant 0 : index
    %329 = vector.load %arg9[%c0_186, %c0_187, %c0_188] : memref<8x64x128xf32, #tpu.memory_space<vmem>>, vector<1x64x128xf32>
    %330 = vector.shape_cast %329 : vector<1x64x128xf32> to vector<64x128xf32>
    %331 = vector.broadcast %328 : vector<1x128xf32> to vector<64x128xf32>
    %332 = arith.mulf %331, %330 : vector<64x128xf32>
    %333 = vector.extract_strided_slice %156 {offsets = [2, 0], sizes = [1, 128], strides = [1, 1]} : vector<4x128xf32> to vector<1x128xf32>
    %c1_189 = arith.constant 1 : index
    %c0_190 = arith.constant 0 : index
    %c0_191 = arith.constant 0 : index
    %334 = vector.load %arg9[%c1_189, %c0_190, %c0_191] : memref<8x64x128xf32, #tpu.memory_space<vmem>>, vector<1x64x128xf32>
    %335 = vector.shape_cast %334 : vector<1x64x128xf32> to vector<64x128xf32>
    %336 = vector.broadcast %333 : vector<1x128xf32> to vector<64x128xf32>
    %337 = arith.mulf %336, %335 : vector<64x128xf32>
    %338 = arith.addf %332, %337 : vector<64x128xf32>
    %339 = vector.extract_strided_slice %157 {offsets = [2, 0], sizes = [1, 128], strides = [1, 1]} : vector<4x128xf32> to vector<1x128xf32>
    %c2_192 = arith.constant 2 : index
    %c0_193 = arith.constant 0 : index
    %c0_194 = arith.constant 0 : index
    %340 = vector.load %arg9[%c2_192, %c0_193, %c0_194] : memref<8x64x128xf32, #tpu.memory_space<vmem>>, vector<1x64x128xf32>
    %341 = vector.shape_cast %340 : vector<1x64x128xf32> to vector<64x128xf32>
    %342 = vector.broadcast %339 : vector<1x128xf32> to vector<64x128xf32>
    %343 = arith.mulf %342, %341 : vector<64x128xf32>
    %344 = arith.addf %338, %343 : vector<64x128xf32>
    %345 = vector.extract_strided_slice %158 {offsets = [2, 0], sizes = [1, 128], strides = [1, 1]} : vector<4x128xf32> to vector<1x128xf32>
    %c3_195 = arith.constant 3 : index
    %c0_196 = arith.constant 0 : index
    %c0_197 = arith.constant 0 : index
    %346 = vector.load %arg9[%c3_195, %c0_196, %c0_197] : memref<8x64x128xf32, #tpu.memory_space<vmem>>, vector<1x64x128xf32>
    %347 = vector.shape_cast %346 : vector<1x64x128xf32> to vector<64x128xf32>
    %348 = vector.broadcast %345 : vector<1x128xf32> to vector<64x128xf32>
    %349 = arith.mulf %348, %347 : vector<64x128xf32>
    %350 = arith.addf %344, %349 : vector<64x128xf32>
    %351 = vector.extract_strided_slice %159 {offsets = [2, 0], sizes = [1, 128], strides = [1, 1]} : vector<4x128xf32> to vector<1x128xf32>
    %c4_198 = arith.constant 4 : index
    %c0_199 = arith.constant 0 : index
    %c0_200 = arith.constant 0 : index
    %352 = vector.load %arg9[%c4_198, %c0_199, %c0_200] : memref<8x64x128xf32, #tpu.memory_space<vmem>>, vector<1x64x128xf32>
    %353 = vector.shape_cast %352 : vector<1x64x128xf32> to vector<64x128xf32>
    %354 = vector.broadcast %351 : vector<1x128xf32> to vector<64x128xf32>
    %355 = arith.mulf %354, %353 : vector<64x128xf32>
    %356 = arith.addf %350, %355 : vector<64x128xf32>
    %357 = vector.extract_strided_slice %160 {offsets = [2, 0], sizes = [1, 128], strides = [1, 1]} : vector<4x128xf32> to vector<1x128xf32>
    %c5_201 = arith.constant 5 : index
    %c0_202 = arith.constant 0 : index
    %c0_203 = arith.constant 0 : index
    %358 = vector.load %arg9[%c5_201, %c0_202, %c0_203] : memref<8x64x128xf32, #tpu.memory_space<vmem>>, vector<1x64x128xf32>
    %359 = vector.shape_cast %358 : vector<1x64x128xf32> to vector<64x128xf32>
    %360 = vector.broadcast %357 : vector<1x128xf32> to vector<64x128xf32>
    %361 = arith.mulf %360, %359 : vector<64x128xf32>
    %362 = arith.addf %356, %361 : vector<64x128xf32>
    %363 = vector.extract_strided_slice %161 {offsets = [2, 0], sizes = [1, 128], strides = [1, 1]} : vector<4x128xf32> to vector<1x128xf32>
    %c6_204 = arith.constant 6 : index
    %c0_205 = arith.constant 0 : index
    %c0_206 = arith.constant 0 : index
    %364 = vector.load %arg9[%c6_204, %c0_205, %c0_206] : memref<8x64x128xf32, #tpu.memory_space<vmem>>, vector<1x64x128xf32>
    %365 = vector.shape_cast %364 : vector<1x64x128xf32> to vector<64x128xf32>
    %366 = vector.broadcast %363 : vector<1x128xf32> to vector<64x128xf32>
    %367 = arith.mulf %366, %365 : vector<64x128xf32>
    %368 = arith.addf %362, %367 : vector<64x128xf32>
    %369 = vector.extract_strided_slice %162 {offsets = [2, 0], sizes = [1, 128], strides = [1, 1]} : vector<4x128xf32> to vector<1x128xf32>
    %c7_207 = arith.constant 7 : index
    %c0_208 = arith.constant 0 : index
    %c0_209 = arith.constant 0 : index
    %370 = vector.load %arg9[%c7_207, %c0_208, %c0_209] : memref<8x64x128xf32, #tpu.memory_space<vmem>>, vector<1x64x128xf32>
    %371 = vector.shape_cast %370 : vector<1x64x128xf32> to vector<64x128xf32>
    %372 = vector.broadcast %369 : vector<1x128xf32> to vector<64x128xf32>
    %373 = arith.mulf %372, %371 : vector<64x128xf32>
    %374 = arith.addf %368, %373 : vector<64x128xf32>
    %c0_210 = arith.constant 0 : index
    %c5_211 = arith.constant 5 : index
    %375 = vector.load %arg4[%c0_210, %c5_211] : memref<64x8xf32, #tpu.memory_space<vmem>>, vector<64x1xf32>
    %376 = vector.broadcast %375 : vector<64x1xf32> to vector<64x128xf32>
    %377 = arith.addf %374, %376 : vector<64x128xf32>
    %cst_212 = arith.constant dense<0.000000e+00> : vector<128xf32>
    %378 = vector.multi_reduction <add>, %377, %cst_212 [0] : vector<64x128xf32> to vector<128xf32>
    %379 = vector.shape_cast %378 : vector<128xf32> to vector<1x128xf32>
    %cst_213 = arith.constant 6.400000e+01 : f32
    %380 = vector.broadcast %cst_213 : f32 to vector<1x128xf32>
    %381 = arith.divf %379, %380 : vector<1x128xf32>
    %382 = vector.broadcast %381 : vector<1x128xf32> to vector<64x128xf32>
    %383 = arith.subf %377, %382 : vector<64x128xf32>
    %384 = arith.mulf %383, %383 : vector<64x128xf32>
    %cst_214 = arith.constant dense<0.000000e+00> : vector<128xf32>
    %385 = vector.multi_reduction <add>, %384, %cst_214 [0] : vector<64x128xf32> to vector<128xf32>
    %386 = vector.shape_cast %385 : vector<128xf32> to vector<1x128xf32>
    %cst_215 = arith.constant 6.400000e+01 : f32
    %387 = vector.broadcast %cst_215 : f32 to vector<1x128xf32>
    %388 = arith.divf %386, %387 : vector<1x128xf32>
    %389 = vector.broadcast %381 : vector<1x128xf32> to vector<64x128xf32>
    %390 = arith.subf %377, %389 : vector<64x128xf32>
    %cst_216 = arith.constant 9.99999974E-6 : f32
    %391 = vector.broadcast %cst_216 : f32 to vector<1x128xf32>
    %392 = arith.addf %388, %391 : vector<1x128xf32>
    %393 = math.rsqrt %392 : vector<1x128xf32>
    %394 = vector.broadcast %393 : vector<1x128xf32> to vector<64x128xf32>
    %395 = arith.mulf %390, %394 : vector<64x128xf32>
    %c0_217 = arith.constant 0 : index
    %c1_218 = arith.constant 1 : index
    %396 = vector.load %arg4[%c0_217, %c1_218] : memref<64x8xf32, #tpu.memory_space<vmem>>, vector<64x1xf32>
    %397 = vector.broadcast %396 : vector<64x1xf32> to vector<64x128xf32>
    %398 = arith.mulf %395, %397 : vector<64x128xf32>
    %c0_219 = arith.constant 0 : index
    %c2_220 = arith.constant 2 : index
    %399 = vector.load %arg4[%c0_219, %c2_220] : memref<64x8xf32, #tpu.memory_space<vmem>>, vector<64x1xf32>
    %400 = vector.broadcast %399 : vector<64x1xf32> to vector<64x128xf32>
    %401 = arith.addf %398, %400 : vector<64x128xf32>
    %c0_221 = arith.constant 0 : index
    %c0_222 = arith.constant 0 : index
    %402 = vector.load %arg5[%c0_221, %c0_222] : memref<16x64xf32, #tpu.memory_space<vmem>>, vector<16x64xf32>
    %cst_223 = arith.constant dense<0.000000e+00> : vector<16x128xf32>
    %403 = tpu.matmul %402, %401, %cst_223 {dimension_numbers = #tpu.dot_dimension_numbers<[1], [0], [0], [1], [0, 0, 1, 1], [], []>} : vector<16x64xf32>, vector<64x128xf32>, vector<16x128xf32> -> vector<16x128xf32>
    %c0_224 = arith.constant 0 : index
    %c0_225 = arith.constant 0 : index
    %404 = vector.load %arg6[%c0_224, %c0_225] : memref<16x1xf32, #tpu.memory_space<vmem>>, vector<16x1xf32>
    %405 = vector.broadcast %404 : vector<16x1xf32> to vector<16x128xf32>
    %406 = arith.addf %403, %405 : vector<16x128xf32>
    %c32 = arith.constant 32 : index
    %407 = arith.index_cast %3 : i32 to index
    %408 = vector.load %arg7[%c32, %407] : memref<64x128xf32, #tpu.memory_space<vmem>>, vector<16x128xf32>
    tpu.vector_store %arg7[%c32, %407], %406 {strides = array<i32>} : memref<64x128xf32, #tpu.memory_space<vmem>>, vector<16x128xf32>,
    %409 = vector.extract_strided_slice %155 {offsets = [3, 0], sizes = [1, 128], strides = [1, 1]} : vector<4x128xf32> to vector<1x128xf32>
    %c0_226 = arith.constant 0 : index
    %c0_227 = arith.constant 0 : index
    %c0_228 = arith.constant 0 : index
    %410 = vector.load %arg9[%c0_226, %c0_227, %c0_228] : memref<8x64x128xf32, #tpu.memory_space<vmem>>, vector<1x64x128xf32>
    %411 = vector.shape_cast %410 : vector<1x64x128xf32> to vector<64x128xf32>
    %412 = vector.broadcast %409 : vector<1x128xf32> to vector<64x128xf32>
    %413 = arith.mulf %412, %411 : vector<64x128xf32>
    %414 = vector.extract_strided_slice %156 {offsets = [3, 0], sizes = [1, 128], strides = [1, 1]} : vector<4x128xf32> to vector<1x128xf32>
    %c1_229 = arith.constant 1 : index
    %c0_230 = arith.constant 0 : index
    %c0_231 = arith.constant 0 : index
    %415 = vector.load %arg9[%c1_229, %c0_230, %c0_231] : memref<8x64x128xf32, #tpu.memory_space<vmem>>, vector<1x64x128xf32>
    %416 = vector.shape_cast %415 : vector<1x64x128xf32> to vector<64x128xf32>
    %417 = vector.broadcast %414 : vector<1x128xf32> to vector<64x128xf32>
    %418 = arith.mulf %417, %416 : vector<64x128xf32>
    %419 = arith.addf %413, %418 : vector<64x128xf32>
    %420 = vector.extract_strided_slice %157 {offsets = [3, 0], sizes = [1, 128], strides = [1, 1]} : vector<4x128xf32> to vector<1x128xf32>
    %c2_232 = arith.constant 2 : index
    %c0_233 = arith.constant 0 : index
    %c0_234 = arith.constant 0 : index
    %421 = vector.load %arg9[%c2_232, %c0_233, %c0_234] : memref<8x64x128xf32, #tpu.memory_space<vmem>>, vector<1x64x128xf32>
    %422 = vector.shape_cast %421 : vector<1x64x128xf32> to vector<64x128xf32>
    %423 = vector.broadcast %420 : vector<1x128xf32> to vector<64x128xf32>
    %424 = arith.mulf %423, %422 : vector<64x128xf32>
    %425 = arith.addf %419, %424 : vector<64x128xf32>
    %426 = vector.extract_strided_slice %158 {offsets = [3, 0], sizes = [1, 128], strides = [1, 1]} : vector<4x128xf32> to vector<1x128xf32>
    %c3_235 = arith.constant 3 : index
    %c0_236 = arith.constant 0 : index
    %c0_237 = arith.constant 0 : index
    %427 = vector.load %arg9[%c3_235, %c0_236, %c0_237] : memref<8x64x128xf32, #tpu.memory_space<vmem>>, vector<1x64x128xf32>
    %428 = vector.shape_cast %427 : vector<1x64x128xf32> to vector<64x128xf32>
    %429 = vector.broadcast %426 : vector<1x128xf32> to vector<64x128xf32>
    %430 = arith.mulf %429, %428 : vector<64x128xf32>
    %431 = arith.addf %425, %430 : vector<64x128xf32>
    %432 = vector.extract_strided_slice %159 {offsets = [3, 0], sizes = [1, 128], strides = [1, 1]} : vector<4x128xf32> to vector<1x128xf32>
    %c4_238 = arith.constant 4 : index
    %c0_239 = arith.constant 0 : index
    %c0_240 = arith.constant 0 : index
    %433 = vector.load %arg9[%c4_238, %c0_239, %c0_240] : memref<8x64x128xf32, #tpu.memory_space<vmem>>, vector<1x64x128xf32>
    %434 = vector.shape_cast %433 : vector<1x64x128xf32> to vector<64x128xf32>
    %435 = vector.broadcast %432 : vector<1x128xf32> to vector<64x128xf32>
    %436 = arith.mulf %435, %434 : vector<64x128xf32>
    %437 = arith.addf %431, %436 : vector<64x128xf32>
    %438 = vector.extract_strided_slice %160 {offsets = [3, 0], sizes = [1, 128], strides = [1, 1]} : vector<4x128xf32> to vector<1x128xf32>
    %c5_241 = arith.constant 5 : index
    %c0_242 = arith.constant 0 : index
    %c0_243 = arith.constant 0 : index
    %439 = vector.load %arg9[%c5_241, %c0_242, %c0_243] : memref<8x64x128xf32, #tpu.memory_space<vmem>>, vector<1x64x128xf32>
    %440 = vector.shape_cast %439 : vector<1x64x128xf32> to vector<64x128xf32>
    %441 = vector.broadcast %438 : vector<1x128xf32> to vector<64x128xf32>
    %442 = arith.mulf %441, %440 : vector<64x128xf32>
    %443 = arith.addf %437, %442 : vector<64x128xf32>
    %444 = vector.extract_strided_slice %161 {offsets = [3, 0], sizes = [1, 128], strides = [1, 1]} : vector<4x128xf32> to vector<1x128xf32>
    %c6_244 = arith.constant 6 : index
    %c0_245 = arith.constant 0 : index
    %c0_246 = arith.constant 0 : index
    %445 = vector.load %arg9[%c6_244, %c0_245, %c0_246] : memref<8x64x128xf32, #tpu.memory_space<vmem>>, vector<1x64x128xf32>
    %446 = vector.shape_cast %445 : vector<1x64x128xf32> to vector<64x128xf32>
    %447 = vector.broadcast %444 : vector<1x128xf32> to vector<64x128xf32>
    %448 = arith.mulf %447, %446 : vector<64x128xf32>
    %449 = arith.addf %443, %448 : vector<64x128xf32>
    %450 = vector.extract_strided_slice %162 {offsets = [3, 0], sizes = [1, 128], strides = [1, 1]} : vector<4x128xf32> to vector<1x128xf32>
    %c7_247 = arith.constant 7 : index
    %c0_248 = arith.constant 0 : index
    %c0_249 = arith.constant 0 : index
    %451 = vector.load %arg9[%c7_247, %c0_248, %c0_249] : memref<8x64x128xf32, #tpu.memory_space<vmem>>, vector<1x64x128xf32>
    %452 = vector.shape_cast %451 : vector<1x64x128xf32> to vector<64x128xf32>
    %453 = vector.broadcast %450 : vector<1x128xf32> to vector<64x128xf32>
    %454 = arith.mulf %453, %452 : vector<64x128xf32>
    %455 = arith.addf %449, %454 : vector<64x128xf32>
    %c0_250 = arith.constant 0 : index
    %c6_251 = arith.constant 6 : index
    %456 = vector.load %arg4[%c0_250, %c6_251] : memref<64x8xf32, #tpu.memory_space<vmem>>, vector<64x1xf32>
    %457 = vector.broadcast %456 : vector<64x1xf32> to vector<64x128xf32>
    %458 = arith.addf %455, %457 : vector<64x128xf32>
    %cst_252 = arith.constant dense<0.000000e+00> : vector<128xf32>
    %459 = vector.multi_reduction <add>, %458, %cst_252 [0] : vector<64x128xf32> to vector<128xf32>
    %460 = vector.shape_cast %459 : vector<128xf32> to vector<1x128xf32>
    %cst_253 = arith.constant 6.400000e+01 : f32
    %461 = vector.broadcast %cst_253 : f32 to vector<1x128xf32>
    %462 = arith.divf %460, %461 : vector<1x128xf32>
    %463 = vector.broadcast %462 : vector<1x128xf32> to vector<64x128xf32>
    %464 = arith.subf %458, %463 : vector<64x128xf32>
    %465 = arith.mulf %464, %464 : vector<64x128xf32>
    %cst_254 = arith.constant dense<0.000000e+00> : vector<128xf32>
    %466 = vector.multi_reduction <add>, %465, %cst_254 [0] : vector<64x128xf32> to vector<128xf32>
    %467 = vector.shape_cast %466 : vector<128xf32> to vector<1x128xf32>
    %cst_255 = arith.constant 6.400000e+01 : f32
    %468 = vector.broadcast %cst_255 : f32 to vector<1x128xf32>
    %469 = arith.divf %467, %468 : vector<1x128xf32>
    %470 = vector.broadcast %462 : vector<1x128xf32> to vector<64x128xf32>
    %471 = arith.subf %458, %470 : vector<64x128xf32>
    %cst_256 = arith.constant 9.99999974E-6 : f32
    %472 = vector.broadcast %cst_256 : f32 to vector<1x128xf32>
    %473 = arith.addf %469, %472 : vector<1x128xf32>
    %474 = math.rsqrt %473 : vector<1x128xf32>
    %475 = vector.broadcast %474 : vector<1x128xf32> to vector<64x128xf32>
    %476 = arith.mulf %471, %475 : vector<64x128xf32>
    %c0_257 = arith.constant 0 : index
    %c1_258 = arith.constant 1 : index
    %477 = vector.load %arg4[%c0_257, %c1_258] : memref<64x8xf32, #tpu.memory_space<vmem>>, vector<64x1xf32>
    %478 = vector.broadcast %477 : vector<64x1xf32> to vector<64x128xf32>
    %479 = arith.mulf %476, %478 : vector<64x128xf32>
    %c0_259 = arith.constant 0 : index
    %c2_260 = arith.constant 2 : index
    %480 = vector.load %arg4[%c0_259, %c2_260] : memref<64x8xf32, #tpu.memory_space<vmem>>, vector<64x1xf32>
    %481 = vector.broadcast %480 : vector<64x1xf32> to vector<64x128xf32>
    %482 = arith.addf %479, %481 : vector<64x128xf32>
    %c0_261 = arith.constant 0 : index
    %c0_262 = arith.constant 0 : index
    %483 = vector.load %arg5[%c0_261, %c0_262] : memref<16x64xf32, #tpu.memory_space<vmem>>, vector<16x64xf32>
    %cst_263 = arith.constant dense<0.000000e+00> : vector<16x128xf32>
    %484 = tpu.matmul %483, %482, %cst_263 {dimension_numbers = #tpu.dot_dimension_numbers<[1], [0], [0], [1], [0, 0, 1, 1], [], []>} : vector<16x64xf32>, vector<64x128xf32>, vector<16x128xf32> -> vector<16x128xf32>
    %c0_264 = arith.constant 0 : index
    %c0_265 = arith.constant 0 : index
    %485 = vector.load %arg6[%c0_264, %c0_265] : memref<16x1xf32, #tpu.memory_space<vmem>>, vector<16x1xf32>
    %486 = vector.broadcast %485 : vector<16x1xf32> to vector<16x128xf32>
    %487 = arith.addf %484, %486 : vector<16x128xf32>
    %c48 = arith.constant 48 : index
    %488 = arith.index_cast %3 : i32 to index
    %489 = vector.load %arg7[%c48, %488] : memref<64x128xf32, #tpu.memory_space<vmem>>, vector<16x128xf32>
    tpu.vector_store %arg7[%c48, %488], %487 {strides = array<i32>} : memref<64x128xf32, #tpu.memory_space<vmem>>, vector<16x128xf32>,
    %c1_i32_266 = arith.constant 1 : i32
    return
  }
  func.func @transform_0(%arg0: i32) -> (i32, i32, i32) {
    %c0_i32 = arith.constant 0 : i32
    %c0_i32_0 = arith.constant 0 : i32
    %c0_i32_1 = arith.constant 0 : i32
    return %c0_i32, %c0_i32_0, %arg0 : i32, i32, i32
  }
  func.func @transform_1(%arg0: i32) -> (i32, i32) {
    %c0_i32 = arith.constant 0 : i32
    %c0_i32_0 = arith.constant 0 : i32
    %c0_i32_1 = arith.constant 0 : i32
    return %c0_i32, %c0_i32_0 : i32, i32
  }
  func.func @transform_2(%arg0: i32) -> (i32, i32) {
    %c0_i32 = arith.constant 0 : i32
    %c0_i32_0 = arith.constant 0 : i32
    %c0_i32_1 = arith.constant 0 : i32
    return %c0_i32, %c0_i32_0 : i32, i32
  }
  func.func @transform_3(%arg0: i32) -> (i32, i32) {
    %c0_i32 = arith.constant 0 : i32
    %c0_i32_0 = arith.constant 0 : i32
    %c0_i32_1 = arith.constant 0 : i32
    return %c0_i32, %c0_i32_0 : i32, i32
  }
  func.func @transform_4(%arg0: i32) -> (i32, i32) {
    %c0_i32 = arith.constant 0 : i32
    %c0_i32_0 = arith.constant 0 : i32
    %c0_i32_1 = arith.constant 0 : i32
    return %c0_i32, %c0_i32_0 : i32, i32
  }
  func.func @transform_5(%arg0: i32) -> (i32, i32) {
    %c0_i32 = arith.constant 0 : i32
    %c0_i32_0 = arith.constant 0 : i32
    %c0_i32_1 = arith.constant 0 : i32
    return %c0_i32, %c0_i32_0 : i32, i32
  }
  func.func @transform_6(%arg0: i32) -> (i32, i32) {
    %c0_i32 = arith.constant 0 : i32
    %c0_i32_0 = arith.constant 0 : i32
    return %c0_i32, %arg0 : i32, i32
  }
  func.func @transform_7(%arg0: i32) -> (i32, i32) {
    %c0_i32 = arith.constant 0 : i32
    %c0_i32_0 = arith.constant 0 : i32
    return %c0_i32, %arg0 : i32, i32
  }
}

</mosaic_0001>

<bundles_post_ra>
// kernel: attention_model_forward.1
= control target key start
LH: loop header
LB: loop body
LE: loop exit
PB: predicated region body
PF: predicated region fallthrough
CT: control target
= control target key end

     0   :  { %vm107_vm0 = vcmask 1043456   ;;  %v7169_v0 = vmov 0   ;;  %vm82_vm1 = vcmask 31744   ;;  %v5167_v19 = vmov 0.0|0.0   ;;  %s7161_s3 = inlined_call_operand.vmem [shape: f32[64,8], index: 3, kind: input, shape index: {}]   ;;  %s7162_s0 = inlined_call_operand.vmem [shape: f32[8,4,128], index: 0, kind: input, shape index: {}]   ;;  %s7163_s2 = inlined_call_operand.vmem [shape: f32[64,4], index: 2, kind: input, shape index: {}]   ;;  %s7164_s1 = inlined_call_operand.vmem [shape: f32[4,64], index: 1, kind: input, shape index: {}]   ;;  %s7165_s7 = inlined_call_operand.vmem [shape: f32[32,128], index: 7, kind: output, shape index: {1}]   ;;  %s7166_s4 = inlined_call_operand.vmem [shape: f32[16,64], index: 4, kind: input, shape index: {}]   ;;  %s7167_s5 = inlined_call_operand.vmem [shape: f32[16,1], index: 5, kind: input, shape index: {}]   ;;  %s7168_s6 = inlined_call_operand.vmem [shape: f32[64,128], index: 6, kind: output, shape index: {0}]  }
   0x1   :  { %5110 = vset.pattern.permute.xlu1 %v7169_v0  ;;  %5109 = vset.pattern.permute.xlu0 %v7169_v0  ;;  %v5221_v1 = vld [vmem:[%s7161_s3 + $0x10] sm:$0xff]  ;;  %v5226_v2 = vld [vmem:[%s7161_s3] sm:$0xff]  ;;  %v5246_v6 = vld [vmem:[%s7163_s2 + $0x8] sm:$0xff]  ;;  %vm5168_vm2 = vmmov 0   ;;  %v7171_v20 = vmov 0.0   ;;  %vm225_vm3 = vcmask 523264  }
   0x2   :  { %v33_v3 = vld [vmem:[%s7162_s0] sm:$0xf]  ;;  %331 = vperm.xlu1 %5110, %v5221_v1   ;;  %321 = vperm.xlu0 %5109, %v5226_v2   ;;  %v4330_v4 = vld [vmem:[%s7162_s0 + $0x4] sm:$0xf]  ;;  %v5254_v7 = vld [vmem:[%s7161_s3 + $0x18] sm:$0xff]  ;;  %v7177_v0 = vmov 1  }
   0x3   :  { %v5239_v5 = vld [vmem:[%s7163_s2] sm:$0xff]  ;;  %4599 = vmatprep.subr.msk.mxu0 %vm107_vm0, %v33_v3  ;;  %4632 = vmatprep.subr.msk.mxu1 %vm107_vm0, %v4330_v4  ;;  %v5259_v8 = vld [vmem:[%s7161_s3 + $0x8] sm:$0xff]  ;;  %v5267_v9 = vld [vmem:[%s7163_s2 + $0x10] sm:$0xff] }
   0x4   :  { %4600 = vmatpush3.msk.msra.mxu0 %vm107_vm0, %v33_v3  ;;  %4601 = vmatprep.mubr.msk.f32.mxu0 %vm82_vm1, %v5239_v5  ;;  %v5278_v10 = vld [vmem:[%s7163_s2 + $0x18] sm:$0xff]  ;;  %v5287_v11 = vld [vmem:[%s7161_s3 + $0x28] sm:$0xff]  ;;  %v5292_v12 = vld [vmem:[%s7161_s3 + $0x20] sm:$0xff] }
   0x5   :  { %4633 = vmatpush3.msk.msra.mxu1 %vm107_vm0, %v4330_v4  ;;  %4634 = vmatprep.mubr.msk.f32.mxu1 %vm82_vm1, %v5239_v5  ;;  %v5297_v13 = vld [vmem:[%s7163_s2 + $0x20] sm:$0xff]  ;;  %v5308_v14 = vld [vmem:[%s7163_s2 + $0x28] sm:$0xff]  ;;  %v5317_v15 = vld [vmem:[%s7161_s3 + $0x38] sm:$0xff] }
   0x6   :  { %4602 = vmatmul.mubr.msk.f32.vlgmr.msra.gmra.mrb[0].mxu0 %vm82_vm1, %v5246_v6  ;;  %4635 = vmatmul.mubr.msk.f32.vlgmr.msra.gmra.mrb[0].mxu1 %vm82_vm1, %v5246_v6  ;;  %v5322_v16 = vld [vmem:[%s7161_s3 + $0x30] sm:$0xff]  ;;  %v5338_v18 = vld [vmem:[%s7163_s2 + $0x38] sm:$0xff] }
   0x7   :  { %336 = vperm.xlu1 %5110, %v5254_v7   ;;  %326 = vperm.xlu0 %5109, %v5259_v8   ;;  %v5327_v17 = vld [vmem:[%s7163_s2 + $0x30] sm:$0xff] }
   0x8   :  { %4604 = vmatprep.mubr.msk.f32.mxu0 %vm82_vm1, %v5267_v9  ;;  %4637 = vmatprep.mubr.msk.f32.mxu1 %vm82_vm1, %v5267_v9 }
   0x9   :  { %4939 = vmatprep.subr.bf16.mxu0 %v5167_v19  ;;  %4951 = vmatprep.subr.bf16.mxu1 %v5167_v19 }
   0xa   :  { %4605 = vmatmul.mubr.msk.f32.gmra.mrb[2].mxu0 %vm82_vm1, %v5278_v10  ;;  %4638 = vmatmul.mubr.msk.f32.gmra.mrb[2].mxu1 %vm82_vm1, %v5278_v10 }
   0xb   :  { %346 = vperm.xlu1 %5110, %v5287_v11   ;;  %341 = vperm.xlu0 %5109, %v5292_v12  }
   0xc   :  { %4607 = vmatprep.mubr.msk.f32.mxu0 %vm82_vm1, %v5297_v13  ;;  %4640 = vmatprep.mubr.msk.f32.mxu1 %vm82_vm1, %v5297_v13 }
   0xe   :  { %4608 = vmatmul.mubr.msk.f32.gmra.mrb[4].mxu0 %vm82_vm1, %v5308_v14  ;;  %4641 = vmatmul.mubr.msk.f32.gmra.mrb[4].mxu1 %vm82_vm1, %v5308_v14 }
   0xf   :  { %356 = vperm.xlu1 %5110, %v5317_v15   ;;  %351 = vperm.xlu0 %5109, %v5322_v16  }
  0x10   :  { %4610 = vmatprep.mubr.msk.f32.mxu0 %vm82_vm1, %v5327_v17  ;;  %4643 = vmatprep.mubr.msk.f32.mxu1 %vm82_vm1, %v5327_v17 }
  0x12   :  { %4611 = vmatmul.mubr.msk.f32.gmra.mrb[6].mxu0 %vm82_vm1, %v5338_v18  ;;  %4644 = vmatmul.mubr.msk.f32.gmra.mrb[6].mxu1 %vm82_vm1, %v5338_v18 }
  0x13   :  { %49 = vperm.xlu1 %5110, %v5259_v8   ;;  %44 = vperm.xlu0 %5109, %v5226_v2  }
  0x14   :  { %4629 = vmatprep.mubr.msk.f32.mxu0 %vm5168_vm2, %v7171_v20  ;;  %4662 = vmatprep.mubr.msk.f32.mxu1 %vm5168_vm2, %v7171_v20 }
  0x17   :  { %59 = vperm.xlu1 %5110, %v5254_v7   ;;  %54 = vperm.xlu0 %5109, %v5221_v1  }
  0x1b   :  { %69 = vperm.xlu1 %5110, %v5287_v11   ;;  %64 = vperm.xlu0 %5109, %v5292_v12  }
  0x1f   :  { %79 = vperm.xlu1 %5110, %v5317_v15   ;;  %74 = vperm.xlu0 %5109, %v5322_v16  }
  0x23   :  { %601 = vperm.xlu1 %5110, %v5259_v8   ;;  %596 = vperm.xlu0 %5109, %v5226_v2  }
  0x27   :  { %611 = vperm.xlu1 %5110, %v5254_v7   ;;  %606 = vperm.xlu0 %5109, %v5221_v1  }
  0x2b   :  { %621 = vperm.xlu1 %5110, %v5287_v11   ;;  %616 = vperm.xlu0 %5109, %v5292_v12  }
  0x2f   :  { %631 = vperm.xlu1 %5110, %v5317_v15   ;;  %626 = vperm.xlu0 %5109, %v5322_v16  }
  0x33   :  { %876 = vperm.xlu1 %5110, %v5259_v8   ;;  %871 = vperm.xlu0 %5109, %v5226_v2  }
  0x37   :  { %886 = vperm.xlu1 %5110, %v5254_v7   ;;  %881 = vperm.xlu0 %5109, %v5221_v1  }
  0x3b   :  { %896 = vperm.xlu1 %5110, %v5287_v11   ;;  %891 = vperm.xlu0 %5109, %v5292_v12  }
  0x3f   :  { %906 = vperm.xlu1 %5110, %v5317_v15   ;;  %901 = vperm.xlu0 %5109, %v5322_v16  }
  0x43   :  { %1151 = vperm.xlu1 %5110, %v5259_v8   ;;  %1146 = vperm.xlu0 %5109, %v5226_v2  }
  0x47   :  { %1161 = vperm.xlu1 %5110, %v5254_v7   ;;  %1156 = vperm.xlu0 %5109, %v5221_v1  }
  0x4b   :  { %1171 = vperm.xlu1 %5110, %v5287_v11   ;;  %1166 = vperm.xlu0 %5109, %v5292_v12  }
  0x4f   :  { %1181 = vperm.xlu1 %5110, %v5317_v15   ;;  %1176 = vperm.xlu0 %5109, %v5322_v16  }
  0x53   :  { %1426 = vperm.xlu1 %5110, %v5259_v8   ;;  %1421 = vperm.xlu0 %5109, %v5226_v2  }
  0x57   :  { %1436 = vperm.xlu1 %5110, %v5254_v7   ;;  %1431 = vperm.xlu0 %5109, %v5221_v1  }
  0x5b   :  { %1446 = vperm.xlu1 %5110, %v5287_v11   ;;  %1441 = vperm.xlu0 %5109, %v5292_v12  }
  0x5f   :  { %1456 = vperm.xlu1 %5110, %v5317_v15   ;;  %1451 = vperm.xlu0 %5109, %v5322_v16  }
  0x63   :  { %1701 = vperm.xlu1 %5110, %v5259_v8   ;;  %1696 = vperm.xlu0 %5109, %v5226_v2  }
  0x67   :  { %1711 = vperm.xlu1 %5110, %v5254_v7   ;;  %1706 = vperm.xlu0 %5109, %v5221_v1  }
  0x6b   :  { %1721 = vperm.xlu1 %5110, %v5287_v11   ;;  %1716 = vperm.xlu0 %5109, %v5292_v12  }
  0x6f   :  { %1731 = vperm.xlu1 %5110, %v5317_v15   ;;  %1726 = vperm.xlu0 %5109, %v5322_v16  }
  0x73   :  { %1976 = vperm.xlu1 %5110, %v5259_v8   ;;  %1971 = vperm.xlu0 %5109, %v5226_v2  }
  0x77   :  { %1986 = vperm.xlu1 %5110, %v5254_v7   ;;  %1981 = vperm.xlu0 %5109, %v5221_v1  }
  0x7b   :  { %1996 = vperm.xlu1 %5110, %v5287_v11   ;;  %1991 = vperm.xlu0 %5109, %v5292_v12  }
  0x7f   :  { %2006 = vperm.xlu1 %5110, %v5317_v15   ;;  %2001 = vperm.xlu0 %5109, %v5322_v16  }
  0x81   :  { %v332_v21 = vpop.permute.xlu1 %331  ;;  %v322_v22 = vpop.permute.xlu0 %321 }
  0x86   :  { %v337_v23 = vpop.permute.xlu1 %336  ;;  %v327_v24 = vpop.permute.xlu0 %326 }
  0x8a   :  { %v347_v25 = vpop.permute.xlu1 %346  ;;  %v342_v26 = vpop.permute.xlu0 %341 }
  0x8e   :  { %v357_v27 = vpop.permute.xlu1 %356  ;;  %v352_v28 = vpop.permute.xlu0 %351 }
  0x92   :  { %v50_v29 = vpop.permute.xlu1 %49  ;;  %v45_v30 = vpop.permute.xlu0 %44 }
  0x96   :  { %v60_v31 = vpop.permute.xlu1 %59  ;;  %v55_v32 = vpop.permute.xlu0 %54 }
  0x9a   :  { %v70_v41 = vpop.permute.xlu1 %69  ;;  %v65_v42 = vpop.permute.xlu0 %64 }
  0x9e   :  { %v80_v63 = vpop.permute.xlu1 %79  ;;  %v75_v1 = vpop.permute.xlu0 %74 }
  0xd9   :  { %v4603_v33 = vpop.f32.mrb[0].mxu0  ;;  %v4636_v34 = vpop.f32.mrb[0].mxu1 }
  0xda   :  { %v5410_v35 = vadd.f32 %v4603_v33, %v50_v29  ;;  %v5412_v36 = vadd.f32 %v4636_v34, %v327_v24  ;;  %v177_v37 = vpop.f32.mrb[1].mxu0  ;;  %v452_v38 = vpop.f32.mrb[1].mxu1  ;;  %v4341_v24 = vld [vmem:[%s7162_s0 + $0x8] sm:$0xf] }
  0xdb   :  { %v5414_v39 = vadd.f32 %v177_v37, %v45_v30  ;;  %v5416_v40 = vadd.f32 %v452_v38, %v322_v22 }
  0xdc   :  { %7350 = vst [vmem:[#allocation3_spill] sm:$0xff] %v5410_v35  ;;  %7351 = vst [vmem:[#allocation4_spill] sm:$0xff] %v5412_v36 }
  0xdd   :  { %7352 = vst [vmem:[#allocation5_spill] sm:$0xff] %v5414_v39  ;;  %7353 = vst [vmem:[#allocation6_spill] sm:$0xff] %v5416_v40  ;;  %v4606_v43 = vpop.f32.mrb[2].mxu0  ;;  %v4639_v44 = vpop.f32.mrb[2].mxu1  ;;  %v4940_v45 = vpack.c.bf16 %v5410_v35, %v5414_v39  ;;  %v4952_v46 = vpack.c.bf16 %v5412_v36, %v5416_v40 }
  0xde   :  { %v5422_v47 = vadd.f32 %v4606_v43, %v60_v31  ;;  %v5424_v48 = vadd.f32 %v4639_v44, %v337_v23  ;;  %v187_v49 = vpop.f32.mrb[3].mxu0  ;;  %v462_v50 = vpop.f32.mrb[3].mxu1 }
  0xdf   :  { %v5426_v51 = vadd.f32 %v187_v49, %v55_v32  ;;  %v5428_v52 = vadd.f32 %v462_v50, %v332_v21  ;;  %4941 = vmatpush3.bf16.msra.mxu0 %v4940_v45  ;;  %4953 = vmatpush3.bf16.msra.mxu1 %v4952_v46 }
  0xe0   :  { %7354 = vst [vmem:[#allocation7_spill] sm:$0xff] %v5422_v47  ;;  %7355 = vst [vmem:[#allocation8_spill] sm:$0xff] %v5424_v48  ;;  %4942 = vmatprep.subr.bf16.mxu0 %v5167_v19  ;;  %4954 = vmatprep.subr.bf16.mxu1 %v5167_v19 }
  0xe1   :  { %7356 = vst [vmem:[#allocation9_spill] sm:$0xff] %v5426_v51  ;;  %7357 = vst [vmem:[#allocation10_spill] sm:$0xff] %v5428_v52  ;;  %v4609_v53 = vpop.f32.mrb[4].mxu0  ;;  %v4642_v54 = vpop.f32.mrb[4].mxu1  ;;  %v4943_v55 = vpack.c.bf16 %v5422_v47, %v5426_v51  ;;  %v4955_v56 = vpack.c.bf16 %v5424_v48, %v5428_v52 }
  0xe2   :  { %v5436_v57 = vadd.f32 %v4609_v53, %v70_v41  ;;  %v5438_v58 = vadd.f32 %v4642_v54, %v347_v25  ;;  %v197_v59 = vpop.f32.mrb[5].mxu0  ;;  %v472_v60 = vpop.f32.mrb[5].mxu1  ;;  %v224_v25 = vld [vmem:[%s7164_s1] sm:$0xf] }
  0xe3   :  { %v5440_v61 = vadd.f32 %v197_v59, %v65_v42  ;;  %v5442_v62 = vadd.f32 %v472_v60, %v342_v26  ;;  %4944 = vmatpush3.bf16.msra.mxu0 %v4943_v55  ;;  %4956 = vmatpush3.bf16.msra.mxu1 %v4955_v56  ;;  %v500_v26 = vld [vmem:[%s7164_s1] sm:$0xf] }
  0xe4   :  { %7358 = vst [vmem:[#allocation11_spill] sm:$0xff] %v5436_v57  ;;  %7359 = vst [vmem:[#allocation12_spill] sm:$0xff] %v5438_v58  ;;  %4945 = vmatprep.subr.bf16.mxu0 %v5167_v19  ;;  %4957 = vmatprep.subr.bf16.mxu1 %v5167_v19 }
  0xe5   :  { %7360 = vst [vmem:[#allocation13_spill] sm:$0xff] %v5440_v61  ;;  %7361 = vst [vmem:[#allocation14_spill] sm:$0xff] %v5442_v62  ;;  %v4612_v2 = vpop.f32.mrb[6].mxu0  ;;  %v4645_v3 = vpop.f32.mrb[6].mxu1  ;;  %v4946_v4 = vpack.c.bf16 %v5436_v57, %v5440_v61  ;;  %v4958_v7 = vpack.c.bf16 %v5438_v58, %v5442_v62 }
  0xe6   :  { %v5450_v8 = vadd.f32 %v4612_v2, %v80_v63  ;;  %v5452_v11 = vadd.f32 %v4645_v3, %v357_v27  ;;  %v207_v12 = vpop.f32.mrb[7].mxu0  ;;  %v482_v15 = vpop.f32.mrb[7].mxu1 }
  0xe7   :  { %v5454_v16 = vadd.f32 %v207_v12, %v75_v1  ;;  %v5456_v21 = vadd.f32 %v482_v15, %v352_v28  ;;  %4947 = vmatpush3.bf16.msra.mxu0 %v4946_v4  ;;  %4959 = vmatpush3.bf16.msra.mxu1 %v4958_v7  ;;  %v602_v27 = vpop.permute.xlu1 %601  ;;  %v597_v28 = vpop.permute.xlu0 %596 }
  0xe8   :  { %7362 = vst [vmem:[#allocation15_spill] sm:$0xff] %v5450_v8  ;;  %7363 = vst [vmem:[#allocation16_spill] sm:$0xff] %v5452_v11  ;;  %4948 = vmatprep.subr.bf16.mxu0 %v5167_v19  ;;  %4960 = vmatprep.subr.bf16.mxu1 %v5167_v19 }
  0xe9   :  { %7364 = vst [vmem:[#allocation17_spill] sm:$0xff] %v5454_v16  ;;  %7365 = vst [vmem:[#allocation18_spill] sm:$0xff] %v5456_v21  ;;  %v4949_v22 = vpack.c.bf16 %v5450_v8, %v5454_v16  ;;  %v4961_v23 = vpack.c.bf16 %v5452_v11, %v5456_v21 }
  0xeb   :  { %4950 = vmatpush3.bf16.msra.mxu0 %v4949_v22  ;;  %4962 = vmatpush3.bf16.msra.mxu1 %v4961_v23  ;;  %v612_v38 = vpop.permute.xlu1 %611  ;;  %v607_v42 = vpop.permute.xlu0 %606 }
  0xec   :  { %4665 = vmatprep.subr.msk.mxu1 %vm107_vm0, %v4341_v24  ;;  %4963 = vmatprep.subr.bf16.mxu0 %v5167_v19 }
  0xee   :  { %4630 = vmatmul.mubr.msk.f32.vlgmr.msra.gmra.mrb[8].mxu0 %vm225_vm3, %v224_v25  ;;  %4663 = vmatmul.mubr.msk.f32.vlgmr.msra.gmra.mrb[8].mxu1 %vm225_vm3, %v500_v26  ;;  %v4352_v25 = vld [vmem:[%s7162_s0 + $0xc] sm:$0xf]  ;;  %v775_v26 = vld [vmem:[%s7164_s1] sm:$0xf] }
  0xef   :  { %4666 = vmatpush3.msk.msra.mxu1 %vm107_vm0, %v4341_v24  ;;  %4667 = vmatprep.mubr.msk.f32.mxu1 %vm82_vm1, %v5239_v5  ;;  %v622_v54 = vpop.permute.xlu1 %621  ;;  %v617_v56 = vpop.permute.xlu0 %616 }
  0xf0   :  { %4695 = vmatprep.mubr.msk.f32.mxu0 %vm5168_vm2, %v7171_v20  ;;  %4975 = vmatprep.subr.bf16.mxu1 %v5167_v19 }
  0xf2   :  { %4668 = vmatmul.mubr.msk.f32.vlgmr.msra.gmra.mrb[10].mxu1 %vm82_vm1, %v5246_v6 }
  0xf3   :  { %4670 = vmatprep.mubr.msk.f32.mxu1 %vm82_vm1, %v5267_v9  ;;  %v632_v3 = vpop.permute.xlu1 %631  ;;  %v627_v12 = vpop.permute.xlu0 %626 }
  0xf6   :  { %4671 = vmatmul.mubr.msk.f32.gmra.mrb[12].mxu1 %vm82_vm1, %v5278_v10 }
  0xf7   :  { %4673 = vmatprep.mubr.msk.f32.mxu1 %vm82_vm1, %v5297_v13 }
  0xfa   :  { %4674 = vmatmul.mubr.msk.f32.gmra.mrb[14].mxu1 %vm82_vm1, %v5308_v14 }
  0xfb   :  { %4676 = vmatprep.mubr.msk.f32.mxu1 %vm82_vm1, %v5327_v17 }
  0xfe   :  { %4677 = vmatmul.mubr.msk.f32.gmra.mrb[16].mxu1 %vm82_vm1, %v5338_v18 }
  0xff   :  { %4728 = vmatprep.mubr.msk.f32.mxu1 %vm5168_vm2, %v7171_v20 }
 0x1c1   :  { %v295_v29 = vpop.f32.mrb[8].mxu0  ;;  %v570_v30 = vpop.f32.mrb[8].mxu1 }
 0x1c2   :  { %v5499_v31 = vmul.f32 0.125, %v295_v29  ;;  %v5501_v32 = vmul.f32 0.125, %v570_v30  ;;  %v4664_v33 = vpop.f32.mrb[9].mxu1  ;;  %v4631_v34 = vpop.f32.mrb[9].mxu0  ;;  %v4385_v29 = vld [vmem:[%s7162_s0 + $0x18] sm:$0xf] }
 0x1c3   :  { %v4396_v30 = vld [vmem:[%s7162_s0 + $0x1c] sm:$0xf]  ;;  %v5684_v33 = vld [vmem:[%s7161_s3 + $0x30] sm:$0xff]  ;;  %v877_v34 = vpop.permute.xlu1 %876 }
 0x1c4   :  { %v2225_v37 = vmax.f32 %v5499_v31, %v5501_v32 }
 0x1c5   :  { %v4669_v41 = vpop.f32.mrb[10].mxu1 }
 0x1c6   :  { %v5505_v43 = vadd.f32 %v4669_v41, %v602_v27  ;;  %v727_v44 = vpop.f32.mrb[11].mxu1  ;;  %v4363_v27 = vld [vmem:[%s7162_s0 + $0x10] sm:$0xf]  ;;  %v5691_v41 = vld [vmem:[%s7161_s3 + $0x38] sm:$0xff] }
 0x1c7   :  { %v5507_v45 = vadd.f32 %v727_v44, %v597_v28  ;;  %v4374_v28 = vld [vmem:[%s7162_s0 + $0x14] sm:$0xf] }
 0x1c8   :  { %7366 = vst [vmem:[#allocation19_spill] sm:$0xff] %v5505_v43 }
 0x1c9   :  { %7367 = vst [vmem:[#allocation20_spill] sm:$0xff] %v5507_v45  ;;  %v4672_v46 = vpop.f32.mrb[12].mxu1  ;;  %v4964_v49 = vpack.c.bf16 %v5505_v43, %v5507_v45 }
 0x1ca   :  { %v5511_v50 = vadd.f32 %v4672_v46, %v612_v38  ;;  %v737_v53 = vpop.f32.mrb[13].mxu1  ;;  %v872_v38 = vpop.permute.xlu0 %871  ;;  %v5172_v46 = vmov 5  }
 0x1cb   :  { %v5513_v55 = vadd.f32 %v737_v53, %v607_v42  ;;  %4965 = vmatpush3.bf16.msra.mxu0 %v4964_v49  ;;  %v887_v42 = vpop.permute.xlu1 %886 }
 0x1cc   :  { %7368 = vst [vmem:[#allocation21_spill] sm:$0xff] %v5511_v50  ;;  %4966 = vmatprep.subr.bf16.mxu0 %v5167_v19 }
 0x1cd   :  { %7369 = vst [vmem:[#allocation22_spill] sm:$0xff] %v5513_v55  ;;  %v4675_v59 = vpop.f32.mrb[14].mxu1  ;;  %v4967_v60 = vpack.c.bf16 %v5511_v50, %v5513_v55 }
 0x1ce   :  { %v5518_v63 = vadd.f32 %v4675_v59, %v622_v54  ;;  %v747_v1 = vpop.f32.mrb[15].mxu1  ;;  %v882_v44 = vpop.permute.xlu0 %881 }
 0x1cf   :  { %v5520_v2 = vadd.f32 %v747_v1, %v617_v56  ;;  %4968 = vmatpush3.bf16.msra.mxu0 %v4967_v60  ;;  %v897_v49 = vpop.permute.xlu1 %896  ;;  %v5173_v56 = vmov 6  }
 0x1d0   :  { %7370 = vst [vmem:[#allocation23_spill] sm:$0xff] %v5518_v63  ;;  %4969 = vmatprep.subr.bf16.mxu0 %v5167_v19 }
 0x1d1   :  { %7371 = vst [vmem:[#allocation24_spill] sm:$0xff] %v5520_v2  ;;  %v4678_v4 = vpop.f32.mrb[16].mxu1  ;;  %v4970_v7 = vpack.c.bf16 %v5518_v63, %v5520_v2 }
 0x1d2   :  { %v5525_v15 = vadd.f32 %v4678_v4, %v632_v3  ;;  %v757_v22 = vpop.f32.mrb[17].mxu1  ;;  %v892_v53 = vpop.permute.xlu0 %891 }
 0x1d3   :  { %v5527_v23 = vadd.f32 %v757_v22, %v627_v12  ;;  %4971 = vmatpush3.bf16.msra.mxu0 %v4970_v7  ;;  %v907_v54 = vpop.permute.xlu1 %906 }
 0x1d4   :  { %7372 = vst [vmem:[#allocation25_spill] sm:$0xff] %v5525_v15  ;;  %4972 = vmatprep.subr.bf16.mxu0 %v5167_v19 }
 0x1d5   :  { %7373 = vst [vmem:[#allocation26_spill] sm:$0xff] %v5527_v23  ;;  %v4973_v24 = vpack.c.bf16 %v5525_v15, %v5527_v23 }
 0x1d6   :  { %v902_v59 = vpop.permute.xlu0 %901 }
 0x1d7   :  { %4974 = vmatpush3.bf16.msra.mxu0 %v4973_v24  ;;  %v1152_v60 = vpop.permute.xlu1 %1151 }
 0x1d8   :  { %4698 = vmatprep.subr.msk.mxu0 %vm107_vm0, %v4352_v25 }
 0x1da   :  { %4696 = vmatmul.mubr.msk.f32.vlgmr.msra.gmra.mrb[10].mxu0 %vm225_vm3, %v775_v26  ;;  %v5702_v1 = vpop.permute.xlu0 %1146 }
 0x1db   :  { %4699 = vmatpush3.msk.msra.mxu0 %vm107_vm0, %v4352_v25  ;;  %4700 = vmatprep.mubr.msk.f32.mxu0 %vm82_vm1, %v5239_v5  ;;  %v5706_v3 = vpop.permute.xlu1 %1161 }
 0x1dc   :  { %4731 = vmatprep.subr.msk.mxu0 %vm107_vm0, %v4363_v27 }
 0x1de   :  { %4701 = vmatmul.mubr.msk.f32.vlgmr.msra.gmra.mrb[12].mxu0 %vm82_vm1, %v5246_v6  ;;  %v5709_v4 = vpop.permute.xlu0 %1156 }
 0x1df   :  { %4732 = vmatpush3.msk.msra.mxu0 %vm107_vm0, %v4363_v27  ;;  %4703 = vmatprep.mubr.msk.f32.mxu0 %vm82_vm1, %v5267_v9  ;;  %v5716_v24 = vpop.permute.xlu1 %1171 }
 0x1e0   :  { %4764 = vmatprep.subr.msk.mxu0 %vm107_vm0, %v4374_v28 }
 0x1e2   :  { %4704 = vmatmul.mubr.msk.f32.gmra.mrb[14].mxu0 %vm82_vm1, %v5278_v10  ;;  %v5718_v25 = vpop.permute.xlu0 %1166 }
 0x1e3   :  { %4706 = vmatprep.mubr.msk.f32.mxu0 %vm82_vm1, %v5297_v13 }
 0x1e6   :  { %4707 = vmatmul.mubr.msk.f32.gmra.mrb[16].mxu0 %vm82_vm1, %v5308_v14 }
 0x1e7   :  { %4709 = vmatprep.mubr.msk.f32.mxu0 %vm82_vm1, %v5327_v17 }
 0x1ea   :  { %4710 = vmatmul.mubr.msk.f32.gmra.mrb[18].mxu0 %vm82_vm1, %v5338_v18 }
 0x1eb   :  { %4733 = vmatprep.mubr.msk.f32.mxu0 %vm82_vm1, %v5239_v5 }
 0x1ee   :  { %4734 = vmatmul.mubr.msk.f32.vlgmr.msra.gmra.mrb[20].mxu0 %vm82_vm1, %v5246_v6 }
 0x1ef   :  { %4765 = vmatpush3.msk.msra.mxu0 %vm107_vm0, %v4374_v28  ;;  %4736 = vmatprep.mubr.msk.f32.mxu0 %vm82_vm1, %v5267_v9 }
 0x1f0   :  { %4797 = vmatprep.subr.msk.mxu0 %vm107_vm0, %v4385_v29 }
 0x1f2   :  { %4737 = vmatmul.mubr.msk.f32.gmra.mrb[22].mxu0 %vm82_vm1, %v5278_v10 }
 0x1f3   :  { %4739 = vmatprep.mubr.msk.f32.mxu0 %vm82_vm1, %v5297_v13 }
 0x1f6   :  { %4740 = vmatmul.mubr.msk.f32.gmra.mrb[24].mxu0 %vm82_vm1, %v5308_v14 }
 0x1f7   :  { %4742 = vmatprep.mubr.msk.f32.mxu0 %vm82_vm1, %v5327_v17 }
 0x1fa   :  { %4743 = vmatmul.mubr.msk.f32.gmra.mrb[26].mxu0 %vm82_vm1, %v5338_v18 }
 0x1fb   :  { %4766 = vmatprep.mubr.msk.f32.mxu0 %vm82_vm1, %v5239_v5 }
 0x1fe   :  { %4767 = vmatmul.mubr.msk.f32.vlgmr.msra.gmra.mrb[28].mxu0 %vm82_vm1, %v5246_v6 }
 0x1ff   :  { %4798 = vmatpush3.msk.msra.mxu0 %vm107_vm0, %v4385_v29  ;;  %4769 = vmatprep.mubr.msk.f32.mxu0 %vm82_vm1, %v5267_v9 }
 0x200   :  { %4830 = vmatprep.subr.msk.mxu0 %vm107_vm0, %v4396_v30 }
 0x202   :  { %4770 = vmatmul.mubr.msk.f32.gmra.mrb[30].mxu0 %vm82_vm1, %v5278_v10 }
 0x203   :  { %4772 = vmatprep.mubr.msk.f32.mxu0 %vm82_vm1, %v5297_v13 }
 0x206   :  { %4773 = vmatmul.mubr.msk.f32.gmra.mrb[32].mxu0 %vm82_vm1, %v5308_v14 }
 0x207   :  { %4775 = vmatprep.mubr.msk.f32.mxu0 %vm82_vm1, %v5327_v17 }
 0x20a   :  { %4776 = vmatmul.mubr.msk.f32.gmra.mrb[34].mxu0 %vm82_vm1, %v5338_v18 }
 0x20b   :  { %4799 = vmatprep.mubr.msk.f32.mxu0 %vm82_vm1, %v5239_v5 }
 0x20e   :  { %4800 = vmatmul.mubr.msk.f32.vlgmr.msra.gmra.mrb[36].mxu0 %vm82_vm1, %v5246_v6 }
 0x20f   :  { %4831 = vmatpush3.msk.msra.mxu0 %vm107_vm0, %v4396_v30  ;;  %4802 = vmatprep.mubr.msk.f32.mxu0 %vm82_vm1, %v5267_v9 }
 0x212   :  { %4803 = vmatmul.mubr.msk.f32.gmra.mrb[38].mxu0 %vm82_vm1, %v5278_v10 }
 0x213   :  { %4805 = vmatprep.mubr.msk.f32.mxu0 %vm82_vm1, %v5297_v13 }
 0x216   :  { %4806 = vmatmul.mubr.msk.f32.gmra.mrb[40].mxu0 %vm82_vm1, %v5308_v14 }
 0x217   :  { %4808 = vmatprep.mubr.msk.f32.mxu0 %vm82_vm1, %v5327_v17 }
 0x21a   :  { %4809 = vmatmul.mubr.msk.f32.gmra.mrb[42].mxu0 %vm82_vm1, %v5338_v18 }
 0x21b   :  { %4832 = vmatprep.mubr.msk.f32.mxu0 %vm82_vm1, %v5239_v5  ;;  %v5170_v5 = vmov 3  }
 0x21c   :  { %5112 = vset.pattern.permute.xlu1 %v5170_v5  ;;  %5111 = vset.pattern.permute.xlu0 %v5170_v5 }
 0x21e   :  { %4833 = vmatmul.mubr.msk.f32.vlgmr.msra.gmra.mrb[44].mxu0 %vm82_vm1, %v5246_v6  ;;  %v5644_v6 = vld [vmem:[%s7161_s3 + $0x8] sm:$0xff] }
 0x21f   :  { %4835 = vmatprep.mubr.msk.f32.mxu0 %vm82_vm1, %v5267_v9  ;;  %2523 = vperm.xlu1 %5112, %v5644_v6   ;;  %v5650_v9 = vld [vmem:[%s7161_s3 + $0x10] sm:$0xff] }
 0x222   :  { %4836 = vmatmul.mubr.msk.f32.gmra.mrb[46].mxu0 %vm82_vm1, %v5278_v10  ;;  %v5656_v10 = vld [vmem:[%s7161_s3 + $0x20] sm:$0xff] }
 0x223   :  { %4838 = vmatprep.mubr.msk.f32.mxu0 %vm82_vm1, %v5297_v13  ;;  %2528 = vperm.xlu1 %5112, %v5650_v9   ;;  %v5662_v13 = vld [vmem:[%s7161_s3] sm:$0xff] }
 0x224   :  { %2518 = vperm.xlu0 %5111, %v5662_v13  }
 0x226   :  { %4839 = vmatmul.mubr.msk.f32.gmra.mrb[48].mxu0 %vm82_vm1, %v5308_v14  ;;  %v5171_v14 = vmov 4  }
 0x227   :  { %4841 = vmatprep.mubr.msk.f32.mxu0 %vm82_vm1, %v5327_v17  ;;  %2538 = vperm.xlu1 %5112, %v5656_v10   ;;  %v5670_v17 = vld [vmem:[%s7161_s3 + $0x18] sm:$0xff] }
 0x228   :  { %2533 = vperm.xlu0 %5111, %v5670_v17  }
 0x22a   :  { %4842 = vmatmul.mubr.msk.f32.gmra.mrb[50].mxu0 %vm82_vm1, %v5338_v18  ;;  %v5677_v18 = vld [vmem:[%s7161_s3 + $0x28] sm:$0xff] }
 0x22b   :  { %5113 = vset.pattern.permute.xlu1 %v5171_v14 }
 0x22c   :  { %3022 = vperm.xlu1 %5113, %v5662_v13   ;;  %2543 = vperm.xlu0 %5111, %v5677_v18  }
 0x230   :  { %3032 = vperm.xlu1 %5113, %v5650_v9   ;;  %2548 = vperm.xlu0 %5111, %v5684_v33  }
 0x234   :  { %3037 = vperm.xlu1 %5113, %v5670_v17   ;;  %5114 = vset.pattern.permute.xlu0 %v5171_v14 }
 0x235   :  { %3027 = vperm.xlu0 %5114, %v5644_v6  }
 0x238   :  { %3047 = vperm.xlu1 %5113, %v5677_v18  }
 0x239   :  { %3042 = vperm.xlu0 %5114, %v5656_v10  }
 0x23c   :  { %3052 = vperm.xlu1 %5113, %v5684_v33  }
 0x23d   :  { %3057 = vperm.xlu0 %5114, %v5691_v41  }
 0x240   :  { %5115 = vset.pattern.permute.xlu1 %v5170_v5  ;;  %v5732_v5 = vpop.permute.xlu1 %1181 }
 0x241   :  { %2553 = vperm.xlu1 %5115, %v5691_v41   ;;  %5117 = vset.pattern.permute.xlu0 %v5173_v56 }
 0x242   :  { %4028 = vperm.xlu0 %5117, %v5662_v13  }
 0x245   :  { %5116 = vset.pattern.permute.xlu1 %v5172_v46 }
 0x246   :  { %3525 = vperm.xlu1 %5116, %v5662_v13   ;;  %4038 = vperm.xlu0 %5117, %v5650_v9  }
 0x24a   :  { %3530 = vperm.xlu1 %5116, %v5644_v6   ;;  %4043 = vperm.xlu0 %5117, %v5670_v17  }
 0x24e   :  { %5118 = vset.pattern.permute.xlu1 %v5173_v56  ;;  %4048 = vperm.xlu0 %5117, %v5656_v10  }
 0x24f   :  { %4033 = vperm.xlu1 %5118, %v5644_v6  }
 0x252   :  { %4053 = vperm.xlu0 %5117, %v5677_v18  }
 0x253   :  { %5119 = vset.pattern.permute.xlu1 %v5172_v46 }
 0x254   :  { %3535 = vperm.xlu1 %5119, %v5650_v9  }
 0x256   :  { %4058 = vperm.xlu0 %5117, %v5684_v33  }
 0x258   :  { %3540 = vperm.xlu1 %5119, %v5670_v17  }
 0x25a   :  { %4063 = vperm.xlu0 %5117, %v5691_v41  }
 0x25c   :  { %3545 = vperm.xlu1 %5119, %v5656_v10  }
 0x25e   :  { %5121 = vset.pattern.permute.xlu0 %v7177_v0 }
 0x25f   :  { %2624 = vperm.xlu0 %5121, %v5644_v6  }
 0x260   :  { %3550 = vperm.xlu1 %5119, %v5677_v18  }
 0x263   :  { %2632 = vperm.xlu0 %5121, %v5670_v17  }
 0x264   :  { %3555 = vperm.xlu1 %5119, %v5684_v33  }
 0x267   :  { %2640 = vperm.xlu0 %5121, %v5677_v18  }
 0x268   :  { %3560 = vperm.xlu1 %5119, %v5691_v41  }
 0x26b   :  { %2648 = vperm.xlu0 %5121, %v5691_v41  }
 0x26c   :  { %5120 = vset.pattern.permute.xlu1 %v7177_v0 }
 0x26d   :  { %2620 = vperm.xlu1 %5120, %v5662_v13  }
 0x26f   :  { %3630 = vperm.xlu0 %5121, %v5644_v6  }
 0x271   :  { %3123 = vperm.xlu1 %5120, %v5662_v13  }
 0x273   :  { %3638 = vperm.xlu0 %5121, %v5670_v17  }
 0x275   :  { %3127 = vperm.xlu1 %5120, %v5644_v6  }
 0x277   :  { %3646 = vperm.xlu0 %5121, %v5677_v18  }
 0x27b   :  { %3654 = vperm.xlu0 %5121, %v5691_v41  }
 0x2ad   :  { %v845_v7 = vpop.f32.mrb[10].mxu0 }
 0x2ae   :  { %v5713_v12 = vmul.f32 0.125, %v845_v7  ;;  %v4697_v22 = vpop.f32.mrb[11].mxu0 }
 0x2b0   :  { %v5724_v26 = vmax.f32 %v2225_v37, %v5713_v12  ;;  %v5737_v37 = vpop.permute.xlu0 %1176 }
 0x2b1   :  { %v4702_v27 = vpop.f32.mrb[12].mxu0 }
 0x2b2   :  { %v5727_v28 = vadd.f32 %v4702_v27, %v877_v34  ;;  %v1002_v29 = vpop.f32.mrb[13].mxu0 }
 0x2b3   :  { %v5730_v30 = vadd.f32 %v1002_v29, %v872_v38 }
 0x2b4   :  { %7374 = vst [vmem:[#allocation27_spill] sm:$0xff] %v5727_v28 }
 0x2b5   :  { %7375 = vst [vmem:[#allocation28_spill] sm:$0xff] %v5730_v30  ;;  %v4705_v14 = vpop.f32.mrb[14].mxu0  ;;  %v4976_v46 = vpack.c.bf16 %v5727_v28, %v5730_v30 }
 0x2b6   :  { %v5739_v56 = vadd.f32 %v4705_v14, %v887_v42  ;;  %v1012_v7 = vpop.f32.mrb[15].mxu0  ;;  %v5751_v42 = vpop.permute.xlu1 %1426 }
 0x2b7   :  { %v5742_v34 = vadd.f32 %v1012_v7, %v882_v44  ;;  %4977 = vmatpush3.bf16.msra.mxu1 %v4976_v46  ;;  %v5756_v44 = vpop.permute.xlu0 %1421 }
 0x2b8   :  { %7376 = vst [vmem:[#allocation29_spill] sm:$0xff] %v5739_v56  ;;  %4978 = vmatprep.subr.bf16.mxu1 %v5167_v19 }
 0x2b9   :  { %7377 = vst [vmem:[#allocation30_spill] sm:$0xff] %v5742_v34  ;;  %v4708_v38 = vpop.f32.mrb[16].mxu0  ;;  %v4979_v22 = vpack.c.bf16 %v5739_v56, %v5742_v34 }
 0x2ba   :  { %v5748_v27 = vadd.f32 %v4708_v38, %v897_v49  ;;  %v1022_v29 = vpop.f32.mrb[17].mxu0 }
 0x2bb   :  { %v5753_v14 = vadd.f32 %v1022_v29, %v892_v53  ;;  %4980 = vmatpush3.bf16.msra.mxu1 %v4979_v22  ;;  %v1437_v22 = vpop.permute.xlu1 %1436 }
 0x2bc   :  { %7378 = vst [vmem:[#allocation31_spill] sm:$0xff] %v5748_v27  ;;  %4981 = vmatprep.subr.bf16.mxu1 %v5167_v19 }
 0x2bd   :  { %7379 = vst [vmem:[#allocation32_spill] sm:$0xff] %v5753_v14  ;;  %v4711_v46 = vpop.f32.mrb[18].mxu0  ;;  %v4982_v49 = vpack.c.bf16 %v5748_v27, %v5753_v14  ;;  %v1432_v27 = vpop.permute.xlu0 %1431 }
 0x2be   :  { %v5762_v7 = vadd.f32 %v4711_v46, %v907_v54  ;;  %v1032_v38 = vpop.f32.mrb[19].mxu0 }
 0x2bf   :  { %v5765_v53 = vadd.f32 %v1032_v38, %v902_v59  ;;  %4983 = vmatpush3.bf16.msra.mxu1 %v4982_v49  ;;  %v1050_v59 = vld [vmem:[%s7164_s1] sm:$0xf] }
 0x2c0   :  { %7380 = vst [vmem:[#allocation33_spill] sm:$0xff] %v5762_v7  ;;  %4984 = vmatprep.subr.bf16.mxu1 %v5167_v19 }
 0x2c1   :  { %7381 = vst [vmem:[#allocation34_spill] sm:$0xff] %v5765_v53  ;;  %v4735_v29 = vpop.f32.mrb[20].mxu0  ;;  %v4985_v20 = vpack.c.bf16 %v5762_v7, %v5765_v53  ;;  %v1442_v0 = vpop.permute.xlu0 %1441 }
 0x2c2   :  { %v5771_v14 = vadd.f32 %v4735_v29, %v1152_v60  ;;  %v1277_v54 = vpop.f32.mrb[21].mxu0 }
 0x2c3   :  { %v5775_v46 = vadd.f32 %v1277_v54, %v5702_v1  ;;  %4986 = vmatpush3.bf16.msra.mxu1 %v4985_v20  ;;  %v1447_v20 = vpop.permute.xlu1 %1446  ;;  %v7386_v54 = vmov 0.0  }
 0x2c4   :  { %7382 = vst [vmem:[#allocation35_spill] sm:$0xff] %v5771_v14  ;;  %4987 = vmatprep.subr.bf16.mxu1 %v5167_v19 }
 0x2c5   :  { %7383 = vst [vmem:[#allocation36_spill] sm:$0xff] %v5775_v46  ;;  %v4738_v49 = vpop.f32.mrb[22].mxu0  ;;  %v4988_v60 = vpack.c.bf16 %v5771_v14, %v5775_v46  ;;  %v7185_v46 = vmov 2  }
 0x2c6   :  { %v5785_v38 = vadd.f32 %v4738_v49, %v5706_v3  ;;  %4729 = vmatmul.mubr.msk.f32.vlgmr.msra.gmra.mrb[18].mxu1 %vm225_vm3, %v1050_v59  ;;  %v1287_v1 = vpop.f32.mrb[23].mxu0  ;;  %5122 = vset.pattern.permute.xlu1 %v7185_v46 }
 0x2c7   :  { %v5790_v29 = vadd.f32 %v1287_v1, %v5709_v4  ;;  %4989 = vmatpush3.bf16.msra.mxu1 %v4988_v60  ;;  %4761 = vmatprep.mubr.msk.f32.mxu1 %vm5168_vm2, %v7386_v54  ;;  %v1457_v60 = vpop.permute.xlu1 %1456 }
 0x2c8   :  { %7384 = vst [vmem:[#allocation37_spill] sm:$0xff] %v5785_v38  ;;  %4990 = vmatprep.subr.bf16.mxu1 %v5167_v19  ;;  %2664 = vperm.xlu1 %5122, %v5644_v6  }
 0x2c9   :  { %7385 = vst [vmem:[#allocation38_spill] sm:$0xff] %v5790_v29  ;;  %v4741_v3 = vpop.f32.mrb[24].mxu0  ;;  %v4991_v59 = vpack.c.bf16 %v5785_v38, %v5790_v29 }
 0x2ca   :  { %v5799_v49 = vadd.f32 %v4741_v3, %v5716_v24  ;;  %v1297_v14 = vpop.f32.mrb[25].mxu0  ;;  %v1452_v3 = vpop.permute.xlu0 %1451 }
 0x2cb   :  { %v5803_v4 = vadd.f32 %v1297_v14, %v5718_v25  ;;  %4992 = vmatpush3.bf16.msra.mxu1 %v4991_v59 }
 0x2cc   :  { %7387 = vst [vmem:[#allocation39_spill] sm:$0xff] %v5799_v49  ;;  %4993 = vmatprep.subr.bf16.mxu1 %v5167_v19  ;;  %3163 = vperm.xlu1 %5122, %v5662_v13  }
 0x2cd   :  { %7388 = vst [vmem:[#allocation40_spill] sm:$0xff] %v5803_v4  ;;  %v4744_v1 = vpop.f32.mrb[26].mxu0  ;;  %v4994_v24 = vpack.c.bf16 %v5799_v49, %v5803_v4 }
 0x2ce   :  { %v5811_v38 = vadd.f32 %v4744_v1, %v5732_v5  ;;  %v1307_v46 = vpop.f32.mrb[27].mxu0  ;;  %v1702_v1 = vpop.permute.xlu1 %1701 }
 0x2cf   :  { %v5814_v25 = vadd.f32 %v1307_v46, %v5737_v37  ;;  %4995 = vmatpush3.bf16.msra.mxu1 %v4994_v24  ;;  %v1325_v37 = vld [vmem:[%s7164_s1] sm:$0xf]  ;;  %v7393_v46 = vmov 1   ;;  %v1697_v24 = vpop.permute.xlu0 %1696 }
 0x2d0   :  { %7389 = vst [vmem:[#allocation41_spill] sm:$0xff] %v5811_v38  ;;  %4996 = vmatprep.subr.bf16.mxu1 %v5167_v19  ;;  %5123 = vset.pattern.permute.xlu1 %v7393_v46 }
 0x2d1   :  { %7390 = vst [vmem:[#allocation42_spill] sm:$0xff] %v5814_v25  ;;  %v4768_v14 = vpop.f32.mrb[28].mxu0  ;;  %v4997_v59 = vpack.c.bf16 %v5811_v38, %v5814_v25  ;;  %2628 = vperm.xlu1 %5123, %v5650_v9  }
 0x2d2   :  { %v5822_v49 = vadd.f32 %v4768_v14, %v5751_v42  ;;  %v1552_v5 = vpop.f32.mrb[29].mxu0 }
 0x2d3   :  { %v5825_v4 = vadd.f32 %v1552_v5, %v5756_v44  ;;  %4998 = vmatpush3.bf16.msra.mxu1 %v4997_v59  ;;  %v1712_v5 = vpop.permute.xlu1 %1711 }
 0x2d4   :  { %7391 = vst [vmem:[#allocation43_spill] sm:$0xff] %v5822_v49  ;;  %4999 = vmatprep.subr.bf16.mxu1 %v5167_v19 }
 0x2d5   :  { %7392 = vst [vmem:[#allocation44_spill] sm:$0xff] %v5825_v4  ;;  %v4771_v38 = vpop.f32.mrb[30].mxu0  ;;  %v5000_v42 = vpack.c.bf16 %v5822_v49, %v5825_v4  ;;  %3131 = vperm.xlu1 %5123, %v5650_v9   ;;  %v7398_v4 = vmov 2  }
 0x2d6   :  { %v5836_v44 = vadd.f32 %v4771_v38, %v1437_v22  ;;  %4762 = vmatmul.mubr.msk.f32.vlgmr.msra.gmra.mrb[20].mxu1 %vm225_vm3, %v1325_v37  ;;  %v1562_v14 = vpop.f32.mrb[31].mxu0  ;;  %v1707_v22 = vpop.permute.xlu0 %1706  ;;  %5136 = vset.pattern.permute.xlu0 %v7398_v4 }
 0x2d7   :  { %v5839_v59 = vadd.f32 %v1562_v14, %v1432_v27  ;;  %5001 = vmatpush3.bf16.msra.mxu1 %v5000_v42  ;;  %4794 = vmatprep.mubr.msk.f32.mxu1 %vm5168_vm2, %v7386_v54 }
 0x2d8   :  { %7394 = vst [vmem:[#allocation45_spill] sm:$0xff] %v5836_v44  ;;  %5002 = vmatprep.subr.bf16.mxu1 %v5167_v19  ;;  %2660 = vperm.xlu0 %5136, %v5662_v13  }
 0x2d9   :  { %7395 = vst [vmem:[#allocation46_spill] sm:$0xff] %v5839_v59  ;;  %v4774_v25 = vpop.f32.mrb[32].mxu0  ;;  %v5003_v49 = vpack.c.bf16 %v5836_v44, %v5839_v59  ;;  %3135 = vperm.xlu1 %5123, %v5670_v17  }
 0x2da   :  { %v5848_v38 = vadd.f32 %v4774_v25, %v1447_v20  ;;  %v1572_v27 = vpop.f32.mrb[33].mxu0  ;;  %v1722_v20 = vpop.permute.xlu1 %1721 }
 0x2db   :  { %v5850_v37 = vadd.f32 %v1572_v27, %v1442_v0  ;;  %5004 = vmatpush3.bf16.msra.mxu1 %v5003_v49  ;;  %v1717_v0 = vpop.permute.xlu0 %1716 }
 0x2dc   :  { %7396 = vst [vmem:[#allocation47_spill] sm:$0xff] %v5848_v38  ;;  %5005 = vmatprep.subr.bf16.mxu1 %v5167_v19  ;;  %3167 = vperm.xlu0 %5136, %v5644_v6  }
 0x2dd   :  { %7397 = vst [vmem:[#allocation48_spill] sm:$0xff] %v5850_v37  ;;  %v4777_v42 = vpop.f32.mrb[34].mxu0  ;;  %v5006_v14 = vpack.c.bf16 %v5848_v38, %v5850_v37  ;;  %5124 = vset.pattern.permute.xlu1 %v7398_v4 }
 0x2de   :  { %v5857_v44 = vadd.f32 %v4777_v42, %v1457_v60  ;;  %v1582_v59 = vpop.f32.mrb[35].mxu0  ;;  %2672 = vperm.xlu1 %5124, %v5670_v17  }
 0x2df   :  { %v5860_v25 = vadd.f32 %v1582_v59, %v1452_v3  ;;  %5007 = vmatpush3.bf16.msra.mxu1 %v5006_v14  ;;  %v1600_v3 = vld [vmem:[%s7164_s1] sm:$0xf]  ;;  %v1732_v59 = vpop.permute.xlu1 %1731 }
 0x2e0   :  { %7399 = vst [vmem:[#allocation49_spill] sm:$0xff] %v5857_v44  ;;  %5008 = vmatprep.subr.bf16.mxu1 %v5167_v19  ;;  %2668 = vperm.xlu0 %5136, %v5650_v9  }
 0x2e1   :  { %7400 = vst [vmem:[#allocation50_spill] sm:$0xff] %v5860_v25  ;;  %v4801_v49 = vpop.f32.mrb[36].mxu0  ;;  %v5009_v27 = vpack.c.bf16 %v5857_v44, %v5860_v25 }
 0x2e2   :  { %v5867_v60 = vadd.f32 %v4801_v49, %v1702_v1  ;;  %v1827_v42 = vpop.f32.mrb[37].mxu0  ;;  %3171 = vperm.xlu1 %5124, %v5650_v9   ;;  %v1727_v1 = vpop.permute.xlu0 %1726 }
 0x2e3   :  { %v5870_v38 = vadd.f32 %v1827_v42, %v1697_v24  ;;  %5010 = vmatpush3.bf16.msra.mxu1 %v5009_v27 }
 0x2e4   :  { %7401 = vst [vmem:[#allocation51_spill] sm:$0xff] %v5867_v60  ;;  %5011 = vmatprep.subr.bf16.mxu1 %v5167_v19  ;;  %3175 = vperm.xlu0 %5136, %v5670_v17  }
 0x2e5   :  { %7402 = vst [vmem:[#allocation52_spill] sm:$0xff] %v5870_v38  ;;  %v4804_v14 = vpop.f32.mrb[38].mxu0  ;;  %v5012_v44 = vpack.c.bf16 %v5867_v60, %v5870_v38 }
 0x2e6   :  { %v5879_v49 = vadd.f32 %v4804_v14, %v1712_v5  ;;  %4795 = vmatmul.mubr.msk.f32.vlgmr.msra.gmra.mrb[22].mxu1 %vm225_vm3, %v1600_v3  ;;  %v1837_v24 = vpop.f32.mrb[39].mxu0  ;;  %5125 = vset.pattern.permute.xlu1 %v7393_v46  ;;  %v1972_v14 = vpop.permute.xlu0 %1971 }
 0x2e7   :  { %v5883_v27 = vadd.f32 %v1837_v24, %v1707_v22  ;;  %5013 = vmatpush3.bf16.msra.mxu1 %v5012_v44  ;;  %4827 = vmatprep.mubr.msk.f32.mxu1 %vm5168_vm2, %v7386_v54  ;;  %v1977_v22 = vpop.permute.xlu1 %1976 }
 0x2e8   :  { %7403 = vst [vmem:[#allocation53_spill] sm:$0xff] %v5879_v49  ;;  %5014 = vmatprep.subr.bf16.mxu1 %v5167_v19  ;;  %2636 = vperm.xlu1 %5125, %v5656_v10  }
 0x2e9   :  { %7404 = vst [vmem:[#allocation54_spill] sm:$0xff] %v5883_v27  ;;  %v4807_v42 = vpop.f32.mrb[40].mxu0  ;;  %v5015_v60 = vpack.c.bf16 %v5879_v49, %v5883_v27  ;;  %2676 = vperm.xlu0 %5136, %v5656_v10  }
 0x2ea   :  { %v5891_v5 = vadd.f32 %v4807_v42, %v1722_v20  ;;  %v1847_v3 = vpop.f32.mrb[41].mxu0  ;;  %v1982_v38 = vpop.permute.xlu0 %1981 }
 0x2eb   :  { %v5895_v44 = vadd.f32 %v1847_v3, %v1717_v0  ;;  %5016 = vmatpush3.bf16.msra.mxu1 %v5015_v60  ;;  %v1987_v0 = vpop.permute.xlu1 %1986 }
 0x2ec   :  { %7405 = vst [vmem:[#allocation55_spill] sm:$0xff] %v5891_v5  ;;  %5017 = vmatprep.subr.bf16.mxu1 %v5167_v19  ;;  %3139 = vperm.xlu1 %5125, %v5656_v10  }
 0x2ed   :  { %7406 = vst [vmem:[#allocation56_spill] sm:$0xff] %v5895_v44  ;;  %v4810_v24 = vpop.f32.mrb[42].mxu0  ;;  %v5018_v49 = vpack.c.bf16 %v5891_v5, %v5895_v44  ;;  %3183 = vperm.xlu0 %5136, %v5677_v18  }
 0x2ee   :  { %v5900_v27 = vadd.f32 %v4810_v24, %v1732_v59  ;;  %v1857_v20 = vpop.f32.mrb[43].mxu0 }
 0x2ef   :  { %v5904_v42 = vadd.f32 %v1857_v20, %v1727_v1  ;;  %5019 = vmatpush3.bf16.msra.mxu1 %v5018_v49  ;;  %v1875_v1 = vld [vmem:[%s7164_s1] sm:$0xf] }
 0x2f0   :  { %7407 = vst [vmem:[#allocation57_spill] sm:$0xff] %v5900_v27  ;;  %5020 = vmatprep.subr.bf16.mxu1 %v5167_v19  ;;  %3143 = vperm.xlu1 %5125, %v5677_v18  }
 0x2f1   :  { %7408 = vst [vmem:[#allocation58_spill] sm:$0xff] %v5904_v42  ;;  %v4834_v60 = vpop.f32.mrb[44].mxu0  ;;  %v5021_v3 = vpack.c.bf16 %v5900_v27, %v5904_v42  ;;  %2684 = vperm.xlu0 %5136, %v5684_v33  }
 0x2f2   :  { %v5909_v25 = vadd.f32 %v4834_v60, %v1977_v22  ;;  %v2102_v59 = vpop.f32.mrb[45].mxu0 }
 0x2f3   :  { %v5913_v24 = vadd.f32 %v2102_v59, %v1972_v14  ;;  %5022 = vmatpush3.bf16.msra.mxu1 %v5021_v3  ;;  %v1997_v14 = vpop.permute.xlu1 %1996  ;;  %v1992_v3 = vpop.permute.xlu0 %1991 }
 0x2f4   :  { %7409 = vst [vmem:[#allocation59_spill] sm:$0xff] %v5909_v25  ;;  %5023 = vmatprep.subr.bf16.mxu1 %v5167_v19  ;;  %5126 = vset.pattern.permute.xlu1 %v7398_v4 }
 0x2f5   :  { %7410 = vst [vmem:[#allocation60_spill] sm:$0xff] %v5913_v24  ;;  %v4837_v49 = vpop.f32.mrb[46].mxu0  ;;  %v5024_v20 = vpack.c.bf16 %v5909_v25, %v5913_v24  ;;  %2680 = vperm.xlu1 %5126, %v5677_v18   ;;  %3191 = vperm.xlu0 %5136, %v5691_v41  }
 0x2f6   :  { %v5921_v22 = vadd.f32 %v4837_v49, %v1987_v0  ;;  %4828 = vmatmul.mubr.msk.f32.vlgmr.msra.gmra.mrb[24].mxu1 %vm225_vm3, %v1875_v1  ;;  %v2112_v60 = vpop.f32.mrb[47].mxu0 }
 0x2f7   :  { %v5925_v59 = vadd.f32 %v2112_v60, %v1982_v38  ;;  %5025 = vmatpush3.bf16.msra.mxu1 %v5024_v20  ;;  %4860 = vmatprep.mubr.msk.f32.mxu1 %vm5168_vm2, %v7386_v54  ;;  %v2007_v54 = vpop.permute.xlu1 %2006 }
 0x2f8   :  { %7411 = vst [vmem:[#allocation61_spill] sm:$0xff] %v5921_v22  ;;  %5026 = vmatprep.subr.bf16.mxu1 %v5167_v19 }
 0x2f9   :  { %7412 = vst [vmem:[#allocation62_spill] sm:$0xff] %v5925_v59  ;;  %v4840_v25 = vpop.f32.mrb[48].mxu0  ;;  %v5027_v0 = vpack.c.bf16 %v5921_v22, %v5925_v59  ;;  %3179 = vperm.xlu1 %5126, %v5656_v10   ;;  %v2002_v22 = vpop.permute.xlu0 %2001  ;;  %3666 = vperm.xlu0 %5136, %v5662_v13  }
 0x2fa   :  { %v5934_v1 = vadd.f32 %v4840_v25, %v1997_v14  ;;  %v2122_v49 = vpop.f32.mrb[49].mxu0 }
 0x2fb   :  { %v5936_v38 = vadd.f32 %v2122_v49, %v1992_v3  ;;  %5028 = vmatpush3.bf16.msra.mxu1 %v5027_v0  ;;  %v2150_v0 = vld [vmem:[%s7164_s1] sm:$0xf] }
 0x2fc   :  { %7413 = vst [vmem:[#allocation63_spill] sm:$0xff] %v5934_v1  ;;  %5029 = vmatprep.subr.bf16.mxu1 %v5167_v19 }
 0x2fd   :  { %7414 = vst [vmem:[#allocation64_spill] sm:$0xff] %v5936_v38  ;;  %v4843_v20 = vpop.f32.mrb[50].mxu0  ;;  %v5030_v60 = vpack.c.bf16 %v5934_v1, %v5936_v38  ;;  %5127 = vset.pattern.permute.xlu1 %v7393_v46  ;;  %4173 = vperm.xlu0 %5136, %v5644_v6  }
 0x2fe   :  { %v5943_v59 = vadd.f32 %v4843_v20, %v2007_v54  ;;  %v2132_v25 = vpop.f32.mrb[51].mxu0  ;;  %2644 = vperm.xlu1 %5127, %v5684_v33  }
 0x2ff   :  { %v5945_v14 = vadd.f32 %v2132_v25, %v2002_v22  ;;  %5031 = vmatpush3.bf16.msra.mxu1 %v5030_v60  ;;  %v5982_v22 = vpop.permute.xlu1 %2523 }
 0x300   :  { %7415 = vst [vmem:[#allocation65_spill] sm:$0xff] %v5943_v59  ;;  %5032 = vmatprep.subr.bf16.mxu1 %v5167_v19  ;;  %v7417_v19 = vmov 0   ;;  %7418 = vst [vmem:[#allocation67_spill] sm:$0xff] %v5982_v22 }
 0x301   :  { %7416 = vst [vmem:[#allocation66_spill] sm:$0xff] %v5945_v14  ;;  %v5033_v3 = vpack.c.bf16 %v5943_v59, %v5945_v14  ;;  %3674 = vperm.xlu0 %5136, %v5650_v9  }
 0x302   :  { %3147 = vperm.xlu1 %5127, %v5684_v33  }
 0x303   :  { %5034 = vmatpush3.bf16.msra.mxu1 %v5033_v3  ;;  %v5986_v49 = vpop.permute.xlu1 %2528 }
 0x304   :  { %7419 = vst [vmem:[#allocation68_spill] sm:$0xff] %v5986_v49 }
 0x305   :  { %4181 = vperm.xlu0 %5136, %v5670_v17  }
 0x306   :  { %4861 = vmatmul.mubr.msk.f32.vlgmr.msra.gmra.mrb[26].mxu1 %vm225_vm3, %v2150_v0  ;;  %3151 = vperm.xlu1 %5127, %v5691_v41  }
 0x309   :  { %3682 = vperm.xlu0 %5136, %v5656_v10  }
 0x30a   :  { %5128 = vset.pattern.permute.xlu1 %v7398_v4 }
 0x30b   :  { %2688 = vperm.xlu1 %5128, %v5691_v41  }
 0x30d   :  { %4189 = vperm.xlu0 %5136, %v5677_v18  }
 0x30f   :  { %3187 = vperm.xlu1 %5128, %v5684_v33  }
 0x311   :  { %3690 = vperm.xlu0 %5136, %v5684_v33  }
 0x313   :  { %5129 = vset.pattern.permute.xlu1 %v7393_v46 }
 0x314   :  { %3626 = vperm.xlu1 %5129, %v5662_v13  }
 0x315   :  { %4197 = vperm.xlu0 %5136, %v5691_v41  }
 0x318   :  { %4129 = vperm.xlu1 %5129, %v5662_v13  }
 0x319   :  { %5139 = vset.pattern.permute.xlu0 %v7417_v19 }
 0x31c   :  { %4133 = vperm.xlu1 %5129, %v5644_v6  }
 0x320   :  { %5130 = vset.pattern.permute.xlu1 %v7398_v4 }
 0x321   :  { %3670 = vperm.xlu1 %5130, %v5644_v6   ;;  %v5990_v6 = vpop.permute.xlu1 %2538 }
 0x322   :  { %7420 = vst [vmem:[#allocation69_spill] sm:$0xff] %v5990_v6 }
 0x325   :  { %4169 = vperm.xlu1 %5130, %v5662_v13   ;;  %v5994_v13 = vpop.permute.xlu1 %3022 }
 0x326   :  { %7421 = vst [vmem:[#allocation70_spill] sm:$0xff] %v5994_v13 }
 0x329   :  { %5131 = vset.pattern.permute.xlu1 %v7393_v46 }
 0x32a   :  { %3634 = vperm.xlu1 %5131, %v5650_v9  }
 0x32e   :  { %4137 = vperm.xlu1 %5131, %v5650_v9  }
 0x332   :  { %4141 = vperm.xlu1 %5131, %v5670_v17  }
 0x336   :  { %5132 = vset.pattern.permute.xlu1 %v7398_v4 }
 0x337   :  { %3678 = vperm.xlu1 %5132, %v5670_v17   ;;  %v5998_v17 = vpop.permute.xlu1 %3032 }
 0x338   :  { %7422 = vst [vmem:[#allocation71_spill] sm:$0xff] %v5998_v17 }
 0x33b   :  { %4177 = vperm.xlu1 %5132, %v5650_v9   ;;  %v6001_v9 = vpop.permute.xlu1 %3037 }
 0x33c   :  { %7423 = vst [vmem:[#allocation72_spill] sm:$0xff] %v6001_v9 }
 0x33f   :  { %5133 = vset.pattern.permute.xlu1 %v7393_v46  ;;  %v6006_v54 = vpop.permute.xlu1 %3047 }
 0x340   :  { %3642 = vperm.xlu1 %5133, %v5656_v10   ;;  %7424 = vst [vmem:[#allocation73_spill] sm:$0xff] %v6006_v54 }
 0x343   :  { %v6009_v20 = vpop.permute.xlu1 %3052 }
 0x344   :  { %4145 = vperm.xlu1 %5133, %v5656_v10   ;;  %7425 = vst [vmem:[#allocation74_spill] sm:$0xff] %v6009_v20 }
 0x348   :  { %4149 = vperm.xlu1 %5133, %v5677_v18  }
 0x34c   :  { %5134 = vset.pattern.permute.xlu1 %v7398_v4 }
 0x34d   :  { %3686 = vperm.xlu1 %5134, %v5677_v18   ;;  %v6013_v18 = vpop.permute.xlu1 %2553 }
 0x34e   :  { %7426 = vst [vmem:[#allocation75_spill] sm:$0xff] %v6013_v18 }
 0x351   :  { %4185 = vperm.xlu1 %5134, %v5656_v10  }
 0x355   :  { %5135 = vset.pattern.permute.xlu1 %v7393_v46 }
 0x356   :  { %3650 = vperm.xlu1 %5135, %v5684_v33  }
 0x35a   :  { %4153 = vperm.xlu1 %5135, %v5684_v33  }
 0x35e   :  { %4157 = vperm.xlu1 %5135, %v5691_v41  }
 0x362   :  { %5137 = vset.pattern.permute.xlu1 %v7398_v4 }
 0x363   :  { %3694 = vperm.xlu1 %5137, %v5691_v41  }
 0x367   :  { %4193 = vperm.xlu1 %5137, %v5684_v33   ;;  %v6018_v33 = vpop.permute.xlu1 %3525 }
 0x368   :  { %7427 = vst [vmem:[#allocation76_spill] sm:$0xff] %v6018_v33 }
 0x36b   :  { %5138 = vset.pattern.permute.xlu1 %v7417_v19  ;;  %v6020_v19 = vpop.permute.xlu1 %3530 }
 0x36c   :  { %7428 = vst [vmem:[#allocation77_spill] sm:$0xff] %v6020_v19 }
 0x399   :  { %v1120_v10 = vpop.f32.mrb[18].mxu1 }
 0x39a   :  { %v1124_v46 = vmul.f32 0.125, %v1120_v10  ;;  %v4730_v60 = vpop.f32.mrb[19].mxu1 }
 0x39c   :  { %v2227_v25 = vmax.f32 %v5724_v26, %v1124_v46 }
 0x3a9   :  { %v1395_v3 = vpop.f32.mrb[20].mxu1 }
 0x3aa   :  { %v1399_v0 = vmul.f32 0.125, %v1395_v3  ;;  %v4763_v54 = vpop.f32.mrb[21].mxu1 }
 0x3ac   :  { %v2228_v9 = vmax.f32 %v2227_v25, %v1399_v0 }
 0x3b9   :  { %v1670_v20 = vpop.f32.mrb[22].mxu1 }
 0x3ba   :  { %v1674_v17 = vmul.f32 0.125, %v1670_v20  ;;  %v4796_v4 = vpop.f32.mrb[23].mxu1 }
 0x3bc   :  { %v2229_v13 = vmax.f32 %v2228_v9, %v1674_v17  ;;  %v6025_v9 = vpop.permute.xlu1 %4033 }
 0x3bd   :  { %7429 = vst [vmem:[#allocation78_spill] sm:$0xff] %v6025_v9 }
 0x3c9   :  { %v1945_v41 = vpop.f32.mrb[24].mxu1 }
 0x3ca   :  { %v1949_v6 = vmul.f32 0.125, %v1945_v41  ;;  %v4829_v18 = vpop.f32.mrb[25].mxu1 }
 0x3cc   :  { %v2230_v49 = vmax.f32 %v2229_v13, %v1949_v6 }
 0x3d9   :  { %v2220_v10 = vpop.f32.mrb[26].mxu1 }
 0x3da   :  { %v2224_v60 = vmul.f32 0.125, %v2220_v10  ;;  %v4862_v22 = vpop.f32.mrb[27].mxu1 }
 0x3dc   :  { %v2231_v26 = vmax.f32 %v2230_v49, %v2224_v60  ;;  %v6027_v49 = vpop.permute.xlu1 %3535 }
 0x3dd   :  { %7430 = vst [vmem:[#allocation79_spill] sm:$0xff] %v6027_v49 }
 0x3de   :  { %v2232_v3 = vsub.f32 %v5499_v31, %v2231_v26  ;;  %v2235_v54 = vsub.f32 %v5501_v32, %v2231_v26  ;;  %v2238_v20 = vsub.f32 %v5713_v12, %v2231_v26  ;;  %v2241_v25 = vsub.f32 %v1124_v46, %v2231_v26 }
 0x3df   :  { %v2244_v4 = vsub.f32 %v1399_v0, %v2231_v26  ;;  %v2247_v18 = vsub.f32 %v1674_v17, %v2231_v26  ;;  %v2250_v13 = vsub.f32 %v1949_v6, %v2231_v26  ;;  %v2253_v41 = vsub.f32 %v2224_v60, %v2231_v26 }
 0x3e0   :  { %v2233_v33 = vmul.f32 1.442695, %v2232_v3  ;;  %v2236_v59 = vmul.f32 1.442695, %v2235_v54  ;;  %v2239_v19 = vmul.f32 1.442695, %v2238_v20  ;;  %v6029_v46 = vpop.permute.xlu1 %3540 }
 0x3e1   :  { %v2242_v22 = vmul.f32 1.442695, %v2241_v25  ;;  %v2245_v31 = vmul.f32 1.442695, %v2244_v4  ;;  %v2248_v32 = vmul.f32 1.442695, %v2247_v18 }
 0x3e2   :  { %5140 = vpow2.f32 %v2233_v33  ;;  %v2251_v12 = vmul.f32 1.442695, %v2250_v13  ;;  %7431 = vst [vmem:[#allocation80_spill] sm:$0xff] %v6029_v46  ;;  %v2254_v17 = vmul.f32 1.442695, %v2253_v41 }
 0x3e3   :  { %5142 = vpow2.f32 %v2236_v59 }
 0x3e4   :  { %5144 = vpow2.f32 %v2239_v19  ;;  %v6031_v26 = vpop.permute.xlu1 %3545 }
 0x3e5   :  { %5146 = vpow2.f32 %v2242_v22  ;;  %7432 = vst [vmem:[#allocation81_spill] sm:$0xff] %v6031_v26 }
 0x3e6   :  { %5148 = vpow2.f32 %v2245_v31 }
 0x3e7   :  { %5150 = vpow2.f32 %v2248_v32  ;;  %v2300_v32 = vlaneseq }
 0x3e8   :  { %5152 = vpow2.f32 %v2251_v12  ;;  %v6033_v18 = vpop.permute.xlu1 %3550 }
 0x3e9   :  { %5154 = vpow2.f32 %v2254_v17  ;;  %7433 = vst [vmem:[#allocation82_spill] sm:$0xff] %v6033_v18  ;;  %v6037_v12 = vshrl.u32 %v2300_v32, 7 }
 0x3ec   :  { %v5141_v6 = vpop.eup %5140  ;;  %v6035_v31 = vpop.permute.xlu1 %3555 }
 0x3ed   :  { %v5143_v0 = vpop.eup %5142  ;;  %7434 = vst [vmem:[#allocation83_spill] sm:$0xff] %v6035_v31 }
 0x3ee   :  { %v2256_v10 = vadd.f32 %v5143_v0, %v5141_v6  ;;  %v5145_v60 = vpop.eup %5144 }
 0x3ef   :  { %v5147_v33 = vpop.eup %5146 }
 0x3f0   :  { %v2257_v59 = vadd.f32 %v5145_v60, %v2256_v10  ;;  %v5149_v3 = vpop.eup %5148  ;;  %v6039_v17 = vpop.permute.xlu1 %3560  ;;  %v6042_v10 = vsub.s32 0, %v6037_v12 }
 0x3f1   :  { %v5151_v20 = vpop.eup %5150  ;;  %7435 = vst [vmem:[#allocation84_spill] sm:$0xff] %v6039_v17 }
 0x3f2   :  { %v2258_v19 = vadd.f32 %v5147_v33, %v2257_v59  ;;  %v5153_v4 = vpop.eup %5152 }
 0x3f3   :  { %v5155_v41 = vpop.eup %5154 }
 0x3f4   :  { %v2259_v54 = vadd.f32 %v5149_v3, %v2258_v19  ;;  %v6044_v19 = vpop.permute.xlu1 %2620 }
 0x3f5   :  { %7436 = vst [vmem:[#allocation85_spill] sm:$0xff] %v6044_v19 }
 0x3f6   :  { %v2260_v25 = vadd.f32 %v5151_v20, %v2259_v54 }
 0x3f8   :  { %v2261_v13 = vadd.f32 %v5153_v4, %v2260_v25  ;;  %v6090_v49 = vpop.permute.xlu1 %3123 }
 0x3f9   :  { %7445 = vst [vmem:[#allocation94_spill] sm:$0xff] %v6090_v49 }
 0x3fa   :  { %v2262_v22 = vadd.f32 %v5155_v41, %v2261_v13 }
 0x3fc   :  { %5156 = vrcp.f32 %v2262_v22 }
 0x406   :  { %v5157_v59 = vpop.eup %5156 }
 0x407   :  { %v6046_v54 = vmul.f32 %v5157_v59, %v5141_v6  ;;  %v6048_v9 = vmul.f32 %v5157_v59, %v5143_v0  ;;  %v6050_v25 = vmul.f32 %v5157_v59, %v5145_v60  ;;  %v6052_v13 = vmul.f32 %v5157_v59, %v5147_v33 }
 0x408   :  { %v6054_v22 = vmul.f32 %v5157_v59, %v5149_v3  ;;  %v6056_v32 = vmul.f32 %v5157_v59, %v5151_v20  ;;  %v6058_v31 = vmul.f32 %v5157_v59, %v5153_v4  ;;  %v6060_v17 = vmul.f32 %v5157_v59, %v5155_v41 }
 0x409   :  { %7437 = vst [vmem:[#allocation86_spill] sm:$0xff] %v6046_v54  ;;  %7438 = vst [vmem:[#allocation87_spill] sm:$0xff] %v6048_v9  ;;  %v2273_v18 = vrot.slane %v6048_v9, 4  ;;  %v2276_v19 = vrot.slane %v6052_v13, 4  ;;  %v2303_v6 = vrot.slane %v6046_v54, %v6042_v10  ;;  %v2323_v33 = vrot.slane %v6048_v9, %v6042_v10 }
 0x40a   :  { %7439 = vst [vmem:[#allocation88_spill] sm:$0xff] %v6050_v25  ;;  %7440 = vst [vmem:[#allocation89_spill] sm:$0xff] %v6052_v13  ;;  %v2279_v0 = vrot.slane %v6056_v32, 4  ;;  %v2282_v60 = vrot.slane %v6060_v17, 4  ;;  %v2351_v3 = vrot.slane %v6050_v25, %v6042_v10 }
 0x40b   :  { %7441 = vst [vmem:[#allocation90_spill] sm:$0xff] %v6054_v22  ;;  %7442 = vst [vmem:[#allocation91_spill] sm:$0xff] %v6056_v32  ;;  %v2284_v20 = vsel %vm107_vm0, %v6046_v54, %v2273_v18  ;;  %v2285_v4 = vsel %vm107_vm0, %v6050_v25, %v2276_v19  ;;  %v2304_v41 = vmul.f32 %v2303_v6, %v5414_v39 }
 0x40c   :  { %7443 = vst [vmem:[#allocation92_spill] sm:$0xff] %v6058_v31  ;;  %7444 = vst [vmem:[#allocation93_spill] sm:$0xff] %v6060_v17  ;;  %v2305_v59 = vmul.f32 %v2303_v6, %v5410_v35  ;;  %v2286_v26 = vsel %vm107_vm0, %v6054_v22, %v2279_v0  ;;  %v2287_v46 = vsel %vm107_vm0, %v6058_v31, %v2282_v60 }
 0x40d   :  { %2288 = vst [vmem:[%s7165_s7] sm:$0xff] %v2284_v20  ;;  %2289 = vst [vmem:[%s7165_s7 + $0x8] sm:$0xff] %v2285_v4  ;;  %v2306_v18 = vmul.f32 %v2303_v6, %v5426_v51  ;;  %v2307_v19 = vmul.f32 %v2303_v6, %v5422_v47  ;;  %v2308_v0 = vmul.f32 %v2303_v6, %v5440_v61 }
 0x40e   :  { %2290 = vst [vmem:[%s7165_s7 + $0x10] sm:$0xff] %v2286_v26  ;;  %2291 = vst [vmem:[%s7165_s7 + $0x18] sm:$0xff] %v2287_v46  ;;  %v2309_v60 = vmul.f32 %v2303_v6, %v5436_v57  ;;  %v2310_v20 = vmul.f32 %v2303_v6, %v5454_v16  ;;  %v2311_v4 = vmul.f32 %v2303_v6, %v5450_v8  ;;  %v6111_v16 = vsub.s32 1, %v6037_v12 }
 0x40f   :  { %v2324_v25 = vmul.f32 %v2323_v33, %v5416_v40  ;;  %v2325_v49 = vmul.f32 %v2323_v33, %v5412_v36  ;;  %v2326_v47 = vmul.f32 %v2323_v33, %v5428_v52  ;;  %v2327_v26 = vmul.f32 %v2323_v33, %v5424_v48  ;;  %v6115_v52 = vpop.permute.xlu0 %2518 }
 0x410   :  { %v2328_v51 = vmul.f32 %v2323_v33, %v5442_v62  ;;  %v2329_v46 = vmul.f32 %v2323_v33, %v5438_v58  ;;  %v2330_v61 = vmul.f32 %v2323_v33, %v5456_v21  ;;  %v2331_v57 = vmul.f32 %v2323_v33, %v5452_v11  ;;  %v6117_v58 = vpop.permute.xlu1 %3127 }
 0x411   :  { %v2332_v6 = vadd.f32 %v2324_v25, %v2304_v41  ;;  %v2333_v8 = vadd.f32 %v2325_v49, %v2305_v59  ;;  %v2334_v40 = vadd.f32 %v2326_v47, %v2306_v18  ;;  %v2379_v36 = vrot.slane %v6052_v13, %v6042_v10  ;;  %7446 = vst [vmem:[#allocation95_spill] sm:$0xff] %v6117_v58 }
 0x412   :  { %v2335_v48 = vadd.f32 %v2327_v26, %v2307_v19  ;;  %v2336_v35 = vadd.f32 %v2328_v51, %v2308_v0  ;;  %v2337_v62 = vadd.f32 %v2329_v46, %v2309_v60  ;;  %v2338_v39 = vadd.f32 %v2330_v61, %v2310_v20 }
 0x413   :  { %v2339_v21 = vadd.f32 %v2331_v57, %v2311_v4  ;;  %v2352_v33 = vmul.f32 %v2351_v3, %v5507_v45  ;;  %v2353_v11 = vmul.f32 %v2351_v3, %v5505_v43  ;;  %v2354_v25 = vmul.f32 %v2351_v3, %v5513_v55 }
 0x414   :  { %v2355_v47 = vmul.f32 %v2351_v3, %v5511_v50  ;;  %v2356_v49 = vmul.f32 %v2351_v3, %v5520_v2  ;;  %v2357_v41 = vmul.f32 %v2351_v3, %v5518_v63  ;;  %v2358_v59 = vmul.f32 %v2351_v3, %v5527_v23  ;;  %v6130_v2 = vpop.permute.xlu0 %2533  ;;  %v7447_v63 = vld [vmem:[#allocation32_spill] sm:$0xff] }
 0x415   :  { %v2359_v51 = vmul.f32 %v2351_v3, %v5525_v15  ;;  %v2360_v61 = vadd.f32 %v2352_v33, %v2332_v6  ;;  %v2361_v18 = vadd.f32 %v2353_v11, %v2333_v8  ;;  %v2362_v19 = vadd.f32 %v2354_v25, %v2334_v40  ;;  %v7448_v6 = vld [vmem:[#allocation31_spill] sm:$0xff] }
 0x416   :  { %v2363_v57 = vadd.f32 %v2355_v47, %v2335_v48  ;;  %v2364_v0 = vadd.f32 %v2356_v49, %v2336_v35  ;;  %v2365_v60 = vadd.f32 %v2357_v41, %v2337_v62  ;;  %v2366_v20 = vadd.f32 %v2358_v59, %v2338_v39  ;;  %v6136_v35 = vpop.permute.xlu1 %2664 }
 0x417   :  { %v2367_v4 = vadd.f32 %v2359_v51, %v2339_v21  ;;  %v2380_v26 = vmul.f32 %v2379_v36, %v5730_v30  ;;  %v2381_v46 = vmul.f32 %v2379_v36, %v5727_v28  ;;  %v2382_v58 = vmul.f32 %v2379_v36, %v5742_v34  ;;  %7449 = vst [vmem:[#allocation96_spill] sm:$0xff] %v6136_v35  ;;  %v7450_v35 = vld [vmem:[#allocation36_spill] sm:$0xff] }
 0x418   :  { %v2383_v23 = vmul.f32 %v2379_v36, %v5739_v56  ;;  %v2384_v3 = vmul.f32 %v2379_v36, %v7447_v63  ;;  %v2385_v8 = vmul.f32 %v2379_v36, %v7448_v6  ;;  %v2386_v40 = vmul.f32 %v2379_v36, %v5765_v53 }
 0x419   :  { %v2387_v39 = vmul.f32 %v2379_v36, %v5762_v7  ;;  %v2388_v48 = vadd.f32 %v2380_v26, %v2360_v61  ;;  %v2389_v62 = vadd.f32 %v2381_v46, %v2361_v18  ;;  %v2390_v11 = vadd.f32 %v2382_v58, %v2362_v19  ;;  %v7451_v36 = vld [vmem:[#allocation35_spill] sm:$0xff]  ;;  %v7453_v19 = vld [vmem:[#allocation40_spill] sm:$0xff]  ;;  %v6157_v26 = vpop.permute.xlu0 %2543  ;;  %v7461_v7 = vld [vmem:[#allocation45_spill] sm:$0xff] }
 0x41a   :  { %v2391_v21 = vadd.f32 %v2383_v23, %v2363_v57  ;;  %v2392_v33 = vadd.f32 %v2384_v3, %v2364_v0  ;;  %v2393_v25 = vadd.f32 %v2385_v8, %v2365_v60  ;;  %v2407_v47 = vrot.slane %v6054_v22, %v6042_v10  ;;  %v7452_v23 = vld [vmem:[#allocation37_spill] sm:$0xff]  ;;  %v7454_v0 = vld [vmem:[#allocation39_spill] sm:$0xff] }
 0x41b   :  { %v2394_v49 = vadd.f32 %v2386_v40, %v2366_v20  ;;  %v2395_v41 = vadd.f32 %v2387_v39, %v2367_v4  ;;  %v2435_v59 = vrot.slane %v6056_v32, %v6042_v10  ;;  %v2463_v51 = vrot.slane %v6058_v31, %v6042_v10  ;;  %v7455_v39 = vld [vmem:[#allocation42_spill] sm:$0xff]  ;;  %v7458_v31 = vld [vmem:[#allocation44_spill] sm:$0xff] }
 0x41c   :  { %v2408_v53 = vmul.f32 %v2407_v47, %v7450_v35  ;;  %v2409_v61 = vmul.f32 %v2407_v47, %v7451_v36  ;;  %v2410_v58 = vmul.f32 %v2407_v47, %v5790_v29  ;;  %v2411_v18 = vmul.f32 %v2407_v47, %v7452_v23  ;;  %v7456_v23 = vld [vmem:[#allocation41_spill] sm:$0xff] }
 0x41d   :  { %v2412_v57 = vmul.f32 %v2407_v47, %v7453_v19  ;;  %v2413_v60 = vmul.f32 %v2407_v47, %v7454_v0  ;;  %v2491_v20 = vrot.slane %v6060_v17, %v6042_v10  ;;  %v6155_v4 = vrot.slane %v6046_v54, %v6111_v16  ;;  %v6161_v0 = vpop.permute.xlu1 %3163  ;;  %v7459_v17 = vld [vmem:[#allocation43_spill] sm:$0xff]  ;;  %v7460_v54 = vld [vmem:[#allocation46_spill] sm:$0xff] }
 0x41e   :  { %v2416_v46 = vadd.f32 %v2408_v53, %v2388_v48  ;;  %v2417_v3 = vadd.f32 %v2409_v61, %v2389_v62  ;;  %v2418_v8 = vadd.f32 %v2410_v58, %v2390_v11  ;;  %v2419_v40 = vadd.f32 %v2411_v18, %v2391_v21  ;;  %7457 = vst [vmem:[#allocation97_spill] sm:$0xff] %v6161_v0  ;;  %v7462_v11 = vld [vmem:[#allocation47_spill] sm:$0xff]  ;;  %v7463_v58 = vld [vmem:[#allocation50_spill] sm:$0xff] }
 0x41f   :  { %v2414_v29 = vmul.f32 %v2407_v47, %v7455_v39  ;;  %v2415_v36 = vmul.f32 %v2407_v47, %v7456_v23  ;;  %v2420_v19 = vadd.f32 %v2412_v57, %v2392_v33  ;;  %v2421_v35 = vadd.f32 %v2413_v60, %v2393_v25  ;;  %v7464_v57 = vld [vmem:[#allocation49_spill] sm:$0xff] }
 0x420   :  { %v2436_v10 = vmul.f32 %v2435_v59, %v7458_v31  ;;  %v2437_v32 = vmul.f32 %v2435_v59, %v7459_v17  ;;  %v2438_v22 = vmul.f32 %v2435_v59, %v7460_v54  ;;  %v2439_v6 = vmul.f32 %v2435_v59, %v7461_v7  ;;  %v6171_v31 = vpop.permute.xlu0 %2548  ;;  %v7465_v54 = vld [vmem:[#allocation52_spill] sm:$0xff] }
 0x421   :  { %v2422_v53 = vadd.f32 %v2414_v29, %v2394_v49  ;;  %v2423_v48 = vadd.f32 %v2415_v36, %v2395_v41  ;;  %v2440_v62 = vmul.f32 %v2435_v59, %v5850_v37  ;;  %v2441_v21 = vmul.f32 %v2435_v59, %v7462_v11  ;;  %v7466_v29 = vld [vmem:[#allocation51_spill] sm:$0xff]  ;;  %v7467_v41 = vld [vmem:[#allocation54_spill] sm:$0xff]  ;;  %v7468_v37 = vld [vmem:[#allocation53_spill] sm:$0xff] }
 0x422   :  { %v2444_v61 = vadd.f32 %v2436_v10, %v2416_v46  ;;  %v2445_v47 = vadd.f32 %v2437_v32, %v2417_v3  ;;  %v2446_v33 = vadd.f32 %v2438_v22, %v2418_v8  ;;  %v2447_v25 = vadd.f32 %v2439_v6, %v2419_v40  ;;  %v6179_v3 = vpop.permute.xlu1 %2628 }
 0x423   :  { %v2442_v18 = vmul.f32 %v2435_v59, %v7463_v58  ;;  %v2443_v60 = vmul.f32 %v2435_v59, %v7464_v57  ;;  %v2448_v0 = vadd.f32 %v2440_v62, %v2420_v19  ;;  %v2449_v17 = vadd.f32 %v2441_v21, %v2421_v35  ;;  %7469 = vst [vmem:[#allocation52_spill] sm:$0xff] %v6179_v3 }
 0x424   :  { %v2464_v7 = vmul.f32 %v2463_v51, %v7465_v54  ;;  %v2465_v49 = vmul.f32 %v2463_v51, %v7466_v29  ;;  %v2466_v36 = vmul.f32 %v2463_v51, %v7467_v41  ;;  %v2467_v11 = vmul.f32 %v2463_v51, %v7468_v37 }
 0x425   :  { %v2450_v46 = vadd.f32 %v2442_v18, %v2422_v53  ;;  %v2451_v32 = vadd.f32 %v2443_v60, %v2423_v48  ;;  %v2468_v22 = vmul.f32 %v2463_v51, %v5895_v44  ;;  %v2469_v6 = vmul.f32 %v2463_v51, %v5891_v5  ;;  %v7470_v53 = vld [vmem:[#allocation59_spill] sm:$0xff]  ;;  %v7471_v18 = vld [vmem:[#allocation62_spill] sm:$0xff]  ;;  %v7472_v44 = vld [vmem:[#allocation61_spill] sm:$0xff] }
 0x426   :  { %v2472_v59 = vadd.f32 %v2464_v7, %v2444_v61  ;;  %v2473_v35 = vadd.f32 %v2465_v49, %v2445_v47  ;;  %v2474_v19 = vadd.f32 %v2466_v36, %v2446_v33  ;;  %v2475_v8 = vadd.f32 %v2467_v11, %v2447_v25  ;;  %v6189_v61 = vpop.permute.xlu0 %3027  ;;  %v7474_v25 = vld [vmem:[#allocation65_spill] sm:$0xff] }
 0x427   :  { %v2470_v40 = vmul.f32 %v2463_v51, %v5904_v42  ;;  %v2471_v10 = vmul.f32 %v2463_v51, %v5900_v27  ;;  %v2476_v62 = vadd.f32 %v2468_v22, %v2448_v0  ;;  %v2477_v21 = vadd.f32 %v2469_v6, %v2449_v17  ;;  %7473 = vst [vmem:[#allocation51_spill] sm:$0xff] %v6189_v61  ;;  %v7497_v61 = vld [vmem:[#allocation14_spill] sm:$0xff] }
 0x428   :  { %v2492_v37 = vmul.f32 %v2491_v20, %v5913_v24  ;;  %v2493_v48 = vmul.f32 %v2491_v20, %v7470_v53  ;;  %v2494_v60 = vmul.f32 %v2491_v20, %v7471_v18  ;;  %v2495_v5 = vmul.f32 %v2491_v20, %v7472_v44 }
 0x429   :  { %v2478_v41 = vadd.f32 %v2470_v40, %v2450_v46  ;;  %v2479_v3 = vadd.f32 %v2471_v10, %v2451_v32  ;;  %v2496_v7 = vmul.f32 %v2491_v20, %v5936_v38  ;;  %v2497_v11 = vmul.f32 %v2491_v20, %v5934_v1  ;;  %v6196_v46 = vpop.permute.xlu1 %3131  ;;  %v7477_v40 = vld [vmem:[#allocation67_spill] sm:$0xff]  ;;  %v7501_v1 = vld [vmem:[#allocation16_spill] sm:$0xff] }
 0x42a   :  { %v2500_v47 = vadd.f32 %v2492_v37, %v2472_v59  ;;  %v2501_v51 = vadd.f32 %v2493_v48, %v2473_v35  ;;  %v2502_v0 = vadd.f32 %v2494_v60, %v2474_v19  ;;  %v2503_v17 = vadd.f32 %v2495_v5, %v2475_v8  ;;  %7475 = vst [vmem:[#allocation98_spill] sm:$0xff] %v6196_v46  ;;  %v7479_v35 = vld [vmem:[#allocation68_spill] sm:$0xff]  ;;  %v7482_v8 = vld [vmem:[#allocation69_spill] sm:$0xff]  ;;  %v7485_v60 = vld [vmem:[#allocation3_spill] sm:$0xff] }
 0x42b   :  { %v2498_v33 = vmul.f32 %v2491_v20, %v5945_v14  ;;  %v2499_v49 = vmul.f32 %v2491_v20, %v7474_v25  ;;  %v2504_v36 = vadd.f32 %v2496_v7, %v2476_v62  ;;  %v6194_v22 = vsub.s32 2, %v6037_v12  ;;  %v7493_v46 = vld [vmem:[#allocation6_spill] sm:$0xff] }
 0x42c   :  { %v2505_v32 = vadd.f32 %v2497_v11, %v2477_v21  ;;  %v6199_v6 = vadd.f32 %v6115_v52, %v2500_v47  ;;  %v6202_v10 = vadd.f32 %v7477_v40, %v2501_v51  ;;  %v2827_v37 = vrot.slane %v6048_v9, %v6111_v16  ;;  %v7484_v21 = vld [vmem:[#allocation5_spill] sm:$0xff]  ;;  %v7487_v11 = vld [vmem:[#allocation7_spill] sm:$0xff] }
 0x42d   :  { %v2506_v5 = vadd.f32 %v2498_v33, %v2478_v41  ;;  %v2507_v59 = vadd.f32 %v2499_v49, %v2479_v3  ;;  %v6207_v20 = vadd.f32 %v7479_v35, %v2502_v0  ;;  %v6210_v19 = vadd.f32 %v6130_v2, %v2503_v17  ;;  %v7486_v41 = vld [vmem:[#allocation9_spill] sm:$0xff]  ;;  %v7489_v0 = vld [vmem:[#allocation11_spill] sm:$0xff]  ;;  %v6229_v33 = vpop.permute.xlu0 %3042  ;;  %v6241_v25 = vpop.permute.xlu1 %3135 }
 0x42e   :  { %7476 = vst [vmem:[#allocation99_spill] sm:$0xff] %v6199_v6  ;;  %7478 = vst [vmem:[#allocation67_spill] sm:$0xff] %v6202_v10  ;;  %v6213_v62 = vadd.f32 %v7482_v8, %v2504_v36  ;;  %v2564_v52 = vadd.f32 %v6202_v10, %v6199_v6  ;;  %v2808_v48 = vmul.f32 %v6155_v4, %v7484_v21  ;;  %v7488_v2 = vld [vmem:[#allocation13_spill] sm:$0xff]  ;;  %v7492_v35 = vld [vmem:[#allocation15_spill] sm:$0xff] }
 0x42f   :  { %7480 = vst [vmem:[#allocation68_spill] sm:$0xff] %v6207_v20  ;;  %7481 = vst [vmem:[#allocation100_spill] sm:$0xff] %v6210_v19  ;;  %v2809_v7 = vmul.f32 %v6155_v4, %v7485_v60  ;;  %v2810_v3 = vmul.f32 %v6155_v4, %v7486_v41  ;;  %v2811_v47 = vmul.f32 %v6155_v4, %v7487_v11  ;;  %v7491_v36 = vld [vmem:[#allocation17_spill] sm:$0xff]  ;;  %v7494_v6 = vld [vmem:[#allocation4_spill] sm:$0xff] }
 0x430   :  { %7483 = vst [vmem:[#allocation69_spill] sm:$0xff] %v6213_v62  ;;  %v2812_v51 = vmul.f32 %v6155_v4, %v7488_v2  ;;  %v2813_v17 = vmul.f32 %v6155_v4, %v7489_v0  ;;  %7490 = vst [vmem:[#allocation101_spill] sm:$0xff] %v6229_v33  ;;  %v2565_v49 = vadd.f32 %v2564_v52, %v6207_v20  ;;  %v7495_v41 = vld [vmem:[#allocation10_spill] sm:$0xff]  ;;  %v7496_v2 = vld [vmem:[#allocation8_spill] sm:$0xff] }
 0x431   :  { %v2814_v40 = vmul.f32 %v6155_v4, %v7491_v36  ;;  %v2815_v8 = vmul.f32 %v6155_v4, %v7492_v35  ;;  %v2828_v10 = vmul.f32 %v2827_v37, %v7493_v46  ;;  %v2829_v11 = vmul.f32 %v2827_v37, %v7494_v6  ;;  %7498 = vst [vmem:[#allocation102_spill] sm:$0xff] %v6241_v25  ;;  %v7499_v20 = vld [vmem:[#allocation12_spill] sm:$0xff]  ;;  %v7500_v36 = vld [vmem:[#allocation18_spill] sm:$0xff]  ;;  %v7506_v25 = vld [vmem:[#allocation75_spill] sm:$0xff]  ;;  %v6264_v35 = vpop.permute.xlu0 %3057 }
 0x432   :  { %v2830_v60 = vmul.f32 %v2827_v37, %v7495_v41  ;;  %v2831_v21 = vmul.f32 %v2827_v37, %v7496_v2  ;;  %v2832_v0 = vmul.f32 %v2827_v37, %v7497_v61  ;;  %v2566_v52 = vadd.f32 %v2565_v49, %v6210_v19  ;;  %v7503_v6 = vld [vmem:[#allocation88_spill] sm:$0xff] }
 0x433   :  { %v2833_v33 = vmul.f32 %v2827_v37, %v7499_v20  ;;  %v2834_v14 = vmul.f32 %v2827_v37, %v7500_v36  ;;  %v2835_v4 = vmul.f32 %v2827_v37, %v7501_v1  ;;  %v6248_v46 = vadd.f32 %v6157_v26, %v2505_v32 }
 0x434   :  { %v2855_v41 = vrot.slane %v7503_v6, %v6111_v16  ;;  %v2883_v2 = vrot.slane %v6052_v13, %v6111_v16  ;;  %v6255_v61 = vsub.s32 3, %v6037_v12  ;;  %v6258_v49 = vadd.f32 %v6171_v31, %v2506_v5 }
 0x435   :  { %7502 = vst [vmem:[#allocation103_spill] sm:$0xff] %v6248_v46  ;;  %v6261_v19 = vadd.f32 %v7506_v25, %v2507_v59  ;;  %v2567_v37 = vadd.f32 %v2566_v52, %v6213_v62  ;;  %v2836_v1 = vadd.f32 %v2828_v10, %v2808_v48  ;;  %v2837_v26 = vadd.f32 %v2829_v11, %v2809_v7  ;;  %v6271_v10 = vpop.permute.xlu1 %2672  ;;  %v7509_v48 = vld [vmem:[#allocation24_spill] sm:$0xff]  ;;  %v7510_v7 = vld [vmem:[#allocation23_spill] sm:$0xff]  ;;  %v7511_v11 = vld [vmem:[#allocation26_spill] sm:$0xff] }
 0x436   :  { %7504 = vst [vmem:[#allocation104_spill] sm:$0xff] %v6255_v61  ;;  %7505 = vst [vmem:[#allocation105_spill] sm:$0xff] %v6258_v49  ;;  %v2838_v32 = vadd.f32 %v2830_v60, %v2810_v3  ;;  %v2839_v36 = vadd.f32 %v2831_v21, %v2811_v47  ;;  %v2840_v20 = vadd.f32 %v2832_v0, %v2812_v51 }
 0x437   :  { %7507 = vst [vmem:[#allocation75_spill] sm:$0xff] %v6261_v19  ;;  %v2568_v13 = vadd.f32 %v2567_v37, %v6248_v46  ;;  %v2841_v38 = vadd.f32 %v2833_v33, %v2813_v17  ;;  %v2842_v12 = vadd.f32 %v2834_v14, %v2814_v40  ;;  %v2843_v61 = vadd.f32 %v2835_v4, %v2815_v8 }
 0x438   :  { %v2856_v31 = vmul.f32 %v2855_v41, %v5507_v45  ;;  %v2857_v5 = vmul.f32 %v2855_v41, %v5505_v43  ;;  %v2858_v25 = vmul.f32 %v2855_v41, %v5513_v55  ;;  %v2859_v59 = vmul.f32 %v2855_v41, %v5511_v50  ;;  %7508 = vst [vmem:[#allocation106_spill] sm:$0xff] %v6271_v10 }
 0x439   :  { %v2569_v21 = vadd.f32 %v2568_v13, %v6258_v49  ;;  %v2860_v60 = vmul.f32 %v2855_v41, %v7509_v48  ;;  %v2861_v3 = vmul.f32 %v2855_v41, %v7510_v7  ;;  %v2862_v47 = vmul.f32 %v2855_v41, %v7511_v11  ;;  %v6281_v49 = vpop.permute.xlu0 %4028 }
 0x43a   :  { %v2863_v14 = vmul.f32 %v2855_v41, %v5525_v15  ;;  %v2864_v51 = vadd.f32 %v2856_v31, %v2836_v1  ;;  %v2865_v0 = vadd.f32 %v2857_v5, %v2837_v26  ;;  %v2866_v17 = vadd.f32 %v2858_v25, %v2838_v32  ;;  %7512 = vst [vmem:[#allocation107_spill] sm:$0xff] %v6281_v49  ;;  %v7513_v26 = vld [vmem:[#allocation31_spill] sm:$0xff]  ;;  %v6289_v31 = vpop.permute.xlu1 %3171 }
 0x43b   :  { %v2570_v33 = vadd.f32 %v2569_v21, %v6261_v19  ;;  %v2867_v40 = vadd.f32 %v2859_v59, %v2839_v36  ;;  %v2868_v8 = vadd.f32 %v2860_v60, %v2840_v20  ;;  %v2869_v52 = vadd.f32 %v2861_v3, %v2841_v38  ;;  %v7514_v36 = vld [vmem:[#allocation34_spill] sm:$0xff]  ;;  %v7515_v38 = vld [vmem:[#allocation33_spill] sm:$0xff]  ;;  %7516 = vst [vmem:[#allocation108_spill] sm:$0xff] %v6289_v31  ;;  %v7529_v31 = vld [vmem:[#allocation39_spill] sm:$0xff] }
 0x43c   :  { %v2870_v4 = vadd.f32 %v2862_v47, %v2842_v12  ;;  %v2871_v37 = vadd.f32 %v2863_v14, %v2843_v61  ;;  %v2884_v13 = vmul.f32 %v2883_v2, %v5730_v30  ;;  %v2885_v10 = vmul.f32 %v2883_v2, %v5727_v28  ;;  %v7517_v21 = vld [vmem:[#allocation90_spill] sm:$0xff]  ;;  %v7534_v30 = vld [vmem:[#allocation45_spill] sm:$0xff] }
 0x43d   :  { %v2571_v46 = vrot.slane %v2570_v33, 4  ;;  %v2886_v62 = vmul.f32 %v2883_v2, %v5742_v34  ;;  %v2887_v1 = vmul.f32 %v2883_v2, %v5739_v56  ;;  %v2888_v41 = vmul.f32 %v2883_v2, %v7447_v63  ;;  %v7532_v34 = vld [vmem:[#allocation43_spill] sm:$0xff]  ;;  %v7533_v28 = vld [vmem:[#allocation46_spill] sm:$0xff] }
 0x43e   :  { %v2889_v32 = vmul.f32 %v2883_v2, %v7513_v26  ;;  %v2890_v20 = vmul.f32 %v2883_v2, %v7514_v36  ;;  %v2891_v12 = vmul.f32 %v2883_v2, %v7515_v38  ;;  %v2892_v61 = vadd.f32 %v2884_v13, %v2864_v51  ;;  %v7518_v26 = vld [vmem:[#allocation91_spill] sm:$0xff]  ;;  %v7519_v2 = vld [vmem:[#allocation92_spill] sm:$0xff]  ;;  %v7520_v13 = vld [vmem:[#allocation93_spill] sm:$0xff] }
 0x43f   :  { %v2572_v5 = vadd.f32 %v2571_v46, %v2570_v33  ;;  %v2893_v25 = vadd.f32 %v2885_v10, %v2865_v0  ;;  %v2894_v59 = vadd.f32 %v2886_v62, %v2866_v17  ;;  %v2911_v60 = vrot.slane %v7517_v21, %v6111_v16  ;;  %v7521_v62 = vld [vmem:[#allocation86_spill] sm:$0xff]  ;;  %v6313_v33 = vpop.permute.xlu0 %4038  ;;  %v7536_v21 = vld [vmem:[#allocation47_spill] sm:$0xff] }
 0x440   :  { %v2895_v3 = vadd.f32 %v2887_v1, %v2867_v40  ;;  %v2896_v47 = vadd.f32 %v2888_v41, %v2868_v8  ;;  %v2897_v14 = vadd.f32 %v2889_v32, %v2869_v52  ;;  %v2898_v19 = vadd.f32 %v2890_v20, %v2870_v4  ;;  %7522 = vst [vmem:[#allocation109_spill] sm:$0xff] %v6313_v33  ;;  %v7523_v40 = vld [vmem:[#allocation36_spill] sm:$0xff]  ;;  %v7524_v52 = vld [vmem:[#allocation35_spill] sm:$0xff]  ;;  %v7526_v1 = vld [vmem:[#allocation37_spill] sm:$0xff] }
 0x441   :  { %v2573_v49 = vrot.slane %v2572_v5, 2  ;;  %v2899_v63 = vadd.f32 %v2891_v12, %v2871_v37  ;;  %v2939_v36 = vrot.slane %v7518_v26, %v6111_v16  ;;  %v2967_v51 = vrot.slane %v7519_v2, %v6111_v16  ;;  %v7528_v20 = vld [vmem:[#allocation40_spill] sm:$0xff] }
 0x442   :  { %v6299_v46 = vrot.slane %v7520_v13, %v6111_v16  ;;  %v6303_v10 = vrot.slane %v7521_v62, %v6194_v22  ;;  %v6307_v0 = vrot.slane %v6048_v9, %v6194_v22  ;;  %v6311_v17 = vrot.slane %v7503_v6, %v6194_v22  ;;  %v7525_v16 = vld [vmem:[#allocation38_spill] sm:$0xff]  ;;  %v6324_v6 = vpop.permute.xlu1 %2636  ;;  %v7535_v26 = vld [vmem:[#allocation48_spill] sm:$0xff] }
 0x443   :  { %v2912_v8 = vmul.f32 %v2911_v60, %v7523_v40  ;;  %v2913_v4 = vmul.f32 %v2911_v60, %v7524_v52  ;;  %v2914_v37 = vmul.f32 %v2911_v60, %v7525_v16  ;;  %v2915_v41 = vmul.f32 %v2911_v60, %v7526_v1  ;;  %7530 = vst [vmem:[#allocation111_spill] sm:$0xff] %v6324_v6 }
 0x444   :  { %v6319_v32 = vadd.f32 %v2573_v49, %v2572_v5  ;;  %v2916_v12 = vmul.f32 %v2911_v60, %v7528_v20  ;;  %v2917_v9 = vmul.f32 %v2911_v60, %v7529_v31  ;;  %v2918_v62 = vmul.f32 %v2911_v60, %v7455_v39  ;;  %v7531_v49 = vld [vmem:[#allocation44_spill] sm:$0xff] }
 0x445   :  { %v2919_v33 = vmul.f32 %v2911_v60, %v7456_v23  ;;  %v2920_v13 = vadd.f32 %v2912_v8, %v2892_v61  ;;  %v2921_v40 = vadd.f32 %v2913_v4, %v2893_v25  ;;  %v2922_v38 = vadd.f32 %v2914_v37, %v2894_v59  ;;  %v6334_v25 = vpop.permute.xlu0 %4043 }
 0x446   :  { %7527 = vst [vmem:[#allocation110_spill] sm:$0xff] %v6319_v32  ;;  %v2923_v52 = vadd.f32 %v2915_v41, %v2895_v3  ;;  %v2924_v56 = vadd.f32 %v2916_v12, %v2896_v47  ;;  %v2925_v16 = vadd.f32 %v2917_v9, %v2897_v14  ;;  %v2926_v2 = vadd.f32 %v2918_v62, %v2898_v19  ;;  %v7539_v41 = vld [vmem:[#allocation54_spill] sm:$0xff] }
 0x447   :  { %v2927_v1 = vadd.f32 %v2919_v33, %v2899_v63  ;;  %v2940_v5 = vmul.f32 %v2939_v36, %v7531_v49  ;;  %v2941_v20 = vmul.f32 %v2939_v36, %v7532_v34  ;;  %v2942_v31 = vmul.f32 %v2939_v36, %v7533_v28  ;;  %7537 = vst [vmem:[#allocation44_spill] sm:$0xff] %v6334_v25  ;;  %v6337_v33 = vpop.permute.xlu1 %3139 }
 0x448   :  { %v2943_v39 = vmul.f32 %v2939_v36, %v7534_v30  ;;  %v2944_v6 = vmul.f32 %v2939_v36, %v7535_v26  ;;  %v2945_v60 = vmul.f32 %v2939_v36, %v7536_v21  ;;  %v2946_v61 = vmul.f32 %v2939_v36, %v7463_v58  ;;  %7538 = vst [vmem:[#allocation43_spill] sm:$0xff] %v6337_v33  ;;  %v7540_v58 = vld [vmem:[#allocation53_spill] sm:$0xff]  ;;  %v7541_v21 = vld [vmem:[#allocation56_spill] sm:$0xff] }
 0x449   :  { %v2947_v9 = vmul.f32 %v2939_v36, %v7464_v57  ;;  %v2948_v19 = vadd.f32 %v2940_v5, %v2920_v13  ;;  %v2949_v63 = vadd.f32 %v2941_v20, %v2921_v40  ;;  %v2950_v59 = vadd.f32 %v2942_v31, %v2922_v38  ;;  %v7542_v13 = vld [vmem:[#allocation55_spill] sm:$0xff] }
 0x44a   :  { %v2951_v3 = vadd.f32 %v2943_v39, %v2923_v52  ;;  %v2952_v47 = vadd.f32 %v2944_v6, %v2924_v56  ;;  %v2953_v14 = vadd.f32 %v2945_v60, %v2925_v16  ;;  %v2954_v62 = vadd.f32 %v2946_v61, %v2926_v2 }
 0x44b   :  { %v2955_v8 = vadd.f32 %v2947_v9, %v2927_v1  ;;  %v2968_v4 = vmul.f32 %v2967_v51, %v7465_v54  ;;  %v2969_v37 = vmul.f32 %v2967_v51, %v7466_v29  ;;  %v2970_v12 = vmul.f32 %v2967_v51, %v7539_v41  ;;  %v6353_v9 = vpop.permute.xlu0 %4048 }
 0x44c   :  { %v2971_v25 = vmul.f32 %v2967_v51, %v7540_v58  ;;  %v2972_v36 = vmul.f32 %v2967_v51, %v7541_v21  ;;  %v2973_v40 = vmul.f32 %v2967_v51, %v7542_v13  ;;  %v2974_v39 = vmul.f32 %v2967_v51, %v5904_v42  ;;  %7543 = vst [vmem:[#allocation46_spill] sm:$0xff] %v6353_v9 }
 0x44d   :  { %v2975_v56 = vmul.f32 %v2967_v51, %v5900_v27  ;;  %v2976_v6 = vadd.f32 %v2968_v4, %v2948_v19  ;;  %v2977_v38 = vadd.f32 %v2969_v37, %v2949_v63  ;;  %v2978_v31 = vadd.f32 %v2970_v12, %v2950_v59  ;;  %v7544_v19 = vld [vmem:[#allocation64_spill] sm:$0xff]  ;;  %v7545_v63 = vld [vmem:[#allocation63_spill] sm:$0xff] }
 0x44e   :  { %v2979_v2 = vadd.f32 %v2971_v25, %v2951_v3  ;;  %v2980_v52 = vadd.f32 %v2972_v36, %v2952_v47  ;;  %v2981_v16 = vadd.f32 %v2973_v40, %v2953_v14  ;;  %v2982_v1 = vadd.f32 %v2974_v39, %v2954_v62  ;;  %v7546_v3 = vld [vmem:[#allocation66_spill] sm:$0xff]  ;;  %v6363_v14 = vpop.permute.xlu1 %3143  ;;  %v7548_v62 = vld [vmem:[#allocation65_spill] sm:$0xff] }
 0x44f   :  { %v2983_v20 = vadd.f32 %v2975_v56, %v2955_v8  ;;  %v2996_v5 = vmul.f32 %v6299_v46, %v5913_v24  ;;  %v2997_v60 = vmul.f32 %v6299_v46, %v7470_v53  ;;  %v2998_v61 = vmul.f32 %v6299_v46, %v7471_v18  ;;  %7547 = vst [vmem:[#allocation45_spill] sm:$0xff] %v6363_v14  ;;  %v7551_v14 = vld [vmem:[#allocation71_spill] sm:$0xff] }
 0x450   :  { %v2999_v51 = vmul.f32 %v6299_v46, %v7472_v44  ;;  %v3000_v25 = vmul.f32 %v6299_v46, %v7544_v19  ;;  %v3001_v59 = vmul.f32 %v6299_v46, %v7545_v63  ;;  %v3002_v47 = vmul.f32 %v6299_v46, %v7546_v3  ;;  %v7549_v19 = vld [vmem:[#allocation70_spill] sm:$0xff]  ;;  %v7550_v44 = vld [vmem:[#allocation51_spill] sm:$0xff] }
 0x451   :  { %v3003_v8 = vmul.f32 %v6299_v46, %v7548_v62  ;;  %v3004_v4 = vadd.f32 %v2996_v5, %v2976_v6  ;;  %v3005_v37 = vadd.f32 %v2997_v60, %v2977_v38  ;;  %v3006_v12 = vadd.f32 %v2998_v61, %v2978_v31  ;;  %v7552_v46 = vld [vmem:[#allocation72_spill] sm:$0xff]  ;;  %v7554_v38 = vld [vmem:[#allocation101_spill] sm:$0xff]  ;;  %v7559_v60 = vld [vmem:[#allocation3_spill] sm:$0xff] }
 0x452   :  { %v3007_v36 = vadd.f32 %v2999_v51, %v2979_v2  ;;  %v3008_v40 = vadd.f32 %v3000_v25, %v2980_v52  ;;  %v3009_v39 = vadd.f32 %v3001_v59, %v2981_v16  ;;  %v3010_v56 = vadd.f32 %v3002_v47, %v2982_v1  ;;  %v7555_v2 = vld [vmem:[#allocation73_spill] sm:$0xff]  ;;  %v7557_v16 = vld [vmem:[#allocation74_spill] sm:$0xff]  ;;  %v6395_v51 = vpop.permute.xlu0 %4053  ;;  %v7562_v59 = vld [vmem:[#allocation7_spill] sm:$0xff] }
 0x453   :  { %v3011_v9 = vadd.f32 %v3003_v8, %v2983_v20  ;;  %v6369_v63 = vadd.f32 %v7549_v19, %v3004_v4  ;;  %v6372_v3 = vadd.f32 %v7550_v44, %v3005_v37  ;;  %v6375_v18 = vadd.f32 %v7551_v14, %v3006_v12  ;;  %v7558_v44 = vld [vmem:[#allocation5_spill] sm:$0xff]  ;;  %7560 = vst [vmem:[#allocation53_spill] sm:$0xff] %v6395_v51  ;;  %v7564_v4 = vld [vmem:[#allocation11_spill] sm:$0xff]  ;;  %v6405_v12 = vpop.permute.xlu1 %2680  ;;  %v7570_v51 = vld [vmem:[#allocation10_spill] sm:$0xff] }
 0x454   :  { %v6378_v6 = vadd.f32 %v7552_v46, %v3007_v36  ;;  %v6381_v31 = vadd.f32 %v7554_v38, %v3008_v40  ;;  %v6384_v52 = vadd.f32 %v7555_v2, %v3009_v39  ;;  %v6387_v1 = vadd.f32 %v7557_v16, %v3010_v56  ;;  %v7561_v19 = vld [vmem:[#allocation9_spill] sm:$0xff]  ;;  %7565 = vst [vmem:[#allocation56_spill] sm:$0xff] %v6405_v12  ;;  %v7567_v56 = vld [vmem:[#allocation15_spill] sm:$0xff]  ;;  %v7568_v38 = vld [vmem:[#allocation6_spill] sm:$0xff] }
 0x455   :  { %v3068_v20 = vadd.f32 %v6372_v3, %v6369_v63  ;;  %v3311_v5 = vmul.f32 %v6303_v10, %v7558_v44  ;;  %v3312_v61 = vmul.f32 %v6303_v10, %v7559_v60  ;;  %v3313_v25 = vmul.f32 %v6303_v10, %v7561_v19  ;;  %v7563_v14 = vld [vmem:[#allocation13_spill] sm:$0xff]  ;;  %v7569_v16 = vld [vmem:[#allocation4_spill] sm:$0xff] }
 0x456   :  { %7553 = vst [vmem:[#allocation48_spill] sm:$0xff] %v6378_v6  ;;  %7556 = vst [vmem:[#allocation54_spill] sm:$0xff] %v6384_v52  ;;  %v3314_v47 = vmul.f32 %v6303_v10, %v7562_v59  ;;  %v3315_v8 = vmul.f32 %v6303_v10, %v7563_v14  ;;  %v3316_v37 = vmul.f32 %v6303_v10, %v7564_v4  ;;  %v7566_v40 = vld [vmem:[#allocation17_spill] sm:$0xff]  ;;  %v7571_v4 = vld [vmem:[#allocation8_spill] sm:$0xff]  ;;  %v6433_v24 = vpop.permute.xlu0 %4058 }
 0x457   :  { %v3069_v36 = vadd.f32 %v3068_v20, %v6375_v18  ;;  %v3317_v39 = vmul.f32 %v6303_v10, %v7566_v40  ;;  %v3318_v46 = vmul.f32 %v6303_v10, %v7567_v56  ;;  %v3331_v2 = vmul.f32 %v6307_v0, %v7568_v38  ;;  %v7572_v14 = vld [vmem:[#allocation14_spill] sm:$0xff]  ;;  %v7573_v59 = vld [vmem:[#allocation12_spill] sm:$0xff]  ;;  %7576 = vst [vmem:[#allocation70_spill] sm:$0xff] %v6433_v24 }
 0x458   :  { %v3332_v33 = vmul.f32 %v6307_v0, %v7569_v16  ;;  %v3333_v32 = vmul.f32 %v6307_v0, %v7570_v51  ;;  %v3334_v12 = vmul.f32 %v6307_v0, %v7571_v4  ;;  %v3335_v20 = vmul.f32 %v6307_v0, %v7572_v14  ;;  %v7574_v56 = vld [vmem:[#allocation18_spill] sm:$0xff]  ;;  %v7575_v19 = vld [vmem:[#allocation16_spill] sm:$0xff] }
 0x459   :  { %v3070_v40 = vadd.f32 %v3069_v36, %v6378_v6  ;;  %v3336_v10 = vmul.f32 %v6307_v0, %v7573_v59  ;;  %v3337_v38 = vmul.f32 %v6307_v0, %v7574_v56  ;;  %v3338_v16 = vmul.f32 %v6307_v0, %v7575_v19  ;;  %v7591_v19 = vld [vmem:[#allocation33_spill] sm:$0xff] }
 0x45a   :  { %v6430_v60 = vadd.f32 %v6264_v35, %v3011_v9  ;;  %v3339_v51 = vadd.f32 %v3331_v2, %v3311_v5  ;;  %v3340_v44 = vadd.f32 %v3332_v33, %v3312_v61  ;;  %v3341_v4 = vadd.f32 %v3333_v32, %v3313_v25  ;;  %v6439_v35 = vpop.permute.xlu1 %3179  ;;  %v7578_v2 = vld [vmem:[#allocation89_spill] sm:$0xff] }
 0x45b   :  { %v3071_v62 = vadd.f32 %v3070_v40, %v6381_v31  ;;  %v3342_v14 = vadd.f32 %v3334_v12, %v3314_v47  ;;  %v3343_v53 = vadd.f32 %v3335_v20, %v3315_v8  ;;  %v3344_v36 = vadd.f32 %v3336_v10, %v3316_v37  ;;  %7577 = vst [vmem:[#allocation51_spill] sm:$0xff] %v6439_v35  ;;  %v7579_v35 = vld [vmem:[#allocation90_spill] sm:$0xff] }
 0x45c   :  { %v3345_v59 = vadd.f32 %v3337_v38, %v3317_v39  ;;  %v3346_v6 = vadd.f32 %v3338_v16, %v3318_v46  ;;  %v3359_v56 = vmul.f32 %v6311_v17, %v5507_v45  ;;  %v3360_v0 = vmul.f32 %v6311_v17, %v5505_v43  ;;  %v7592_v43 = vld [vmem:[#allocation36_spill] sm:$0xff] }
 0x45d   :  { %v3072_v33 = vadd.f32 %v3071_v62, %v6384_v52  ;;  %v3361_v32 = vmul.f32 %v6311_v17, %v5513_v55  ;;  %v3362_v9 = vmul.f32 %v6311_v17, %v5511_v50  ;;  %v3363_v5 = vmul.f32 %v6311_v17, %v7509_v48 }
 0x45e   :  { %v3364_v61 = vmul.f32 %v6311_v17, %v7510_v7  ;;  %v3365_v25 = vmul.f32 %v6311_v17, %v7511_v11  ;;  %v3366_v47 = vmul.f32 %v6311_v17, %v5525_v15  ;;  %v3367_v8 = vadd.f32 %v3359_v56, %v3339_v51  ;;  %v7580_v17 = vld [vmem:[#allocation91_spill] sm:$0xff]  ;;  %v6462_v56 = vpop.permute.xlu0 %4063 }
 0x45f   :  { %v3073_v62 = vadd.f32 %v3072_v33, %v6387_v1  ;;  %v3368_v37 = vadd.f32 %v3360_v0, %v3340_v44  ;;  %v3369_v12 = vadd.f32 %v3361_v32, %v3341_v4  ;;  %v3370_v40 = vadd.f32 %v3362_v9, %v3342_v14  ;;  %7581 = vst [vmem:[#allocation71_spill] sm:$0xff] %v6462_v56  ;;  %v7582_v44 = vld [vmem:[#allocation28_spill] sm:$0xff]  ;;  %v7583_v14 = vld [vmem:[#allocation27_spill] sm:$0xff]  ;;  %v6471_v32 = vpop.permute.xlu1 %2644  ;;  %v7587_v9 = vld [vmem:[#allocation29_spill] sm:$0xff] }
 0x460   :  { %v3371_v39 = vadd.f32 %v3363_v5, %v3343_v53  ;;  %v3372_v46 = vadd.f32 %v3364_v61, %v3344_v36  ;;  %v3373_v38 = vadd.f32 %v3365_v25, %v3345_v59  ;;  %v3386_v16 = vrot.slane %v7578_v2, %v6194_v22  ;;  %v7584_v36 = vld [vmem:[#allocation30_spill] sm:$0xff]  ;;  %v7585_v0 = vld [vmem:[#allocation92_spill] sm:$0xff]  ;;  %7586 = vst [vmem:[#allocation72_spill] sm:$0xff] %v6471_v32  ;;  %v7595_v2 = vld [vmem:[#allocation37_spill] sm:$0xff] }
 0x461   :  { %v3074_v20 = vadd.f32 %v3073_v62, %v6430_v60  ;;  %v3374_v10 = vadd.f32 %v3366_v47, %v3346_v6  ;;  %v3414_v24 = vrot.slane %v7579_v35, %v6194_v22  ;;  %v3442_v51 = vrot.slane %v7580_v17, %v6194_v22  ;;  %v7588_v61 = vld [vmem:[#allocation32_spill] sm:$0xff]  ;;  %v7589_v47 = vld [vmem:[#allocation31_spill] sm:$0xff]  ;;  %v7590_v56 = vld [vmem:[#allocation34_spill] sm:$0xff] }
 0x462   :  { %v3387_v4 = vmul.f32 %v3386_v16, %v7582_v44  ;;  %v3388_v53 = vmul.f32 %v3386_v16, %v7583_v14  ;;  %v3389_v59 = vmul.f32 %v3386_v16, %v7584_v36  ;;  %v6469_v33 = vrot.slane %v7585_v0, %v6194_v22  ;;  %v7593_v17 = vld [vmem:[#allocation35_spill] sm:$0xff]  ;;  %v7594_v35 = vld [vmem:[#allocation38_spill] sm:$0xff]  ;;  %v6482_v52 = vpop.permute.xlu0 %2624 }
 0x463   :  { %v3075_v6 = vrot.slane %v3074_v20, 4  ;;  %v3390_v5 = vmul.f32 %v3386_v16, %v7587_v9  ;;  %v3391_v25 = vmul.f32 %v3386_v16, %v7588_v61  ;;  %v3392_v62 = vmul.f32 %v3386_v16, %v7589_v47  ;;  %7596 = vst [vmem:[#allocation101_spill] sm:$0xff] %v6482_v52 }
 0x464   :  { %v3393_v15 = vmul.f32 %v3386_v16, %v7590_v56  ;;  %v3394_v11 = vmul.f32 %v3386_v16, %v7591_v19  ;;  %v3395_v7 = vadd.f32 %v3387_v4, %v3367_v8  ;;  %v3396_v14 = vadd.f32 %v3388_v53, %v3368_v37  ;;  %v7597_v8 = vld [vmem:[#allocation40_spill] sm:$0xff]  ;;  %v7598_v16 = vld [vmem:[#allocation39_spill] sm:$0xff] }
 0x465   :  { %v3076_v36 = vadd.f32 %v3075_v6, %v3074_v20  ;;  %v3397_v44 = vadd.f32 %v3389_v59, %v3369_v12  ;;  %v3398_v48 = vadd.f32 %v3390_v5, %v3370_v40  ;;  %v3399_v0 = vadd.f32 %v3391_v25, %v3371_v39  ;;  %v7599_v40 = vld [vmem:[#allocation42_spill] sm:$0xff] }
 0x466   :  { %v3400_v50 = vadd.f32 %v3392_v62, %v3372_v46  ;;  %v3401_v55 = vadd.f32 %v3393_v15, %v3373_v38  ;;  %v3402_v32 = vadd.f32 %v3394_v11, %v3374_v10  ;;  %v3415_v45 = vmul.f32 %v3414_v24, %v7592_v43  ;;  %v6488_v11 = vpop.permute.xlu1 %3147 }
 0x467   :  { %v3077_v9 = vrot.slane %v3076_v36, 2  ;;  %v3416_v61 = vmul.f32 %v3414_v24, %v7593_v17  ;;  %v3417_v47 = vmul.f32 %v3414_v24, %v7594_v35  ;;  %v3418_v56 = vmul.f32 %v3414_v24, %v7595_v2  ;;  %7600 = vst [vmem:[#allocation73_spill] sm:$0xff] %v6488_v11 }
 0x468   :  { %v3419_v37 = vmul.f32 %v3414_v24, %v7597_v8  ;;  %v3420_v12 = vmul.f32 %v3414_v24, %v7598_v16  ;;  %v3421_v39 = vmul.f32 %v3414_v24, %v7599_v40  ;;  %v3422_v15 = vmul.f32 %v3414_v24, %v7456_v23 }
 0x469   :  { %v3078_v46 = vadd.f32 %v3077_v9, %v3076_v36  ;;  %v3423_v38 = vadd.f32 %v3415_v45, %v3395_v7  ;;  %v3424_v20 = vadd.f32 %v3416_v61, %v3396_v14  ;;  %v3425_v10 = vadd.f32 %v3417_v47, %v3397_v44  ;;  %v7601_v36 = vld [vmem:[#allocation47_spill] sm:$0xff]  ;;  %v7602_v44 = vld [vmem:[#allocation50_spill] sm:$0xff] }
 0x46a   :  { %v3426_v4 = vadd.f32 %v3418_v56, %v3398_v48  ;;  %v3427_v53 = vadd.f32 %v3419_v37, %v3399_v0  ;;  %v3428_v59 = vadd.f32 %v3420_v12, %v3400_v50  ;;  %v3429_v6 = vadd.f32 %v3421_v39, %v3401_v55  ;;  %v6498_v56 = vpop.permute.xlu0 %2632  ;;  %v6500_v61 = vpop.permute.xlu1 %3151 }
 0x46b   :  { %v3079_v5 = vrot.slane %v3078_v46, 1  ;;  %v3430_v25 = vadd.f32 %v3422_v15, %v3402_v32  ;;  %v3443_v62 = vmul.f32 %v3442_v51, %v7531_v49  ;;  %v3444_v52 = vmul.f32 %v3442_v51, %v7532_v34  ;;  %7603 = vst [vmem:[#allocation74_spill] sm:$0xff] %v6498_v56  ;;  %7604 = vst [vmem:[#allocation36_spill] sm:$0xff] %v6500_v61 }
 0x46c   :  { %v3445_v19 = vmul.f32 %v3442_v51, %v7533_v28  ;;  %v3446_v24 = vmul.f32 %v3442_v51, %v7534_v30  ;;  %v3447_v11 = vmul.f32 %v3442_v51, %v7535_v26  ;;  %v3448_v45 = vmul.f32 %v3442_v51, %v7601_v36 }
 0x46d   :  { %v3080_v7 = vadd.f32 %v3079_v5, %v3078_v46  ;;  %v3449_v48 = vmul.f32 %v3442_v51, %v7602_v44  ;;  %v3450_v50 = vmul.f32 %v3442_v51, %v7464_v57  ;;  %v3451_v55 = vadd.f32 %v3443_v62, %v3423_v38 }
 0x46e   :  { %v3452_v14 = vadd.f32 %v3444_v52, %v3424_v20  ;;  %v3453_v0 = vadd.f32 %v3445_v19, %v3425_v10  ;;  %v3454_v32 = vadd.f32 %v3446_v24, %v3426_v4  ;;  %v3455_v9 = vadd.f32 %v3447_v11, %v3427_v53  ;;  %v6530_v5 = vpop.permute.xlu0 %2640 }
 0x46f   :  { %v3081_v47 = vmul.f32 0.015625, %v3080_v7  ;;  %v3456_v37 = vadd.f32 %v3448_v45, %v3428_v59  ;;  %v3457_v12 = vadd.f32 %v3449_v48, %v3429_v6  ;;  %v3458_v39 = vadd.f32 %v3450_v50, %v3430_v25  ;;  %7609 = vst [vmem:[#allocation112_spill] sm:$0xff] %v6530_v5  ;;  %v6534_v7 = vpop.permute.xlu1 %2688 }
 0x470   :  { %v3471_v15 = vmul.f32 %v6469_v33, %v7465_v54  ;;  %v3472_v46 = vmul.f32 %v6469_v33, %v7466_v29  ;;  %v3473_v51 = vmul.f32 %v6469_v33, %v7539_v41  ;;  %v3474_v52 = vmul.f32 %v6469_v33, %v7540_v58 }
 0x471   :  { %v6511_v19 = vsub.f32 %v6375_v18, %v3081_v47  ;;  %v6514_v11 = vsub.f32 %v6381_v31, %v3081_v47  ;;  %v6517_v38 = vsub.f32 %v6387_v1, %v3081_v47  ;;  %v3475_v20 = vmul.f32 %v6469_v33, %v7541_v21 }
 0x472   :  { %v6522_v10 = vsub.f32 %v6430_v60, %v3081_v47  ;;  %v3476_v4 = vmul.f32 %v6469_v33, %v7542_v13  ;;  %v3477_v53 = vmul.f32 %v6469_v33, %v5904_v42  ;;  %v3478_v18 = vmul.f32 %v6469_v33, %v5900_v27  ;;  %v7610_v60 = vld [vmem:[#allocation93_spill] sm:$0xff]  ;;  %v6553_v23 = vpop.permute.xlu0 %2648  ;;  %v7625_v42 = vld [vmem:[#allocation76_spill] sm:$0xff] }
 0x473   :  { %7605 = vst [vmem:[#allocation35_spill] sm:$0xff] %v6511_v19  ;;  %7606 = vst [vmem:[#allocation38_spill] sm:$0xff] %v6514_v11  ;;  %v3479_v31 = vadd.f32 %v3471_v15, %v3451_v55  ;;  %v3480_v59 = vadd.f32 %v3472_v46, %v3452_v14  ;;  %v3481_v6 = vadd.f32 %v3473_v51, %v3453_v0  ;;  %v7614_v55 = vld [vmem:[#allocation48_spill] sm:$0xff]  ;;  %v7619_v46 = vld [vmem:[#allocation61_spill] sm:$0xff] }
 0x474   :  { %7607 = vst [vmem:[#allocation37_spill] sm:$0xff] %v6517_v38  ;;  %7608 = vst [vmem:[#allocation40_spill] sm:$0xff] %v6522_v10  ;;  %v3482_v1 = vadd.f32 %v3474_v52, %v3454_v32  ;;  %v3483_v25 = vadd.f32 %v3475_v20, %v3455_v9  ;;  %v3484_v62 = vadd.f32 %v3476_v4, %v3456_v37  ;;  %v7616_v0 = vld [vmem:[#allocation60_spill] sm:$0xff]  ;;  %v7617_v9 = vld [vmem:[#allocation59_spill] sm:$0xff] }
 0x475   :  { %v3485_v24 = vadd.f32 %v3477_v53, %v3457_v12  ;;  %v3498_v45 = vrot.slane %v7610_v60, %v6194_v22  ;;  %7611 = vst [vmem:[#allocation93_spill] sm:$0xff] %v6534_v7  ;;  %v3486_v48 = vadd.f32 %v3478_v18, %v3458_v39  ;;  %v6537_v50 = vsub.f32 %v6369_v63, %v3081_v47  ;;  %v7618_v12 = vld [vmem:[#allocation62_spill] sm:$0xff]  ;;  %v7620_v51 = vld [vmem:[#allocation64_spill] sm:$0xff]  ;;  %v7621_v39 = vld [vmem:[#allocation63_spill] sm:$0xff] }
 0x476   :  { %v6540_v33 = vsub.f32 %v6372_v3, %v3081_v47  ;;  %v6543_v14 = vsub.f32 %v7614_v55, %v3081_v47  ;;  %v7622_v63 = vld [vmem:[#allocation66_spill] sm:$0xff]  ;;  %v7623_v53 = vld [vmem:[#allocation65_spill] sm:$0xff]  ;;  %7624 = vst [vmem:[#allocation60_spill] sm:$0xff] %v6553_v23 }
 0x477   :  { %7612 = vst [vmem:[#allocation113_spill] sm:$0xff] %v6537_v50  ;;  %v3499_v32 = vmul.f32 %v3498_v45, %v7616_v0  ;;  %v3500_v37 = vmul.f32 %v3498_v45, %v7617_v9  ;;  %v3501_v15 = vmul.f32 %v3498_v45, %v7618_v12  ;;  %v3502_v22 = vmul.f32 %v3498_v45, %v7619_v46  ;;  %v7627_v13 = vld [vmem:[#allocation77_spill] sm:$0xff] }
 0x478   :  { %7613 = vst [vmem:[#allocation114_spill] sm:$0xff] %v6540_v33  ;;  %7615 = vst [vmem:[#allocation48_spill] sm:$0xff] %v6543_v14  ;;  %v3503_v52 = vmul.f32 %v3498_v45, %v7620_v51  ;;  %v3504_v20 = vmul.f32 %v3498_v45, %v7621_v39  ;;  %v3505_v4 = vmul.f32 %v3498_v45, %v7622_v63  ;;  %v7629_v39 = vld [vmem:[#allocation79_spill] sm:$0xff] }
 0x479   :  { %v3506_v3 = vmul.f32 %v3498_v45, %v7623_v53  ;;  %v3507_v18 = vadd.f32 %v3499_v32, %v3479_v31  ;;  %v3508_v7 = vadd.f32 %v3500_v37, %v3480_v59  ;;  %v3509_v55 = vadd.f32 %v3501_v15, %v3481_v6  ;;  %v7630_v45 = vld [vmem:[#allocation80_spill] sm:$0xff]  ;;  %v6567_v59 = vpop.permute.xlu1 %3187  ;;  %v7632_v6 = vld [vmem:[#allocation81_spill] sm:$0xff]  ;;  %v7637_v32 = vld [vmem:[#allocation54_spill] sm:$0xff] }
 0x47a   :  { %v3510_v5 = vadd.f32 %v3502_v22, %v3482_v1  ;;  %v3511_v56 = vadd.f32 %v3503_v52, %v3483_v25  ;;  %v3512_v61 = vadd.f32 %v3504_v20, %v3484_v62  ;;  %v3513_v27 = vadd.f32 %v3505_v4, %v3485_v24  ;;  %7631 = vst [vmem:[#allocation61_spill] sm:$0xff] %v6567_v59  ;;  %v7634_v25 = vld [vmem:[#allocation82_spill] sm:$0xff]  ;;  %v7635_v24 = vld [vmem:[#allocation83_spill] sm:$0xff]  ;;  %v7639_v20 = vld [vmem:[#allocation104_spill] sm:$0xff] }
 0x47b   :  { %v3514_v57 = vadd.f32 %v3506_v3, %v3486_v48  ;;  %v6556_v44 = vadd.f32 %v7625_v42, %v3507_v18  ;;  %v6559_v40 = vadd.f32 %v7627_v13, %v3508_v7  ;;  %v6562_v63 = vadd.f32 %v7629_v39, %v3509_v55  ;;  %v7636_v48 = vld [vmem:[#allocation84_spill] sm:$0xff]  ;;  %v7640_v4 = vld [vmem:[#allocation86_spill] sm:$0xff]  ;;  %v7641_v18 = vld [vmem:[#allocation87_spill] sm:$0xff] }
 0x47c   :  { %v6565_v31 = vadd.f32 %v7630_v45, %v3510_v5  ;;  %v6570_v1 = vadd.f32 %v7632_v6, %v3511_v56  ;;  %v6573_v62 = vadd.f32 %v7634_v25, %v3512_v61  ;;  %v6576_v42 = vadd.f32 %v7635_v24, %v3513_v27  ;;  %v7642_v45 = vld [vmem:[#allocation88_spill] sm:$0xff]  ;;  %v7643_v25 = vld [vmem:[#allocation89_spill] sm:$0xff]  ;;  %v7655_v53 = vld [vmem:[#allocation10_spill] sm:$0xff] }
 0x47d   :  { %7626 = vst [vmem:[#allocation59_spill] sm:$0xff] %v6556_v44  ;;  %7628 = vst [vmem:[#allocation62_spill] sm:$0xff] %v6559_v40  ;;  %v6579_v13 = vadd.f32 %v7636_v48, %v3514_v57  ;;  %v3571_v7 = vadd.f32 %v6559_v40, %v6556_v44  ;;  %v6584_v5 = vsub.f32 %v7637_v32, %v3081_v47  ;;  %v6619_v48 = vpop.permute.xlu0 %3630  ;;  %v6630_v23 = vpop.permute.xlu1 %3626  ;;  %v7657_v40 = vld [vmem:[#allocation14_spill] sm:$0xff] }
 0x47e   :  { %7633 = vst [vmem:[#allocation64_spill] sm:$0xff] %v6570_v1  ;;  %v3090_v37 = vmul.f32 %v6537_v50, %v6537_v50  ;;  %v3091_v56 = vmul.f32 %v6540_v33, %v6540_v33  ;;  %v3092_v61 = vmul.f32 %v6511_v19, %v6511_v19  ;;  %v3093_v27 = vmul.f32 %v6543_v14, %v6543_v14  ;;  %v7652_v33 = vld [vmem:[#allocation13_spill] sm:$0xff]  ;;  %v7656_v14 = vld [vmem:[#allocation8_spill] sm:$0xff] }
 0x47f   :  { %7638 = vst [vmem:[#allocation76_spill] sm:$0xff] %v6584_v5  ;;  %v3094_v57 = vmul.f32 %v6514_v11, %v6514_v11  ;;  %v3096_v15 = vmul.f32 %v6517_v38, %v6517_v38  ;;  %v3572_v47 = vadd.f32 %v3571_v7, %v6562_v63  ;;  %v3095_v22 = vmul.f32 %v6584_v5, %v6584_v5  ;;  %v7653_v5 = vld [vmem:[#allocation6_spill] sm:$0xff]  ;;  %v7654_v11 = vld [vmem:[#allocation4_spill] sm:$0xff] }
 0x480   :  { %v3097_v52 = vmul.f32 %v6522_v10, %v6522_v10  ;;  %v3098_v39 = vadd.f32 %v3091_v56, %v3090_v37  ;;  %v6605_v3 = vrot.slane %v7640_v4, %v7639_v20  ;;  %v6609_v55 = vrot.slane %v7641_v18, %v7639_v20  ;;  %7644 = vst [vmem:[#allocation77_spill] sm:$0xff] %v6619_v48  ;;  %v7645_v37 = vld [vmem:[#allocation90_spill] sm:$0xff]  ;;  %v7646_v4 = vld [vmem:[#allocation91_spill] sm:$0xff]  ;;  %v7650_v48 = vld [vmem:[#allocation9_spill] sm:$0xff] }
 0x481   :  { %v6613_v6 = vrot.slane %v7642_v45, %v7639_v20  ;;  %v6617_v24 = vrot.slane %v7643_v25, %v7639_v20  ;;  %v3573_v7 = vadd.f32 %v3572_v47, %v6565_v31  ;;  %v6624_v56 = vrot.slane %v7645_v37, %v7639_v20  ;;  %7647 = vst [vmem:[#allocation79_spill] sm:$0xff] %v6630_v23  ;;  %v7648_v45 = vld [vmem:[#allocation5_spill] sm:$0xff]  ;;  %v7649_v25 = vld [vmem:[#allocation3_spill] sm:$0xff]  ;;  %v6656_v50 = vpop.permute.xlu0 %3638 }
 0x482   :  { %v3099_v32 = vadd.f32 %v3098_v39, %v3092_v61  ;;  %v6628_v18 = vrot.slane %v7646_v4, %v7639_v20  ;;  %v3814_v59 = vmul.f32 %v6605_v3, %v7648_v45  ;;  %v3815_v10 = vmul.f32 %v6605_v3, %v7649_v25  ;;  %v7651_v61 = vld [vmem:[#allocation7_spill] sm:$0xff] }
 0x483   :  { %v3816_v47 = vmul.f32 %v6605_v3, %v7650_v48  ;;  %v3817_v39 = vmul.f32 %v6605_v3, %v7651_v61  ;;  %v3574_v37 = vadd.f32 %v3573_v7, %v6570_v1  ;;  %v3818_v4 = vmul.f32 %v6605_v3, %v7652_v33  ;;  %v7658_v33 = vld [vmem:[#allocation20_spill] sm:$0xff] }
 0x484   :  { %v3100_v38 = vadd.f32 %v3099_v32, %v3093_v27  ;;  %v3834_v23 = vmul.f32 %v6609_v55, %v7653_v5  ;;  %v3835_v45 = vmul.f32 %v6609_v55, %v7654_v11  ;;  %v3836_v25 = vmul.f32 %v6609_v55, %v7655_v53 }
 0x485   :  { %v3837_v48 = vmul.f32 %v6609_v55, %v7656_v14  ;;  %v3838_v61 = vmul.f32 %v6609_v55, %v7657_v40  ;;  %v3575_v27 = vadd.f32 %v3574_v37, %v6573_v62  ;;  %v3862_v1 = vmul.f32 %v6613_v6, %v7658_v33  ;;  %v7659_v14 = vld [vmem:[#allocation19_spill] sm:$0xff]  ;;  %v7660_v40 = vld [vmem:[#allocation22_spill] sm:$0xff] }
 0x486   :  { %v3101_v7 = vadd.f32 %v3100_v38, %v3094_v57  ;;  %v3842_v32 = vadd.f32 %v3834_v23, %v3814_v59  ;;  %v3843_v5 = vadd.f32 %v3835_v45, %v3815_v10  ;;  %v3844_v44 = vadd.f32 %v3836_v25, %v3816_v47  ;;  %v6663_v38 = vpop.permute.xlu1 %4129  ;;  %v7662_v23 = vld [vmem:[#allocation21_spill] sm:$0xff]  ;;  %v7663_v10 = vld [vmem:[#allocation24_spill] sm:$0xff]  ;;  %v7665_v33 = vld [vmem:[#allocation27_spill] sm:$0xff] }
 0x487   :  { %v3845_v19 = vadd.f32 %v3837_v48, %v3817_v39  ;;  %v3846_v11 = vadd.f32 %v3838_v61, %v3818_v4  ;;  %v3576_v53 = vadd.f32 %v3575_v27, %v6576_v42  ;;  %v3863_v16 = vmul.f32 %v6613_v6, %v7659_v14  ;;  %7661 = vst [vmem:[#allocation80_spill] sm:$0xff] %v6663_v38  ;;  %v7664_v39 = vld [vmem:[#allocation28_spill] sm:$0xff]  ;;  %v7733_v38 = vld [vmem:[#allocation45_spill] sm:$0xff] }
 0x488   :  { %v3102_v36 = vadd.f32 %v3101_v7, %v3095_v22  ;;  %v3864_v37 = vmul.f32 %v6613_v6, %v7660_v40  ;;  %v3865_v59 = vmul.f32 %v6613_v6, %v7662_v23  ;;  %v3866_v57 = vmul.f32 %v6613_v6, %v7663_v10  ;;  %v6674_v22 = vld [vmem:[%s7166_s4] sm:$0xff] }
 0x489   :  { %v3870_v47 = vadd.f32 %v3862_v1, %v3842_v32  ;;  %v3890_v4 = vmul.f32 %v6617_v24, %v7664_v39  ;;  %v3577_v45 = vadd.f32 %v3576_v53, %v6579_v13  ;;  %v3871_v48 = vadd.f32 %v3863_v16, %v3843_v5  ;;  %4879 = vmatprep.mubr.msk.f32.mxu0 %vm225_vm3, %v6674_v22  ;;  %v7666_v32 = vld [vmem:[#allocation30_spill] sm:$0xff]  ;;  %v7667_v53 = vld [vmem:[#allocation29_spill] sm:$0xff] }
 0x48a   :  { %v3103_v25 = vadd.f32 %v3102_v36, %v3096_v15  ;;  %v3872_v61 = vadd.f32 %v3864_v37, %v3844_v44  ;;  %v3873_v27 = vadd.f32 %v3865_v59, %v3845_v19  ;;  %v3874_v7 = vadd.f32 %v3866_v57, %v3846_v11  ;;  %4898 = vmatprep.mubr.msk.f32.mxu1 %vm225_vm3, %v6674_v22  ;;  %v7668_v36 = vld [vmem:[#allocation32_spill] sm:$0xff]  ;;  %v6691_v37 = vpop.permute.xlu0 %3646 }
 0x48b   :  { %v3891_v1 = vmul.f32 %v6617_v24, %v7665_v33  ;;  %v3892_v14 = vmul.f32 %v6617_v24, %v7666_v32  ;;  %v3578_v40 = vrot.slane %v3577_v45, 4  ;;  %v3893_v16 = vmul.f32 %v6617_v24, %v7667_v53  ;;  %v6693_v33 = vpop.permute.xlu1 %4133 }
 0x48c   :  { %v3104_v23 = vadd.f32 %v3103_v25, %v3097_v52  ;;  %v3894_v44 = vmul.f32 %v6617_v24, %v7668_v36  ;;  %v3898_v15 = vadd.f32 %v3890_v4, %v3870_v47  ;;  %v3918_v11 = vmul.f32 %v6624_v56, %v7592_v43  ;;  %7669 = vst [vmem:[#allocation81_spill] sm:$0xff] %v6693_v33 }
 0x48d   :  { %v3899_v19 = vadd.f32 %v3891_v1, %v3871_v48  ;;  %v3900_v5 = vadd.f32 %v3892_v14, %v3872_v61  ;;  %v3579_v59 = vadd.f32 %v3578_v40, %v3577_v45  ;;  %v3901_v57 = vadd.f32 %v3893_v16, %v3873_v27  ;;  %v7670_v40 = vld [vmem:[#allocation110_spill] sm:$0xff]  ;;  %v7672_v16 = vld [vmem:[#allocation92_spill] sm:$0xff] }
 0x48e   :  { %v3105_v10 = vrot.slane %v3104_v23, 4  ;;  %v3902_v39 = vadd.f32 %v3894_v44, %v3874_v7  ;;  %v3919_v52 = vmul.f32 %v6624_v56, %v7593_v17  ;;  %v3920_v25 = vmul.f32 %v6624_v56, %v7594_v35  ;;  %v6718_v44 = vpop.permute.xlu0 %3654 }
 0x48f   :  { %v3921_v47 = vmul.f32 %v6624_v56, %v7595_v2  ;;  %v3922_v43 = vmul.f32 %v6624_v56, %v7597_v8  ;;  %v3580_v4 = vrot.slane %v3579_v59, 2  ;;  %v3926_v45 = vadd.f32 %v3918_v11, %v3898_v15  ;;  %7673 = vst [vmem:[#allocation82_spill] sm:$0xff] %v6718_v44 }
 0x490   :  { %v3106_v48 = vadd.f32 %v3105_v10, %v3104_v23  ;;  %v3946_v61 = vmul.f32 %v6628_v18, %v7531_v49  ;;  %v3927_v27 = vadd.f32 %v3919_v52, %v3899_v19  ;;  %v3928_v7 = vadd.f32 %v3920_v25, %v3900_v5  ;;  %v6722_v5 = vpop.permute.xlu1 %3670 }
 0x491   :  { %v3929_v1 = vadd.f32 %v3921_v47, %v3901_v57  ;;  %v3930_v32 = vadd.f32 %v3922_v43, %v3902_v39  ;;  %v3581_v17 = vadd.f32 %v3580_v4, %v3579_v59  ;;  %v3947_v35 = vmul.f32 %v6628_v18, %v7532_v34 }
 0x492   :  { %v3107_v14 = vrot.slane %v3106_v48, 2  ;;  %v3948_v2 = vmul.f32 %v6628_v18, %v7533_v28  ;;  %v7671_v8 = vrot.slane %v7670_v40, 1  ;;  %v3949_v53 = vmul.f32 %v6628_v18, %v7534_v30 }
 0x493   :  { %v3954_v49 = vadd.f32 %v3946_v61, %v3926_v45  ;;  %v6716_v36 = vrot.slane %v7672_v16, %v7639_v20  ;;  %v3950_v34 = vmul.f32 %v6628_v18, %v7535_v26  ;;  %v3955_v19 = vadd.f32 %v3947_v35, %v3927_v27  ;;  %v6742_v61 = vpop.permute.xlu0 %2660  ;;  %v7675_v35 = vld [vmem:[#allocation99_spill] sm:$0xff] }
 0x494   :  { %v2576_v23 = vadd.f32 %v7671_v8, %v7670_v40  ;;  %v3108_v15 = vadd.f32 %v3107_v14, %v3106_v48  ;;  %v3956_v28 = vadd.f32 %v3948_v2, %v3928_v7  ;;  %v6726_v11 = vrot.slane %v7610_v60, %v7639_v20  ;;  %v7676_v40 = vld [vmem:[#allocation67_spill] sm:$0xff] }
 0x495   :  { %v3957_v30 = vadd.f32 %v3949_v53, %v3929_v1  ;;  %v3974_v59 = vmul.f32 %v6716_v36, %v7465_v54  ;;  %v3975_v10 = vmul.f32 %v6716_v36, %v7466_v29  ;;  %v3582_v57 = vrot.slane %v3581_v17, 1 }
 0x496   :  { %v3109_v39 = vrot.slane %v3108_v15, 1  ;;  %v3958_v52 = vadd.f32 %v3950_v34, %v3930_v32  ;;  %v3976_v26 = vmul.f32 %v6716_v36, %v7539_v41  ;;  %v3977_v25 = vmul.f32 %v6716_v36, %v7540_v58  ;;  %v2701_v58 = vld [vmem:[%s7167_s5] sm:$0xff] }
 0x497   :  { %v3982_v47 = vadd.f32 %v3974_v59, %v3954_v49  ;;  %v3983_v43 = vadd.f32 %v3975_v10, %v3955_v19  ;;  %v2578_v60 = vmul.f32 0.015625, %v2576_v23  ;;  %v3978_v4 = vmul.f32 %v6716_v36, %v7541_v21  ;;  %v6749_v21 = vpop.permute.xlu1 %4169  ;;  %2705 = vperm.xlu1 %5138, %v2701_v58   ;;  %v7677_v49 = vld [vmem:[#allocation107_spill] sm:$0xff]  ;;  %v7679_v19 = vld [vmem:[#allocation68_spill] sm:$0xff] }
 0x498   :  { %v3110_v20 = vadd.f32 %v3109_v39, %v3108_v15  ;;  %v3984_v54 = vadd.f32 %v3976_v26, %v3956_v28  ;;  %v3985_v48 = vadd.f32 %v3977_v25, %v3957_v30  ;;  %v4002_v29 = vmul.f32 %v6726_v11, %v7616_v0  ;;  %7674 = vst [vmem:[#allocation83_spill] sm:$0xff] %v6749_v21  ;;  %v6754_v0 = vld [vmem:[%s7167_s5 + $0x8] sm:$0xff]  ;;  %v7680_v30 = vld [vmem:[#allocation109_spill] sm:$0xff]  ;;  %v6785_v39 = vpop.permute.xlu0 %3167 }
 0x499   :  { %v4003_v45 = vmul.f32 %v6726_v11, %v7617_v9  ;;  %v3583_v41 = vadd.f32 %v3582_v57, %v3581_v17  ;;  %v3986_v27 = vadd.f32 %v3978_v4, %v3958_v52  ;;  %v4004_v7 = vmul.f32 %v6726_v11, %v7618_v12  ;;  %2710 = vperm.xlu0 %5139, %v6754_v0   ;;  %v7681_v52 = vld [vmem:[#allocation100_spill] sm:$0xff]  ;;  %v7682_v25 = vld [vmem:[#allocation69_spill] sm:$0xff] }
 0x49a   :  { %v3111_v9 = vmul.f32 0.015625, %v3110_v20  ;;  %v4005_v1 = vmul.f32 %v6726_v11, %v7619_v46  ;;  %v4010_v32 = vadd.f32 %v4002_v29, %v3982_v47  ;;  %v4006_v17 = vmul.f32 %v6726_v11, %v7620_v51  ;;  %v7678_v46 = vld [vmem:[#allocation78_spill] sm:$0xff] }
 0x49b   :  { %v4011_v14 = vadd.f32 %v4003_v45, %v3983_v43  ;;  %v4012_v12 = vadd.f32 %v4004_v7, %v3984_v54  ;;  %v6762_v2 = vsub.f32 %v7675_v35, %v2578_v60  ;;  %v6765_v8 = vsub.f32 %v7676_v40, %v2578_v60  ;;  %3208 = vperm.xlu1 %5138, %v2701_v58   ;;  %v7683_v43 = vld [vmem:[#allocation103_spill] sm:$0xff]  ;;  %v6798_v54 = vpop.permute.xlu1 %3634  ;;  %v7685_v45 = vld [vmem:[#allocation44_spill] sm:$0xff]  ;;  %v7688_v40 = vld [vmem:[#allocation46_spill] sm:$0xff] }
 0x49c   :  { %v3112_v23 = vadd.f32 1e-05, %v3111_v9  ;;  %v4013_v53 = vadd.f32 %v4005_v1, %v3985_v48  ;;  %v6768_v16 = vadd.f32 %v7677_v49, %v4010_v32  ;;  %v6773_v34 = vmul.f32 0.015625, %v3583_v41  ;;  %v7684_v48 = vld [vmem:[#allocation75_spill] sm:$0xff] }
 0x49d   :  { %v6771_v15 = vadd.f32 %v7678_v46, %v4011_v14  ;;  %v6776_v28 = vsub.f32 %v7679_v19, %v2578_v60  ;;  %v4014_v51 = vadd.f32 %v4006_v17, %v3986_v27  ;;  %v6779_v59 = vadd.f32 %v7680_v30, %v4012_v12  ;;  %3711 = vperm.xlu0 %5139, %v2701_v58   ;;  %v7686_v1 = vld [vmem:[#allocation11_spill] sm:$0xff]  ;;  %v7687_v14 = vld [vmem:[#allocation12_spill] sm:$0xff] }
 0x49e   :  { %v2587_v57 = vmul.f32 %v6762_v2, %v6762_v2  ;;  %v6788_v26 = vsub.f32 %v7681_v52, %v2578_v60  ;;  %v6791_v47 = vsub.f32 %v7682_v25, %v2578_v60  ;;  %v6794_v20 = vsub.f32 %v7683_v43, %v2578_v60  ;;  %v7689_v30 = vld [vmem:[#allocation23_spill] sm:$0xff]  ;;  %v7691_v52 = vld [vmem:[#allocation17_spill] sm:$0xff]  ;;  %v7692_v25 = vld [vmem:[#allocation18_spill] sm:$0xff]  ;;  %v6840_v43 = vpop.permute.xlu0 %2668 }
 0x49f   :  { %v4074_v10 = vadd.f32 %v6771_v15, %v6768_v16  ;;  %v2588_v4 = vmul.f32 %v6765_v8, %v6765_v8  ;;  %v6801_v29 = vsub.f32 %v7684_v48, %v2578_v60  ;;  %5158 = vrsqrt.f32 %v3112_v23  ;;  %3213 = vperm.xlu1 %5138, %v6754_v0  }
 0x4a0   :  { %v6804_v41 = vadd.f32 %v7685_v45, %v4013_v53  ;;  %v2589_v7 = vmul.f32 %v6776_v28, %v6776_v28  ;;  %v3819_v32 = vmul.f32 %v6605_v3, %v7686_v1  ;;  %v3839_v17 = vmul.f32 %v6609_v55, %v7687_v14  ;;  %v7695_v1 = vld [vmem:[#allocation39_spill] sm:$0xff] }
 0x4a1   :  { %v4075_v27 = vadd.f32 %v4074_v10, %v6779_v59  ;;  %v2595_v9 = vadd.f32 %v2588_v4, %v2587_v57  ;;  %v6816_v12 = vsub.f32 %v6562_v63, %v6773_v34  ;;  %v6820_v35 = vsub.f32 %v6565_v31, %v6773_v34  ;;  %4214 = vperm.xlu0 %5139, %v2701_v58   ;;  %v7690_v57 = vld [vmem:[#allocation105_spill] sm:$0xff] }
 0x4a2   :  { %v6823_v23 = vadd.f32 %v7688_v40, %v4014_v51  ;;  %v2590_v49 = vmul.f32 %v6788_v26, %v6788_v26  ;;  %v3847_v19 = vadd.f32 %v3839_v17, %v3819_v32  ;;  %v3867_v10 = vmul.f32 %v6613_v6, %v7689_v30  ;;  %v7696_v17 = vld [vmem:[#allocation26_spill] sm:$0xff]  ;;  %v7698_v30 = vld [vmem:[#allocation16_spill] sm:$0xff] }
 0x4a3   :  { %v4076_v53 = vadd.f32 %v4075_v27, %v6804_v41  ;;  %v2596_v46 = vadd.f32 %v2595_v9, %v2589_v7  ;;  %v6834_v31 = vsub.f32 %v7690_v57, %v2578_v60  ;;  %v3820_v51 = vmul.f32 %v6605_v3, %v7691_v52  ;;  %v7693_v27 = vld [vmem:[#allocation31_spill] sm:$0xff]  ;;  %v6846_v9 = vpop.permute.xlu1 %4137  ;;  %3716 = vperm.xlu1 %5138, %v6754_v0  }
 0x4a4   :  { %v3840_v58 = vmul.f32 %v6609_v55, %v7692_v25  ;;  %v2591_v4 = vmul.f32 %v6791_v47, %v6791_v47  ;;  %v3875_v45 = vadd.f32 %v3867_v10, %v3847_v19  ;;  %v3895_v7 = vmul.f32 %v6617_v24, %v7693_v27  ;;  %7694 = vst [vmem:[#allocation84_spill] sm:$0xff] %v6846_v9 }
 0x4a5   :  { %v6831_v63 = vadd.f32 %v4076_v53, %v6823_v23  ;;  %v2597_v48 = vadd.f32 %v2596_v46, %v2590_v49  ;;  %v2592_v60 = vmul.f32 %v6794_v20, %v6794_v20  ;;  %v3923_v32 = vmul.f32 %v6624_v56, %v7695_v1  ;;  %v7697_v46 = vld [vmem:[#allocation15_spill] sm:$0xff] }
 0x4a6   :  { %v3848_v14 = vadd.f32 %v3840_v58, %v3820_v51  ;;  %v3868_v40 = vmul.f32 %v6613_v6, %v7696_v17  ;;  %v3903_v49 = vadd.f32 %v3895_v7, %v3875_v45  ;;  %v3821_v19 = vmul.f32 %v6605_v3, %v7697_v46  ;;  %v7699_v51 = vld [vmem:[#allocation34_spill] sm:$0xff]  ;;  %v7700_v3 = vld [vmem:[#allocation47_spill] sm:$0xff]  ;;  %v7702_v17 = vld [vmem:[#allocation25_spill] sm:$0xff]  ;;  %v6878_v46 = vpop.permute.xlu0 %3175 }
 0x4a7   :  { %v2598_v53 = vadd.f32 %v2597_v48, %v2591_v4  ;;  %v3841_v10 = vmul.f32 %v6609_v55, %v7698_v30  ;;  %v6861_v57 = vsub.f32 %v6573_v62, %v6773_v34  ;;  %v2593_v52 = vmul.f32 %v6834_v31, %v6834_v31  ;;  %4219 = vperm.xlu1 %5138, %v6754_v0   ;;  %v7701_v7 = vld [vmem:[#allocation42_spill] sm:$0xff] }
 0x4a8   :  { %v3876_v25 = vadd.f32 %v3868_v40, %v3848_v14  ;;  %v3896_v58 = vmul.f32 %v6617_v24, %v7699_v51  ;;  %v2594_v4 = vmul.f32 %v6801_v29, %v6801_v29  ;;  %v3931_v45 = vadd.f32 %v3923_v32, %v3903_v49  ;;  %v7703_v32 = vld [vmem:[#allocation55_spill] sm:$0xff]  ;;  %v6884_v51 = vpop.permute.xlu1 %4141 }
 0x4a9   :  { %v2599_v48 = vadd.f32 %v2598_v53, %v2592_v60  ;;  %v3951_v27 = vmul.f32 %v6628_v18, %v7700_v3  ;;  %v6872_v55 = vpop.eup %5158  ;;  %v3924_v1 = vmul.f32 %v6624_v56, %v7701_v7  ;;  %v3849_v14 = vadd.f32 %v3841_v10, %v3821_v19  ;;  %v7704_v49 = vld [vmem:[#allocation63_spill] sm:$0xff]  ;;  %7705 = vst [vmem:[#allocation54_spill] sm:$0xff] %v6884_v51  ;;  %v7707_v10 = vld [vmem:[#allocation33_spill] sm:$0xff] }
 0x4aa   :  { %v3904_v62 = vadd.f32 %v3896_v58, %v3876_v25  ;;  %v3869_v40 = vmul.f32 %v6613_v6, %v7702_v17  ;;  %v3979_v53 = vmul.f32 %v6716_v36, %v7703_v32  ;;  %v4007_v0 = vmul.f32 %v6726_v11, %v7704_v49  ;;  %v7706_v58 = vld [vmem:[#allocation50_spill] sm:$0xff]  ;;  %v7708_v7 = vld [vmem:[#allocation113_spill] sm:$0xff]  ;;  %v7712_v51 = vld [vmem:[#allocation35_spill] sm:$0xff] }
 0x4ab   :  { %v2600_v30 = vadd.f32 %v2599_v48, %v2593_v52  ;;  %v3959_v60 = vadd.f32 %v3951_v27, %v3931_v45  ;;  %v3952_v3 = vmul.f32 %v6628_v18, %v7706_v58  ;;  %v3897_v6 = vmul.f32 %v6617_v24, %v7707_v10  ;;  %v7709_v27 = vld [vmem:[#allocation58_spill] sm:$0xff]  ;;  %v7713_v10 = vld [vmem:[#allocation59_spill] sm:$0xff] }
 0x4ac   :  { %v3932_v25 = vadd.f32 %v3924_v1, %v3904_v62  ;;  %v3877_v19 = vadd.f32 %v3869_v40, %v3849_v14  ;;  %v3114_v52 = vmul.f32 %v6872_v55, %v7708_v7  ;;  %v3980_v17 = vmul.f32 %v6716_v36, %v7709_v27  ;;  %v7710_v49 = vld [vmem:[#allocation66_spill] sm:$0xff]  ;;  %v7711_v1 = vld [vmem:[#allocation41_spill] sm:$0xff]  ;;  %v7718_v27 = vld [vmem:[#allocation48_spill] sm:$0xff] }
 0x4ad   :  { %v2601_v48 = vadd.f32 %v2600_v30, %v2594_v4  ;;  %v3987_v45 = vadd.f32 %v3979_v53, %v3959_v60  ;;  %v4008_v21 = vmul.f32 %v6726_v11, %v7710_v49  ;;  %v3925_v58 = vmul.f32 %v6624_v56, %v7711_v1  ;;  %v7714_v53 = vld [vmem:[#allocation49_spill] sm:$0xff]  ;;  %v7716_v56 = vld [vmem:[#allocation94_spill] sm:$0xff] }
 0x4ae   :  { %v3960_v32 = vadd.f32 %v3952_v3, %v3932_v25  ;;  %v3905_v62 = vadd.f32 %v3897_v6, %v3877_v19  ;;  %v3116_v24 = vmul.f32 %v6872_v55, %v7712_v51  ;;  %v6902_v4 = vsub.f32 %v7713_v10, %v6773_v34  ;;  %v7715_v3 = vld [vmem:[#allocation62_spill] sm:$0xff]  ;;  %v6910_v6 = vpop.permute.xlu0 %2676 }
 0x4af   :  { %v2602_v14 = vrot.slane %v2601_v48, 4  ;;  %v4015_v40 = vadd.f32 %v4007_v0, %v3987_v45  ;;  %v3953_v25 = vmul.f32 %v6628_v18, %v7714_v53  ;;  %v6908_v19 = vsub.f32 %v7715_v3, %v6773_v34  ;;  %v7717_v45 = vld [vmem:[#allocation53_spill] sm:$0xff]  ;;  %v7721_v53 = vld [vmem:[#allocation70_spill] sm:$0xff] }
 0x4b0   :  { %v3988_v30 = vadd.f32 %v3980_v17, %v3960_v32  ;;  %v3933_v60 = vadd.f32 %v3925_v58, %v3905_v62  ;;  %v3154_v0 = vmul.f32 %v7716_v56, %v3114_v52  ;;  %v3117_v49 = vmul.f32 %v6872_v55, %v7718_v27  ;;  %v6918_v17 = vpop.permute.xlu1 %3678  ;;  %v7719_v18 = vld [vmem:[#allocation57_spill] sm:$0xff] }
 0x4b1   :  { %v2603_v7 = vadd.f32 %v2602_v14, %v2601_v48  ;;  %v6914_v51 = vadd.f32 %v7717_v45, %v4015_v40  ;;  %v3981_v1 = vmul.f32 %v6716_v36, %v7719_v18  ;;  %v3593_v58 = vmul.f32 %v6902_v4, %v6902_v4  ;;  %v7720_v48 = vld [vmem:[#allocation98_spill] sm:$0xff]  ;;  %v7725_v18 = vld [vmem:[#allocation76_spill] sm:$0xff] }
 0x4b2   :  { %v4016_v32 = vadd.f32 %v4008_v21, %v3988_v30  ;;  %v3961_v62 = vadd.f32 %v3953_v25, %v3933_v60  ;;  %v3156_v14 = vmul.f32 %v7720_v48, %v3116_v24  ;;  %v3594_v40 = vmul.f32 %v6908_v19, %v6908_v19  ;;  %v7722_v30 = vld [vmem:[#allocation65_spill] sm:$0xff]  ;;  %v7723_v36 = vld [vmem:[#allocation38_spill] sm:$0xff]  ;;  %v7726_v24 = vld [vmem:[#allocation64_spill] sm:$0xff] }
 0x4b3   :  { %v2604_v10 = vrot.slane %v2603_v7, 2  ;;  %v4078_v52 = vadd.f32 %v6831_v63, %v6914_v51  ;;  %v4009_v60 = vmul.f32 %v6726_v11, %v7722_v30  ;;  %v3118_v25 = vmul.f32 %v6872_v55, %v7723_v36  ;;  %v7724_v45 = vld [vmem:[#allocation102_spill] sm:$0xff]  ;;  %v7727_v30 = vld [vmem:[#allocation97_spill] sm:$0xff] }
 0x4b4   :  { %v6930_v3 = vadd.f32 %v7721_v53, %v4016_v32  ;;  %v3989_v21 = vadd.f32 %v3981_v1, %v3961_v62  ;;  %v3157_v27 = vmul.f32 %v7724_v45, %v3117_v49  ;;  %v3119_v63 = vmul.f32 %v6872_v55, %v7725_v18  ;;  %v3184_v1 = vpop.permute.xlu0 %3183  ;;  %v7729_v45 = vld [vmem:[#allocation114_spill] sm:$0xff]  ;;  %v6950_v9 = vpop.permute.xlu1 %4177 }
 0x4b5   :  { %v2605_v56 = vadd.f32 %v2604_v10, %v2603_v7  ;;  %v6941_v48 = vsub.f32 %v7726_v24, %v6773_v34  ;;  %v3595_v62 = vmul.f32 %v6816_v12, %v6816_v12  ;;  %v3601_v11 = vadd.f32 %v3594_v40, %v3593_v58  ;;  %v7728_v10 = vld [vmem:[#allocation108_spill] sm:$0xff]  ;;  %7730 = vst [vmem:[#allocation104_spill] sm:$0xff] %v6950_v9  ;;  %v7731_v24 = vld [vmem:[#allocation71_spill] sm:$0xff] }
 0x4b6   :  { %v4079_v32 = vadd.f32 %v4078_v52, %v6930_v3  ;;  %v4017_v53 = vadd.f32 %v4009_v60, %v3989_v21  ;;  %v3194_v36 = vadd.f32 %v7727_v30, %v3154_v0  ;;  %v3196_v49 = vadd.f32 %v7728_v10, %v3156_v14  ;;  %v7732_v52 = vld [vmem:[#allocation43_spill] sm:$0xff] }
 0x4b7   :  { %v2606_v7 = vrot.slane %v2605_v56, 1  ;;  %v3115_v18 = vmul.f32 %v6872_v55, %v7729_v45  ;;  %v3158_v21 = vmul.f32 %v7732_v52, %v3118_v25  ;;  %v3596_v60 = vmul.f32 %v6820_v35, %v6820_v35  ;;  %v7734_v30 = vld [vmem:[#allocation95_spill] sm:$0xff]  ;;  %v7735_v25 = vld [vmem:[#allocation37_spill] sm:$0xff] }
 0x4b8   :  { %v6953_v33 = vadd.f32 %v7731_v24, %v4017_v53  ;;  %v3602_v58 = vadd.f32 %v3601_v11, %v3595_v62  ;;  %v3159_v0 = vmul.f32 %v7733_v38, %v3119_v63  ;;  %v6961_v14 = vsub.f32 %v6576_v42, %v6773_v34  ;;  %v7736_v62 = vld [vmem:[#allocation40_spill] sm:$0xff] }
 0x4b9   :  { %v2607_v40 = vadd.f32 %v2606_v7, %v2605_v56  ;;  %v3155_v10 = vmul.f32 %v7734_v30, %v3115_v18  ;;  %v3597_v53 = vmul.f32 %v6941_v48, %v6941_v48  ;;  %v3120_v52 = vmul.f32 %v6872_v55, %v7735_v25  ;;  %v6979_v18 = vpop.permute.xlu0 %2684  ;;  %v7739_v25 = vld [vmem:[#allocation36_spill] sm:$0xff] }
 0x4ba   :  { %v4080_v45 = vadd.f32 %v4079_v32, %v6953_v33  ;;  %v3603_v24 = vadd.f32 %v3602_v58, %v3596_v60  ;;  %v3121_v56 = vmul.f32 %v6872_v55, %v7736_v62  ;;  %v3197_v42 = vadd.f32 %v6878_v46, %v3157_v27  ;;  %v7737_v27 = vld [vmem:[#allocation51_spill] sm:$0xff] }
 0x4bb   :  { %v2608_v9 = vmul.f32 0.015625, %v2607_v40  ;;  %v3195_v38 = vadd.f32 %v6785_v39, %v3155_v10  ;;  %v6975_v63 = vsub.f32 %v6579_v13, %v6773_v34  ;;  %v3598_v11 = vmul.f32 %v6861_v57, %v6861_v57  ;;  %v6983_v40 = vpop.permute.xlu1 %3642  ;;  %v7738_v34 = vld [vmem:[#allocation73_spill] sm:$0xff] }
 0x4bc   :  { %v4081_v32 = vrot.slane %v4080_v45, 4  ;;  %v3604_v7 = vadd.f32 %v3603_v24, %v3597_v53  ;;  %v3599_v58 = vmul.f32 %v6961_v14, %v6961_v14  ;;  %v3198_v30 = vadd.f32 %v7737_v27, %v3158_v21 }
 0x4bd   :  { %v2609_v60 = vadd.f32 1e-05, %v2608_v9  ;;  %v5051_v55 = vpack.c.bf16 %v3195_v38, %v3194_v36  ;;  %v3199_v13 = vadd.f32 %v3184_v1, %v3159_v0  ;;  %v3160_v10 = vmul.f32 %v7738_v34, %v3120_v52  ;;  %v3192_v38 = vpop.permute.xlu0 %3191 }
 0x4be   :  { %v4082_v39 = vadd.f32 %v4081_v32, %v4080_v45  ;;  %v3605_v46 = vadd.f32 %v3604_v7, %v3598_v11  ;;  %v3161_v62 = vmul.f32 %v7739_v25, %v3121_v56  ;;  %v5055_v53 = vpack.c.bf16 %v3197_v42, %v3196_v49  ;;  %v7740_v32 = vld [vmem:[#allocation61_spill] sm:$0xff] }
 0x4bf   :  { %5160 = vrsqrt.f32 %v2609_v60  ;;  %5052 = vmatprep.subr.bf16.mxu1 %v5051_v55  ;;  %v3600_v9 = vmul.f32 %v6975_v63, %v6975_v63  ;;  %v3200_v21 = vadd.f32 %v7740_v32, %v3160_v10  ;;  %v5059_v1 = vpack.c.bf16 %v3199_v13, %v3198_v30  ;;  %v6991_v11 = vpop.permute.xlu1 %4145  ;;  %v7741_v10 = vld [vmem:[#allocation101_spill] sm:$0xff] }
 0x4c0   :  { %v4083_v24 = vrot.slane %v4082_v39, 2  ;;  %v3606_v44 = vadd.f32 %v3605_v46, %v3599_v58  ;;  %5054 = vmatpush3.bf16.msra.mxu1 %v5051_v55  ;;  %v3201_v0 = vadd.f32 %v3192_v38, %v3161_v62  ;;  %v7745_v38 = vld [vmem:[#allocation112_spill] sm:$0xff] }
 0x4c1   :  { %5056 = vmatprep.subr.bf16.mxu1 %v5055_v53  ;;  %v6993_v55 = vpop.permute.xlu0 %3666 }
 0x4c2   :  { %v4084_v36 = vadd.f32 %v4083_v24, %v4082_v39  ;;  %v3607_v45 = vadd.f32 %v3606_v44, %v3600_v9  ;;  %v5063_v7 = vpack.c.bf16 %v3201_v0, %v3200_v21 }
 0x4c3   :  { %v6995_v44 = vpop.permute.xlu1 %4149 }
 0x4c4   :  { %v4085_v52 = vrot.slane %v4084_v36, 1  ;;  %v3608_v56 = vrot.slane %v3607_v45, 4  ;;  %5058 = vmatpush3.bf16.msra.mxu1 %v5055_v53  ;;  %v7008_v53 = vld [vmem:[%s7166_s4 + $0x8] sm:$0xff] }
 0x4c5   :  { %5060 = vmatprep.subr.bf16.mxu1 %v5059_v1 }
 0x4c6   :  { %v3609_v49 = vadd.f32 %v3608_v56, %v3607_v45  ;;  %v4086_v42 = vadd.f32 %v4085_v52, %v4084_v36  ;;  %v7746_v52 = vld [vmem:[#allocation96_spill] sm:$0xff] }
 0x4c7   :  { %v7022_v0 = vpop.permute.xlu1 %3686 }
 0x4c8   :  { %v3610_v60 = vrot.slane %v3609_v49, 2  ;;  %5062 = vmatpush3.bf16.msra.mxu1 %v5059_v1  ;;  %v6999_v27 = vmul.f32 0.015625, %v4086_v42  ;;  %v7020_v1 = vpop.permute.xlu0 %4173 }
 0x4c9   :  { %v5161_v58 = vpop.eup %5160  ;;  %5064 = vmatprep.subr.bf16.mxu1 %v5063_v7 }
 0x4ca   :  { %v2613_v39 = vmul.f32 %v5161_v58, %v6776_v28  ;;  %v2612_v46 = vmul.f32 %v5161_v58, %v6765_v8  ;;  %v2614_v30 = vmul.f32 %v5161_v58, %v6788_v26  ;;  %v2615_v13 = vmul.f32 %v5161_v58, %v6791_v47  ;;  %v7742_v28 = vld [vmem:[#allocation74_spill] sm:$0xff]  ;;  %v7743_v8 = vld [vmem:[#allocation52_spill] sm:$0xff] }
 0x4cb   :  { %v2616_v34 = vmul.f32 %v5161_v58, %v6794_v20  ;;  %v3611_v62 = vadd.f32 %v3610_v60, %v3609_v49  ;;  %v2611_v26 = vmul.f32 %v5161_v58, %v6762_v2  ;;  %v7015_v47 = vsub.f32 %v6771_v15, %v6999_v27  ;;  %v7744_v20 = vld [vmem:[#allocation111_spill] sm:$0xff]  ;;  %v7747_v15 = vld [vmem:[#allocation85_spill] sm:$0xff] }
 0x4cc   :  { %v2652_v25 = vmul.f32 %v7741_v10, %v2612_v46  ;;  %5066 = vmatpush3.bf16.msra.mxu1 %v5063_v7  ;;  %v2654_v24 = vmul.f32 %v7742_v28, %v2614_v30  ;;  %v2653_v9 = vmul.f32 %v7743_v8, %v2613_v39  ;;  %v2655_v45 = vmul.f32 %v7744_v20, %v2615_v13  ;;  %v7748_v7 = vld [vmem:[#allocation106_spill] sm:$0xff]  ;;  %v7058_v8 = vpop.permute.xlu1 %4185 }
 0x4cd   :  { %v3612_v36 = vrot.slane %v3611_v62, 1  ;;  %v2656_v32 = vmul.f32 %v7745_v38, %v2616_v34  ;;  %v2618_v21 = vmul.f32 %v5161_v58, %v6801_v29  ;;  %v2617_v49 = vmul.f32 %v5161_v58, %v6834_v31 }
 0x4ce   :  { %v2692_v56 = vadd.f32 %v7746_v52, %v2652_v25  ;;  %v2651_v42 = vmul.f32 %v7747_v15, %v2611_v26  ;;  %v2694_v60 = vadd.f32 %v7748_v7, %v2654_v24  ;;  %v7034_v29 = vsub.f32 %v6768_v16, %v6999_v27  ;;  %v7749_v25 = vld [vmem:[#allocation60_spill] sm:$0xff]  ;;  %v3675_v24 = vpop.permute.xlu0 %3674 }
 0x4cf   :  { %4899 = vmatmul.mubr.msk.f32.vlgmr.msra.gmra.mrb[28].mxu1 %vm225_vm3, %v7008_v53  ;;  %v3613_v2 = vadd.f32 %v3612_v36, %v3611_v62  ;;  %v7038_v39 = vsub.f32 %v6779_v59, %v6999_v27  ;;  %v7042_v46 = vsub.f32 %v6804_v41, %v6999_v27  ;;  %v2693_v30 = vadd.f32 %v6840_v43, %v2653_v9  ;;  %v7750_v62 = vld [vmem:[#allocation56_spill] sm:$0xff] }
 0x4d0   :  { %4936 = vmatprep.mubr.msk.f32.mxu1 %vm225_vm3, %v6674_v22  ;;  %v2691_v58 = vadd.f32 %v6742_v61, %v2651_v42  ;;  %v7048_v13 = vsub.f32 %v6823_v23, %v6999_v27  ;;  %v4096_v16 = vmul.f32 %v7034_v29, %v7034_v29  ;;  %v4097_v59 = vmul.f32 %v7015_v47, %v7015_v47  ;;  %v7751_v23 = vld [vmem:[#allocation72_spill] sm:$0xff]  ;;  %v3651_v7 = vpop.permute.xlu1 %3650 }
 0x4d1   :  { %v3614_v31 = vmul.f32 0.015625, %v3613_v2  ;;  %v2658_v41 = vmul.f32 %v7749_v25, %v2618_v21  ;;  %v2696_v28 = vadd.f32 %v7750_v62, %v2656_v32  ;;  %v4098_v61 = vmul.f32 %v7038_v39, %v7038_v39 }
 0x4d2   :  { %v5035_v10 = vpack.c.bf16 %v2692_v56, %v2691_v58  ;;  %v4104_v43 = vadd.f32 %v4097_v59, %v4096_v16  ;;  %v2657_v9 = vmul.f32 %v7751_v23, %v2617_v49  ;;  %v5039_v36 = vpack.c.bf16 %v2694_v60, %v2693_v30  ;;  %v7078_v42 = vpop.permute.xlu0 %4181 }
 0x4d3   :  { %v3615_v34 = vadd.f32 1e-05, %v3614_v31  ;;  %v2695_v26 = vadd.f32 %v6910_v6, %v2655_v45  ;;  %v7064_v20 = vsub.f32 %v6914_v51, %v6999_v27  ;;  %v4099_v38 = vmul.f32 %v7042_v46, %v7042_v46  ;;  %v7752_v6 = vld [vmem:[#allocation93_spill] sm:$0xff] }
 0x4d4   :  { %5036 = vmatprep.subr.bf16.mxu0 %v5035_v10  ;;  %v4105_v32 = vadd.f32 %v4104_v43, %v4098_v61  ;;  %v7070_v21 = vsub.f32 %v6930_v3, %v6999_v27  ;;  %v4100_v52 = vmul.f32 %v7048_v13, %v7048_v13  ;;  %v2698_v45 = vadd.f32 %v7752_v6, %v2658_v41  ;;  %v7753_v61 = vld [vmem:[#allocation77_spill] sm:$0xff] }
 0x4d5   :  { %5162 = vrsqrt.f32 %v3615_v34  ;;  %5038 = vmatpush3.bf16.msra.mxu0 %v5035_v10  ;;  %v5043_v2 = vpack.c.bf16 %v2696_v28, %v2695_v26  ;;  %v2697_v51 = vadd.f32 %v6979_v18, %v2657_v9  ;;  %v4101_v49 = vmul.f32 %v7064_v20, %v7064_v20  ;;  %v7091_v10 = vpop.permute.xlu1 %4153 }
 0x4d6   :  { %5040 = vmatprep.subr.bf16.mxu0 %v5039_v36  ;;  %v4106_v56 = vadd.f32 %v4105_v32, %v4099_v38  ;;  %v7082_v3 = vsub.f32 %v6953_v33, %v6999_v27  ;;  %v4102_v60 = vmul.f32 %v7070_v21, %v7070_v21  ;;  %v3683_v27 = vpop.permute.xlu0 %3682 }
 0x4d7   :  { %v5047_v58 = vpack.c.bf16 %v2698_v45, %v2697_v51 }
 0x4d8   :  { %v4107_v15 = vadd.f32 %v4106_v56, %v4100_v52  ;;  %v4103_v16 = vmul.f32 %v7082_v3, %v7082_v3 }
 0x4d9   :  { %5042 = vmatpush3.bf16.msra.mxu0 %v5039_v36  ;;  %v4158_v56 = vpop.permute.xlu1 %4157 }
 0x4da   :  { %5044 = vmatprep.subr.bf16.mxu0 %v5043_v2  ;;  %v4108_v31 = vadd.f32 %v4107_v15, %v4101_v49 }
 0x4dc   :  { %v4109_v30 = vadd.f32 %v4108_v31, %v4102_v60 }
 0x4dd   :  { %5046 = vmatpush3.bf16.msra.mxu0 %v5043_v2  ;;  %v3695_v51 = vpop.permute.xlu1 %3694 }
 0x4de   :  { %5048 = vmatprep.subr.bf16.mxu0 %v5047_v58  ;;  %v4110_v41 = vadd.f32 %v4109_v30, %v4103_v16 }
 0x4df   :  { %v5163_v18 = vpop.eup %5162 }
 0x4e0   :  { %v3618_v59 = vmul.f32 %v5163_v18, %v6908_v19  ;;  %v3620_v34 = vmul.f32 %v5163_v18, %v6820_v35  ;;  %v3622_v33 = vmul.f32 %v5163_v18, %v6861_v57  ;;  %v3617_v25 = vmul.f32 %v5163_v18, %v6902_v4  ;;  %v7754_v35 = vld [vmem:[#allocation79_spill] sm:$0xff] }
 0x4e1   :  { %v3619_v62 = vmul.f32 %v5163_v18, %v6816_v12  ;;  %v3621_v28 = vmul.f32 %v5163_v18, %v6941_v48  ;;  %5050 = vmatpush3.bf16.msra.mxu0 %v5047_v58  ;;  %v3624_v19 = vmul.f32 %v5163_v18, %v6975_v63  ;;  %v4111_v57 = vrot.slane %v4110_v41, 4  ;;  %v4190_v63 = vpop.permute.xlu0 %4189 }
 0x4e2   :  { %v3658_v43 = vmul.f32 %v7753_v61, %v3618_v59  ;;  %v3660_v23 = vmul.f32 %v6656_v50, %v3620_v34  ;;  %v3657_v9 = vmul.f32 %v7754_v35, %v3617_v25  ;;  %v3662_v26 = vmul.f32 %v6691_v37, %v3622_v33  ;;  %v7760_v35 = vld [vmem:[#allocation83_spill] sm:$0xff] }
 0x4e3   :  { %v3659_v36 = vmul.f32 %v6798_v54, %v3619_v62  ;;  %v3661_v48 = vmul.f32 %v6983_v40, %v3621_v28  ;;  %v4112_v38 = vadd.f32 %v4111_v57, %v4110_v41  ;;  %v3623_v52 = vmul.f32 %v5163_v18, %v6961_v14  ;;  %v7755_v54 = vld [vmem:[#allocation82_spill] sm:$0xff]  ;;  %v7756_v41 = vld [vmem:[#allocation80_spill] sm:$0xff]  ;;  %v7757_v28 = vld [vmem:[#allocation81_spill] sm:$0xff] }
 0x4e4   :  { %v3698_v4 = vadd.f32 %v6722_v5, %v3658_v43  ;;  %v3700_v12 = vadd.f32 %v6918_v17, %v3660_v23  ;;  %v3697_v32 = vadd.f32 %v6993_v55, %v3657_v9  ;;  %4880 = vmatmul.mubr.msk.f32.vlgmr.msra.gmra.mrb[52].mxu0 %vm225_vm3, %v7008_v53  ;;  %v3664_v17 = vmul.f32 %v7755_v54, %v3624_v19  ;;  %v7758_v43 = vld [vmem:[#allocation84_spill] sm:$0xff]  ;;  %v7759_v23 = vld [vmem:[#allocation54_spill] sm:$0xff]  ;;  %v4194_v19 = vpop.permute.xlu1 %4193 }
 0x4e5   :  { %v3699_v50 = vadd.f32 %v3675_v24, %v3659_v36  ;;  %4917 = vmatprep.mubr.msk.f32.mxu0 %vm225_vm3, %v6674_v22  ;;  %v4113_v37 = vrot.slane %v4112_v38, 2  ;;  %v3702_v40 = vadd.f32 %v7022_v0, %v3662_v26  ;;  %v3701_v55 = vadd.f32 %v3683_v27, %v3661_v48  ;;  %v3691_v2 = vpop.permute.xlu0 %3690  ;;  %v7761_v57 = vld [vmem:[#allocation104_spill] sm:$0xff] }
 0x4e6   :  { %v5067_v5 = vpack.c.bf16 %v3698_v4, %v3697_v32  ;;  %v3663_v24 = vmul.f32 %v3651_v7, %v3623_v52  ;;  %v3704_v22 = vadd.f32 %v3695_v51, %v3664_v17 }
 0x4e7   :  { %v4114_v6 = vadd.f32 %v4113_v37, %v4112_v38  ;;  %v5071_v45 = vpack.c.bf16 %v3700_v12, %v3699_v50  ;;  %v5075_v15 = vpack.c.bf16 %v3702_v40, %v3701_v55 }
 0x4e8   :  { %5068 = vmatprep.subr.bf16.mxu0 %v5067_v5  ;;  %v3703_v60 = vadd.f32 %v3691_v2, %v3663_v24 }
 0x4e9   :  { %5070 = vmatpush3.bf16.msra.mxu0 %v5067_v5  ;;  %v4115_v14 = vrot.slane %v4114_v6, 1  ;;  %v4198_v26 = vpop.permute.xlu0 %4197 }
 0x4ea   :  { %5072 = vmatprep.subr.bf16.mxu0 %v5071_v45  ;;  %v5079_v30 = vpack.c.bf16 %v3704_v22, %v3703_v60 }
 0x4eb   :  { %v4116_v49 = vadd.f32 %v4115_v14, %v4114_v6 }
 0x4ed   :  { %5074 = vmatpush3.bf16.msra.mxu0 %v5071_v45  ;;  %v4117_v31 = vmul.f32 0.015625, %v4116_v49 }
 0x4ee   :  { %5076 = vmatprep.subr.bf16.mxu0 %v5075_v15 }
 0x4ef   :  { %v4118_v58 = vadd.f32 1e-05, %v4117_v31 }
 0x4f1   :  { %5078 = vmatpush3.bf16.msra.mxu0 %v5075_v15  ;;  %5164 = vrsqrt.f32 %v4118_v58 }
 0x4f2   :  { %5080 = vmatprep.subr.bf16.mxu0 %v5079_v30 }
 0x4f5   :  { %5082 = vmatpush3.bf16.msra.mxu0 %v5079_v30 }
 0x4f8   :  { %4918 = vmatmul.mubr.msk.f32.vlgmr.msra.gmra.mrb[54].mxu0 %vm225_vm3, %v7008_v53 }
 0x4fb   :  { %v5165_v0 = vpop.eup %5164 }
 0x4fc   :  { %v4120_v7 = vmul.f32 %v5165_v0, %v7034_v29  ;;  %v4121_v18 = vmul.f32 %v5165_v0, %v7015_v47  ;;  %v4122_v16 = vmul.f32 %v5165_v0, %v7038_v39  ;;  %v4123_v59 = vmul.f32 %v5165_v0, %v7042_v46 }
 0x4fd   :  { %v4124_v34 = vmul.f32 %v5165_v0, %v7048_v13  ;;  %v4125_v33 = vmul.f32 %v5165_v0, %v7064_v20  ;;  %v4126_v27 = vmul.f32 %v5165_v0, %v7070_v21  ;;  %v4127_v25 = vmul.f32 %v5165_v0, %v7082_v3 }
 0x4fe   :  { %v4160_v62 = vmul.f32 %v7756_v41, %v4120_v7  ;;  %v4161_v61 = vmul.f32 %v7757_v28, %v4121_v18  ;;  %v4162_v29 = vmul.f32 %v7758_v43, %v4122_v16  ;;  %v4163_v47 = vmul.f32 %v7759_v23, %v4123_v59 }
 0x4ff   :  { %v4164_v39 = vmul.f32 %v6991_v11, %v4124_v34  ;;  %v4165_v46 = vmul.f32 %v6995_v44, %v4125_v33  ;;  %v4166_v13 = vmul.f32 %v7091_v10, %v4126_v27  ;;  %v4167_v20 = vmul.f32 %v4158_v56, %v4127_v25 }
 0x500   :  { %v4200_v21 = vadd.f32 %v7760_v35, %v4160_v62  ;;  %v4201_v3 = vadd.f32 %v7020_v1, %v4161_v61  ;;  %v4203_v9 = vadd.f32 %v7078_v42, %v4163_v47  ;;  %v4202_v36 = vadd.f32 %v7761_v57, %v4162_v29 }
 0x501   :  { %v4205_v4 = vadd.f32 %v4190_v63, %v4165_v46  ;;  %v4204_v12 = vadd.f32 %v7058_v8, %v4164_v39  ;;  %v4207_v48 = vadd.f32 %v4198_v26, %v4167_v20  ;;  %v4206_v38 = vadd.f32 %v4194_v19, %v4166_v13 }
 0x502   :  { %v5083_v11 = vpack.c.bf16 %v4201_v3, %v4200_v21  ;;  %v5087_v32 = vpack.c.bf16 %v4203_v9, %v4202_v36 }
 0x503   :  { %v5091_v44 = vpack.c.bf16 %v4205_v4, %v4204_v12  ;;  %v5095_v50 = vpack.c.bf16 %v4207_v48, %v4206_v38 }
 0x504   :  { %5084 = vmatprep.subr.bf16.mxu1 %v5083_v11 }
 0x505   :  { %5086 = vmatpush3.bf16.msra.mxu1 %v5083_v11 }
 0x506   :  { %5088 = vmatprep.subr.bf16.mxu1 %v5087_v32 }
 0x509   :  { %5090 = vmatpush3.bf16.msra.mxu1 %v5087_v32 }
 0x50a   :  { %5092 = vmatprep.subr.bf16.mxu1 %v5091_v44 }
 0x50d   :  { %5094 = vmatpush3.bf16.msra.mxu1 %v5091_v44 }
 0x50e   :  { %5096 = vmatprep.subr.bf16.mxu1 %v5095_v50 }
 0x511   :  { %5098 = vmatpush3.bf16.msra.mxu1 %v5095_v50 }
 0x514   :  { %4937 = vmatmul.mubr.msk.f32.vlgmr.msra.gmra.mrb[30].mxu1 %vm225_vm3, %v7008_v53 }
 0x516   :  { %v2706_v1 = vpop.permute.xlu1 %2705 }
 0x518   :  { %v2711_v37 = vpop.permute.xlu0 %2710 }
 0x51a   :  { %v3209_v42 = vpop.permute.xlu1 %3208 }
 0x51c   :  { %v3712_v45 = vpop.permute.xlu0 %3711 }
 0x51e   :  { %v3214_v8 = vpop.permute.xlu1 %3213 }
 0x520   :  { %v4215_v49 = vpop.permute.xlu0 %4214 }
 0x522   :  { %v3717_v40 = vpop.permute.xlu1 %3716 }
 0x526   :  { %v4220_v2 = vpop.permute.xlu1 %4219 }
 0x5a2   :  { %v4900_v10 = vpop.f32.mrb[28].mxu1 }
 0x5a3   :  { %v3294_v52 = vadd.f32 %v4900_v10, %v3214_v8  ;;  %v3288_v63 = vpop.f32.mrb[29].mxu1 }
 0x5a4   :  { %v3289_v56 = vadd.f32 %v3288_v63, %v3209_v42 }
 0x5a5   :  { %3298 = vst [vmem:[%s7168_s6 + $0x18] sm:$0xff] %v3294_v52 }
 0x5a6   :  { %3297 = vst [vmem:[%s7168_s6 + $0x10] sm:$0xff] %v3289_v56 }
 0x5b7   :  { %v4881_v5 = vpop.f32.mrb[52].mxu0 }
 0x5b8   :  { %v2791_v54 = vadd.f32 %v4881_v5, %v2711_v37  ;;  %v2785_v17 = vpop.f32.mrb[53].mxu0 }
 0x5b9   :  { %v2786_v53 = vadd.f32 %v2785_v17, %v2706_v1 }
 0x5ba   :  { %2795 = vst [vmem:[%s7168_s6 + $0x8] sm:$0xff] %v2791_v54 }
 0x5bb   :  { %2794 = vst [vmem:[%s7168_s6] sm:$0xff] %v2786_v53 }
 0x5cb   :  { %v4919_v6 = vpop.f32.mrb[54].mxu0 }
 0x5cc   :  { %v3797_v55 = vadd.f32 %v4919_v6, %v3717_v40  ;;  %v3791_v24 = vpop.f32.mrb[55].mxu0 }
 0x5cd   :  { %v3792_v14 = vadd.f32 %v3791_v24, %v3712_v45 }
 0x5ce   :  { %3801 = vst [vmem:[%s7168_s6 + $0x28] sm:$0xff] %v3797_v55 }
 0x5cf   :  { %3800 = vst [vmem:[%s7168_s6 + $0x20] sm:$0xff] %v3792_v14 }
 0x5e7   :  { %v4938_v51 = vpop.f32.mrb[30].mxu1 }
 0x5e8   :  { %v4300_v15 = vadd.f32 %v4938_v51, %v4220_v2  ;;  %v4294_v60 = vpop.f32.mrb[31].mxu1 }
 0x5e9   :  { %v4295_v22 = vadd.f32 %v4294_v60, %v4215_v49 }
 0x5ea   :  { %4304 = vst [vmem:[%s7168_s6 + $0x38] sm:$0xff] %v4300_v15 }
 0x5eb   :  { %4303 = vst [vmem:[%s7168_s6 + $0x30] sm:$0xff] %v4295_v22 }

</bundles_post_ra>
